<compile_context>
chip_gen: v7x
topology: tpu7x:2x2x1
jax: 0.10.0
libtpu: 0.0.40
codegen_flags: <defaults>
</compile_context>

<pallas_src>
import jax
import jax.numpy as jnp
from jax import lax
from jax.experimental import pallas as pl
from jax.experimental.pallas import tpu as pltpu

# ---------------- small synthetic config ----------------
VOCAB = 256
HIDDEN = 128
N_HEADS = 4
HEAD_DIM = HIDDEN // N_HEADS
INTER = 256
N_LAYERS = 2
BATCH = 2
SEQ = 16
PROT_DIM = 64      # prot_output_size
PROT_VOCAB = 32    # number of cached protein vectors
RMS_EPS = 1e-6
NEG_INF = -1e9


# ---------------- constant tables (built once, constant-folded under jit) ----------------
def _rotate_half_matrix():
    """Block-diagonal sign/permute matrix R such that x @ R == rotate_half(x) per head."""
    half = HEAD_DIM // 2
    eye = jnp.eye(half, dtype=jnp.float32)
    zero = jnp.zeros((half, half), jnp.float32)
    blk = jnp.block([[zero, eye], [-eye, zero]])            # (Dh, Dh)
    return jnp.kron(jnp.eye(N_HEADS, dtype=jnp.float32), blk)   # (H, H)


def _rope_tables():
    """cos/sin tables tiled to full (B*S, H) so RoPE is a pure elementwise op in-kernel."""
    pos = jnp.arange(SEQ, dtype=jnp.float32)
    inv_freq = 1.0 / (10000.0 ** (jnp.arange(0, HEAD_DIM, 2, dtype=jnp.float32) / HEAD_DIM))
    freqs = pos[:, None] * inv_freq[None, :]                     # (S, Dh/2)
    cos = jnp.concatenate([jnp.cos(freqs), jnp.cos(freqs)], -1)  # (S, Dh)
    sin = jnp.concatenate([jnp.sin(freqs), jnp.sin(freqs)], -1)
    cos = jnp.tile(jnp.tile(cos, (1, N_HEADS)), (BATCH, 1))      # (B*S, H)
    sin = jnp.tile(jnp.tile(sin, (1, N_HEADS)), (BATCH, 1))
    return cos, sin


# ---------------- kernel 1: protein embedding projection + masked mix ----------------
def _embed_mix_kernel(tok_ref, prot_ref, w_ref, b_ref, mask_ref, o_ref):
    prot = jnp.dot(prot_ref[...], w_ref[...], preferred_element_type=jnp.float32)
    prot = prot + b_ref[...].astype(jnp.float32)                 # (M, H)
    tok = tok_ref[...].astype(jnp.float32)
    use_prot = mask_ref[...] > 0                                 # (M, 1) -> broadcast over H
    o_ref[...] = jnp.where(use_prot, prot, tok).astype(o_ref.dtype)


def embed_mix(tok_emb2d, prot_raw, w, b, mask_col):
    M, H = tok_emb2d.shape
    return pl.pallas_call(
        _embed_mix_kernel,
        out_shape=jax.ShapeDtypeStruct((M, H), tok_emb2d.dtype),
        grid=(1,),
        in_specs=[pl.BlockSpec((M, H), lambda i: (0, 0)),
                  pl.BlockSpec((M, PROT_DIM), lambda i: (0, 0)),
                  pl.BlockSpec((PROT_DIM, H), lambda i: (0, 0)),
                  pl.BlockSpec((1, H), lambda i: (0, 0)),
                  pl.BlockSpec((M, 1), lambda i: (0, 0))],
        out_specs=pl.BlockSpec((M, H), lambda i: (0, 0)),
    )(tok_emb2d, prot_raw, w, b, mask_col)


# ---------------- kernel 2: fully fused decoder layer ----------------
def _layer_kernel(x_ref, mask_ref, cos_ref, sin_ref, rot_ref,
                  in_norm_ref, post_norm_ref,
                  wqkv_ref, wo_ref, wgu_ref, wd_ref, o_ref):
    f32 = jnp.float32
    x = x_ref[...].astype(f32)                                   # (M, H)

    # --- input RMSNorm ---
    var = jnp.mean(x * x, axis=-1, keepdims=True)
    h = x * lax.rsqrt(var + RMS_EPS) * in_norm_ref[...].astype(f32)

    # --- fused QKV projection (H -> 3H), f32 accumulate ---
    qkv = jnp.dot(h.astype(jnp.bfloat16), wqkv_ref[...],
                  preferred_element_type=f32)                    # (M, 3H)
    q = qkv[:, :HIDDEN]
    k = qkv[:, HIDDEN:2 * HIDDEN]
    v = qkv[:, 2 * HIDDEN:]

    # --- RoPE, full-width: rotate_half(x) == x @ R (block-diag sign-permute) ---
    cos = cos_ref[...]
    sin = sin_ref[...]
    rot = rot_ref[...]
    q = q * cos + jnp.dot(q, rot, preferred_element_type=f32) * sin
    k = k * cos + jnp.dot(k, rot, preferred_element_type=f32) * sin

    # --- attention bias built in-kernel: causal + key-padding ---
    rows = lax.broadcasted_iota(jnp.int32, (SEQ, SEQ), 0)
    cols = lax.broadcasted_iota(jnp.int32, (SEQ, SEQ), 1)
    causal = rows >= cols
    mask = mask_ref[...]                                         # (B, S) int32
    scale = 1.0 / (HEAD_DIM ** 0.5)

    batch_out = []
    for b in range(BATCH):
        keep = jnp.logical_and(causal, mask[b:b + 1, :] > 0)     # (S, S)
        bias = jnp.where(keep, 0.0, NEG_INF).astype(f32)
        head_out = []
        for hh in range(N_HEADS):
            r0, r1 = b * SEQ, (b + 1) * SEQ
            c0, c1 = hh * HEAD_DIM, (hh + 1) * HEAD_DIM
            qh = q[r0:r1, c0:c1]                                 # (S, Dh)
            kh = k[r0:r1, c0:c1]
            vh = v[r0:r1, c0:c1]
            s = lax.dot_general(qh, kh, (((1,), (1,)), ((), ())),
                                preferred_element_type=f32) * scale + bias
            m = jnp.max(s, axis=-1, keepdims=True)
            p = jnp.exp(s - m)
            p = p / jnp.sum(p, axis=-1, keepdims=True)
            head_out.append(jnp.dot(p, vh, preferred_element_type=f32))
        batch_out.append(jnp.concatenate(head_out, axis=-1))     # (S, H)
    attn = jnp.concatenate(batch_out, axis=0)                    # (M, H)

    # --- output projection + residual (fused) ---
    x = x + jnp.dot(attn.astype(jnp.bfloat16), wo_ref[...],
                    preferred_element_type=f32)

    # --- post-attention RMSNorm ---
    var2 = jnp.mean(x * x, axis=-1, keepdims=True)
    h2 = x * lax.rsqrt(var2 + RMS_EPS) * post_norm_ref[...].astype(f32)

    # --- fused gate/up + SwiGLU + down projection + residual ---
    gu = jnp.dot(h2.astype(jnp.bfloat16), wgu_ref[...],
                 preferred_element_type=f32)                     # (M, 2*INTER)
    g = gu[:, :INTER]
    u = gu[:, INTER:]
    act = g * jax.nn.sigmoid(g) * u
    x = x + jnp.dot(act.astype(jnp.bfloat16), wd_ref[...],
                    preferred_element_type=f32)

    o_ref[...] = x.astype(o_ref.dtype)


def decoder_layer(x2d, attn_mask, cos, sin, rot, layer):
    M, H = x2d.shape
    return pl.pallas_call(
        _layer_kernel,
        out_shape=jax.ShapeDtypeStruct((M, H), x2d.dtype),
        grid=(1,),
        in_specs=[pl.BlockSpec((M, H), lambda i: (0, 0)),
                  pl.BlockSpec((BATCH, SEQ), lambda i: (0, 0)),
                  pl.BlockSpec((M, H), lambda i: (0, 0)),
                  pl.BlockSpec((M, H), lambda i: (0, 0)),
                  pl.BlockSpec((H, H), lambda i: (0, 0)),
                  pl.BlockSpec((1, H), lambda i: (0, 0)),
                  pl.BlockSpec((1, H), lambda i: (0, 0)),
                  pl.BlockSpec((H, 3 * H), lambda i: (0, 0)),
                  pl.BlockSpec((H, H), lambda i: (0, 0)),
                  pl.BlockSpec((H, 2 * INTER), lambda i: (0, 0)),
                  pl.BlockSpec((INTER, H), lambda i: (0, 0))],
        out_specs=pl.BlockSpec((M, H), lambda i: (0, 0)),
        compiler_params=pltpu.CompilerParams(dimension_semantics=("arbitrary",)),
    )(x2d, attn_mask, cos, sin, rot,
      layer["in_norm"], layer["post_norm"],
      layer["wqkv"], layer["wo"], layer["wgu"], layer["wd"])


# ---------------- kernel 3: final norm + lm_head + both CE losses ----------------
def _ce_mean(logits, labels, valid):
    """Mean CE over rows with valid==1 (matches torch CrossEntropyLoss mean). Returns (1,1)."""
    m = jnp.max(logits, axis=-1, keepdims=True)
    lse = jnp.log(jnp.sum(jnp.exp(logits - m), axis=-1, keepdims=True)) + m
    col = lax.broadcasted_iota(jnp.int32, logits.shape, 1)
    tgt = jnp.sum(jnp.where(col == labels, logits, 0.0), axis=-1, keepdims=True)
    nll = (lse - tgt) * valid                                    # (M, 1)
    nll_sum = jnp.sum(nll, axis=0, keepdims=True)                # (1, 1)
    cnt = jnp.sum(valid, axis=0, keepdims=True)                  # (1, 1)
    return nll_sum / jnp.maximum(cnt, 1.0)


def _head_kernel(x_ref, fnorm_ref, wlm_ref, w2p_ref, pvt_ref,
                 lm_lab_ref, lm_val_ref, pr_lab_ref, pr_val_ref,
                 logits_ref, loss_ref):
    f32 = jnp.float32
    x = x_ref[...].astype(f32)                                   # (M, H)
    var = jnp.mean(x * x, axis=-1, keepdims=True)
    hidden = x * lax.rsqrt(var + RMS_EPS) * fnorm_ref[...].astype(f32)
    hb = hidden.astype(jnp.bfloat16)

    # lm_head: keep f32 accumulator (matches torch `.float()` precision intent)
    logits = jnp.dot(hb, wlm_ref[...], preferred_element_type=f32)   # (M, VOCAB) f32
    logits_ref[...] = logits
    lm_loss = _ce_mean(logits, lm_lab_ref[...], lm_val_ref[...])

    # protein LM branch: llm2prot -> logits vs pre-transposed prot_vectors -> masked CE
    h4p = jnp.dot(hb, w2p_ref[...], preferred_element_type=f32)      # (M, PROT_DIM)
    prot_logits = jnp.dot(h4p.astype(jnp.bfloat16), pvt_ref[...],
                          preferred_element_type=f32)                # (M, PROT_VOCAB)
    prot_loss = _ce_mean(prot_logits, pr_lab_ref[...], pr_val_ref[...])

    loss_ref[...] = lm_loss + prot_loss


def head_and_loss(x2d, fnorm, wlm, w2p, pvt, lm_lab, lm_val, pr_lab, pr_val):
    M, H = x2d.shape
    return pl.pallas_call(
        _head_kernel,
        out_shape=(jax.ShapeDtypeStruct((M, VOCAB), jnp.float32),
                   jax.ShapeDtypeStruct((1, 1), jnp.float32)),
        grid=(1,),
        in_specs=[pl.BlockSpec((M, H), lambda i: (0, 0)),
                  pl.BlockSpec((1, H), lambda i: (0, 0)),
                  pl.BlockSpec((H, VOCAB), lambda i: (0, 0)),
                  pl.BlockSpec((H, PROT_DIM), lambda i: (0, 0)),
                  pl.BlockSpec((PROT_DIM, PROT_VOCAB), lambda i: (0, 0)),
                  pl.BlockSpec((M, 1), lambda i: (0, 0)),
                  pl.BlockSpec((M, 1), lambda i: (0, 0)),
                  pl.BlockSpec((M, 1), lambda i: (0, 0)),
                  pl.BlockSpec((M, 1), lambda i: (0, 0))],
        out_specs=(pl.BlockSpec((M, VOCAB), lambda i: (0, 0)),
                   pl.BlockSpec((1, 1), lambda i: (0, 0))),
    )(x2d, fnorm, wlm, w2p, pvt, lm_lab, lm_val, pr_lab, pr_val)


# ---------------- params ----------------
def init_params(key):
    def nrm(k, shape, scale=0.02):
        return (scale * jax.random.normal(k, shape, dtype=jnp.float32)).astype(jnp.bfloat16)

    keys = iter(jax.random.split(key, 64))
    prot_vectors = nrm(next(keys), (PROT_VOCAB, PROT_DIM), scale=1.0)
    p = {
        "embed": nrm(next(keys), (VOCAB, HIDDEN)),
        "lm_head": nrm(next(keys), (HIDDEN, VOCAB)),
        "final_norm": jnp.ones((1, HIDDEN), jnp.bfloat16),
        "layers": [],
        # protein side (init_prot_model)
        "prot_vectors": prot_vectors,
        "prot_vectors_t": prot_vectors.T,              # pre-transposed once at init
        "prot2llm_w": nrm(next(keys), (PROT_DIM, HIDDEN)),
        "prot2llm_b": jnp.zeros((1, HIDDEN), jnp.bfloat16),
        "llm2prot_w": nrm(next(keys), (HIDDEN, PROT_DIM)),   # bias=False in torch
    }
    for _ in range(N_LAYERS):
        p["layers"].append({
            "in_norm": jnp.ones((1, HIDDEN), jnp.bfloat16),
            "post_norm": jnp.ones((1, HIDDEN), jnp.bfloat16),
            "wqkv": nrm(next(keys), (HIDDEN, 3 * HIDDEN)),   # fused q|k|v
            "wo": nrm(next(keys), (HIDDEN, HIDDEN)),
            "wgu": nrm(next(keys), (HIDDEN, 2 * INTER)),     # fused gate|up
            "wd": nrm(next(keys), (INTER, HIDDEN)),
        })
    return p


# ---------------- forward ----------------
def prot_llm_forward(params, input_ids, attention_mask, prot_ids, prot_emb_mask,
                     labels, prot_labels):
    B, S = input_ids.shape
    H = HIDDEN
    M = B * S

    cos, sin = _rope_tables()
    rot = _rotate_half_matrix()

    # --- protein embeddings (gather in XLA) + token embeddings + masked mix (1 kernel) ---
    prot_raw = jnp.take(params["prot_vectors"], prot_ids.reshape(-1), axis=0)   # (M, PROT_DIM)
    tok_emb = jnp.take(params["embed"], input_ids.reshape(-1), axis=0)          # (M, H)
    prot_mask_col = prot_emb_mask.reshape(M, 1).astype(jnp.int32)
    x = embed_mix(tok_emb, prot_raw, params["prot2llm_w"], params["prot2llm_b"],
                  prot_mask_col)                                                # (M, H) bf16

    # --- fused decoder layers (1 kernel per layer, use_cache=False path) ---
    attn_mask = attention_mask.astype(jnp.int32)                                # (B, S)
    for layer in params["layers"]:
        x = decoder_layer(x, attn_mask, cos, sin, rot, layer)

    # --- dense, shifted per-row labels / validity (static shapes) ---
    zcol_i = jnp.zeros((B, 1), jnp.int32)
    zcol_b = jnp.zeros((B, 1), dtype=bool)
    lm_tgt = jnp.concatenate([labels[:, 1:].astype(jnp.int32), zcol_i], axis=1)
    lm_ok = jnp.concatenate([labels[:, 1:] != -100, zcol_b], axis=1)            # ignore_index=-100
    lm_lab = jnp.where(lm_ok, lm_tgt, 0).reshape(M, 1)
    lm_val = lm_ok.reshape(M, 1).astype(jnp.float32)

    pr_tgt = jnp.concatenate([prot_labels.astype(jnp.int32), zcol_i], axis=1)
    pr_ok = jnp.concatenate([prot_emb_mask[:, 1:], zcol_b], axis=1)
    pr_lab = jnp.where(pr_ok, pr_tgt, 0).reshape(M, 1)
    pr_val = pr_ok.reshape(M, 1).astype(jnp.float32)

    # --- final norm + lm_head (f32 logits) + both CE reductions (1 kernel) ---
    logits2d, loss = head_and_loss(
        x, params["final_norm"], params["lm_head"],
        params["llm2prot_w"], params["prot_vectors_t"],
        lm_lab, lm_val, pr_lab, pr_val)

    lm_logits = logits2d.reshape(B, S, VOCAB)
    return loss[0, 0], lm_logits


if __name__ == "__main__":
    key = jax.random.PRNGKey(0)
    kp, k1, k2, k3, k4 = jax.random.split(key, 5)
    params = init_params(kp)

    input_ids = jax.random.randint(k1, (BATCH, SEQ), 0, VOCAB, dtype=jnp.int32)
    attention_mask = jnp.ones((BATCH, SEQ), dtype=jnp.int32)

    # one protein token per row (position 3); prot_ids/prot_labels in dense form
    prot_emb_mask = jnp.zeros((BATCH, SEQ), dtype=bool).at[:, 3].set(True)
    prot_ids = jnp.zeros((BATCH, SEQ), dtype=jnp.int32).at[:, 3].set(
        jax.random.randint(k2, (BATCH,), 0, PROT_VOCAB, dtype=jnp.int32))
    labels = jax.random.randint(k3, (BATCH, SEQ), 0, VOCAB, dtype=jnp.int32)
    prot_labels = jax.random.randint(k4, (BATCH, SEQ - 1), 0, PROT_VOCAB, dtype=jnp.int32)

    fwd = jax.jit(prot_llm_forward)
    loss, logits = fwd(params, input_ids, attention_mask, prot_ids, prot_emb_mask,
                       labels, prot_labels)
    jax.block_until_ready((loss, logits))
    assert logits.shape == (BATCH, SEQ, VOCAB) and logits.dtype == jnp.float32
    assert loss.shape == () and bool(jnp.isfinite(loss))
    print("KERNEL_OK")
</pallas_src>

<mosaic_0001>
module attributes {stable_mosaic.version = 11 : i64} {
  func.func @_embed_mix_kernel(%arg0: i32, %arg1: memref<32x128xbf16, #tpu.memory_space<vmem>>, %arg2: memref<32x64xbf16, #tpu.memory_space<vmem>>, %arg3: memref<64x128xbf16, #tpu.memory_space<vmem>>, %arg4: memref<1x128xbf16, #tpu.memory_space<vmem>>, %arg5: memref<32x1xi32, #tpu.memory_space<vmem>>, %arg6: memref<32x128xbf16, #tpu.memory_space<vmem>>) attributes {dimension_semantics = [#tpu.dimension_semantics<arbitrary>], iteration_bounds = array<i64: 1>, scalar_prefetch = 0 : i64, scratch_operands = 0 : i64, tpu.core_type = #tpu.core_type<tc>, window_params = [{pipeline_mode = #tpu.pipeline_mode<synchronous>, transform_indices = @transform_0, window_bounds = array<i64: 32, 128>}, {pipeline_mode = #tpu.pipeline_mode<synchronous>, transform_indices = @transform_1, window_bounds = array<i64: 32, 64>}, {pipeline_mode = #tpu.pipeline_mode<synchronous>, transform_indices = @transform_2, window_bounds = array<i64: 64, 128>}, {pipeline_mode = #tpu.pipeline_mode<synchronous>, transform_indices = @transform_3, window_bounds = array<i64: 1, 128>}, {pipeline_mode = #tpu.pipeline_mode<synchronous>, transform_indices = @transform_4, window_bounds = array<i64: 32, 1>}, {pipeline_mode = #tpu.pipeline_mode<synchronous>, transform_indices = @transform_5, window_bounds = array<i64: 32, 128>}]} {
    %c0 = arith.constant 0 : index
    %c0_0 = arith.constant 0 : index
    %0 = vector.load %arg2[%c0, %c0_0] : memref<32x64xbf16, #tpu.memory_space<vmem>>, vector<32x64xbf16>
    %c0_1 = arith.constant 0 : index
    %c0_2 = arith.constant 0 : index
    %1 = vector.load %arg3[%c0_1, %c0_2] : memref<64x128xbf16, #tpu.memory_space<vmem>>, vector<64x128xbf16>
    %cst = arith.constant dense<0.000000e+00> : vector<32x128xf32>
    %2 = tpu.matmul %0, %1, %cst {dimension_numbers = #tpu.dot_dimension_numbers<[1], [0], [0], [1], [0, 0, 1, 1], [], []>} : vector<32x64xbf16>, vector<64x128xbf16>, vector<32x128xf32> -> vector<32x128xf32>
    %c0_3 = arith.constant 0 : index
    %c0_4 = arith.constant 0 : index
    %3 = vector.load %arg4[%c0_3, %c0_4] : memref<1x128xbf16, #tpu.memory_space<vmem>>, vector<1x128xbf16>
    %4 = arith.extf %3 : vector<1x128xbf16> to vector<1x128xf32>
    %5 = vector.broadcast %4 : vector<1x128xf32> to vector<32x128xf32>
    %6 = arith.addf %2, %5 : vector<32x128xf32>
    %c0_5 = arith.constant 0 : index
    %c0_6 = arith.constant 0 : index
    %7 = vector.load %arg1[%c0_5, %c0_6] : memref<32x128xbf16, #tpu.memory_space<vmem>>, vector<32x128xbf16>
    %8 = arith.extf %7 : vector<32x128xbf16> to vector<32x128xf32>
    %c0_7 = arith.constant 0 : index
    %c0_8 = arith.constant 0 : index
    %9 = vector.load %arg5[%c0_7, %c0_8] : memref<32x1xi32, #tpu.memory_space<vmem>>, vector<32x1xi32>
    %c0_i32 = arith.constant 0 : i32
    %10 = vector.broadcast %c0_i32 : i32 to vector<32x1xi32>
    %11 = arith.cmpi sgt, %9, %10 : vector<32x1xi32>
    %12 = vector.shape_cast %11 : vector<32x1xi1> to vector<32x1xi1>
    %13 = vector.broadcast %12 : vector<32x1xi1> to vector<32x128xi1>
    %14 = arith.select %13, %6, %8 : vector<32x128xi1>, vector<32x128xf32>
    %15 = arith.truncf %14 : vector<32x128xf32> to vector<32x128xbf16>
    %c0_9 = arith.constant 0 : index
    %c0_10 = arith.constant 0 : index
    %16 = vector.load %arg6[%c0_9, %c0_10] : memref<32x128xbf16, #tpu.memory_space<vmem>>, vector<32x128xbf16>
    tpu.vector_store %arg6[%c0_9, %c0_10], %15 {strides = array<i32>} : memref<32x128xbf16, #tpu.memory_space<vmem>>, vector<32x128xbf16>,
    return
  }
  func.func @transform_0(%arg0: i32) -> (i32, i32) {
    %c0_i32 = arith.constant 0 : i32
    %c0_i32_0 = arith.constant 0 : i32
    %c0_i32_1 = arith.constant 0 : i32
    return %c0_i32, %c0_i32_0 : i32, i32
  }
  func.func @transform_1(%arg0: i32) -> (i32, i32) {
    %c0_i32 = arith.constant 0 : i32
    %c0_i32_0 = arith.constant 0 : i32
    %c0_i32_1 = arith.constant 0 : i32
    return %c0_i32, %c0_i32_0 : i32, i32
  }
  func.func @transform_2(%arg0: i32) -> (i32, i32) {
    %c0_i32 = arith.constant 0 : i32
    %c0_i32_0 = arith.constant 0 : i32
    %c0_i32_1 = arith.constant 0 : i32
    return %c0_i32, %c0_i32_0 : i32, i32
  }
  func.func @transform_3(%arg0: i32) -> (i32, i32) {
    %c0_i32 = arith.constant 0 : i32
    %c0_i32_0 = arith.constant 0 : i32
    %c0_i32_1 = arith.constant 0 : i32
    return %c0_i32, %c0_i32_0 : i32, i32
  }
  func.func @transform_4(%arg0: i32) -> (i32, i32) {
    %c0_i32 = arith.constant 0 : i32
    %c0_i32_0 = arith.constant 0 : i32
    %c0_i32_1 = arith.constant 0 : i32
    return %c0_i32, %c0_i32_0 : i32, i32
  }
  func.func @transform_5(%arg0: i32) -> (i32, i32) {
    %c0_i32 = arith.constant 0 : i32
    %c0_i32_0 = arith.constant 0 : i32
    %c0_i32_1 = arith.constant 0 : i32
    return %c0_i32, %c0_i32_0 : i32, i32
  }
}

module attributes {stable_mosaic.version = 11 : i64} {
  func.func @_layer_kernel(%arg0: i32, %arg1: memref<32x128xbf16, #tpu.memory_space<vmem>>, %arg2: memref<2x16xi32, #tpu.memory_space<vmem>>, %arg3: memref<32x128xf32, #tpu.memory_space<vmem>>, %arg4: memref<32x128xf32, #tpu.memory_space<vmem>>, %arg5: memref<128x128xf32, #tpu.memory_space<vmem>>, %arg6: memref<1x128xbf16, #tpu.memory_space<vmem>>, %arg7: memref<1x128xbf16, #tpu.memory_space<vmem>>, %arg8: memref<128x384xbf16, #tpu.memory_space<vmem>>, %arg9: memref<128x128xbf16, #tpu.memory_space<vmem>>, %arg10: memref<128x512xbf16, #tpu.memory_space<vmem>>, %arg11: memref<256x128xbf16, #tpu.memory_space<vmem>>, %arg12: memref<32x128xbf16, #tpu.memory_space<vmem>>) attributes {dimension_semantics = [#tpu.dimension_semantics<arbitrary>], iteration_bounds = array<i64: 1>, scalar_prefetch = 0 : i64, scratch_operands = 0 : i64, tpu.core_type = #tpu.core_type<tc>, window_params = [{pipeline_mode = #tpu.pipeline_mode<synchronous>, transform_indices = @transform_0, window_bounds = array<i64: 32, 128>}, {pipeline_mode = #tpu.pipeline_mode<synchronous>, transform_indices = @transform_1, window_bounds = array<i64: 2, 16>}, {pipeline_mode = #tpu.pipeline_mode<synchronous>, transform_indices = @transform_2, window_bounds = array<i64: 32, 128>}, {pipeline_mode = #tpu.pipeline_mode<synchronous>, transform_indices = @transform_3, window_bounds = array<i64: 32, 128>}, {pipeline_mode = #tpu.pipeline_mode<synchronous>, transform_indices = @transform_4, window_bounds = array<i64: 128, 128>}, {pipeline_mode = #tpu.pipeline_mode<synchronous>, transform_indices = @transform_5, window_bounds = array<i64: 1, 128>}, {pipeline_mode = #tpu.pipeline_mode<synchronous>, transform_indices = @transform_6, window_bounds = array<i64: 1, 128>}, {pipeline_mode = #tpu.pipeline_mode<synchronous>, transform_indices = @transform_7, window_bounds = array<i64: 128, 384>}, {pipeline_mode = #tpu.pipeline_mode<synchronous>, transform_indices = @transform_8, window_bounds = array<i64: 128, 128>}, {pipeline_mode = #tpu.pipeline_mode<synchronous>, transform_indices = @transform_9, window_bounds = array<i64: 128, 512>}, {pipeline_mode = #tpu.pipeline_mode<synchronous>, transform_indices = @transform_10, window_bounds = array<i64: 256, 128>}, {pipeline_mode = #tpu.pipeline_mode<synchronous>, transform_indices = @transform_11, window_bounds = array<i64: 32, 128>}]} {
    %c0 = arith.constant 0 : index
    %c0_0 = arith.constant 0 : index
    %0 = vector.load %arg1[%c0, %c0_0] : memref<32x128xbf16, #tpu.memory_space<vmem>>, vector<32x128xbf16>
    %1 = arith.extf %0 : vector<32x128xbf16> to vector<32x128xf32>
    %2 = arith.mulf %1, %1 : vector<32x128xf32>
    %cst = arith.constant dense<0.000000e+00> : vector<32xf32>
    %3 = vector.multi_reduction <add>, %2, %cst [1] : vector<32x128xf32> to vector<32xf32>
    %4 = vector.shape_cast %3 : vector<32xf32> to vector<32x1xf32>
    %cst_1 = arith.constant 1.280000e+02 : f32
    %5 = vector.broadcast %cst_1 : f32 to vector<32x1xf32>
    %6 = arith.divf %4, %5 : vector<32x1xf32>
    %cst_2 = arith.constant 9.99999997E-7 : f32
    %7 = vector.broadcast %cst_2 : f32 to vector<32x1xf32>
    %8 = arith.addf %6, %7 : vector<32x1xf32>
    %9 = math.rsqrt %8 : vector<32x1xf32>
    %10 = vector.broadcast %9 : vector<32x1xf32> to vector<32x128xf32>
    %11 = arith.mulf %1, %10 : vector<32x128xf32>
    %c0_3 = arith.constant 0 : index
    %c0_4 = arith.constant 0 : index
    %12 = vector.load %arg6[%c0_3, %c0_4] : memref<1x128xbf16, #tpu.memory_space<vmem>>, vector<1x128xbf16>
    %13 = arith.extf %12 : vector<1x128xbf16> to vector<1x128xf32>
    %14 = vector.broadcast %13 : vector<1x128xf32> to vector<32x128xf32>
    %15 = arith.mulf %11, %14 : vector<32x128xf32>
    %16 = arith.truncf %15 : vector<32x128xf32> to vector<32x128xbf16>
    %c0_5 = arith.constant 0 : index
    %c0_6 = arith.constant 0 : index
    %17 = vector.load %arg8[%c0_5, %c0_6] : memref<128x384xbf16, #tpu.memory_space<vmem>>, vector<128x384xbf16>
    %cst_7 = arith.constant dense<0.000000e+00> : vector<32x384xf32>
    %18 = tpu.matmul %16, %17, %cst_7 {dimension_numbers = #tpu.dot_dimension_numbers<[1], [0], [0], [1], [0, 0, 1, 1], [], []>} : vector<32x128xbf16>, vector<128x384xbf16>, vector<32x384xf32> -> vector<32x384xf32>
    %19 = vector.extract_strided_slice %18 {offsets = [0, 0], sizes = [32, 128], strides = [1, 1]} : vector<32x384xf32> to vector<32x128xf32>
    %20 = vector.extract_strided_slice %18 {offsets = [0, 128], sizes = [32, 128], strides = [1, 1]} : vector<32x384xf32> to vector<32x128xf32>
    %21 = vector.extract_strided_slice %18 {offsets = [0, 256], sizes = [32, 128], strides = [1, 1]} : vector<32x384xf32> to vector<32x128xf32>
    %c0_8 = arith.constant 0 : index
    %c0_9 = arith.constant 0 : index
    %22 = vector.load %arg3[%c0_8, %c0_9] : memref<32x128xf32, #tpu.memory_space<vmem>>, vector<32x128xf32>
    %c0_10 = arith.constant 0 : index
    %c0_11 = arith.constant 0 : index
    %23 = vector.load %arg4[%c0_10, %c0_11] : memref<32x128xf32, #tpu.memory_space<vmem>>, vector<32x128xf32>
    %c0_12 = arith.constant 0 : index
    %c0_13 = arith.constant 0 : index
    %24 = vector.load %arg5[%c0_12, %c0_13] : memref<128x128xf32, #tpu.memory_space<vmem>>, vector<128x128xf32>
    %25 = arith.mulf %19, %22 : vector<32x128xf32>
    %cst_14 = arith.constant dense<0.000000e+00> : vector<32x128xf32>
    %26 = tpu.matmul %19, %24, %cst_14 {dimension_numbers = #tpu.dot_dimension_numbers<[1], [0], [0], [1], [0, 0, 1, 1], [], []>} : vector<32x128xf32>, vector<128x128xf32>, vector<32x128xf32> -> vector<32x128xf32>
    %27 = arith.mulf %26, %23 : vector<32x128xf32>
    %28 = arith.addf %25, %27 : vector<32x128xf32>
    %29 = arith.mulf %20, %22 : vector<32x128xf32>
    %cst_15 = arith.constant dense<0.000000e+00> : vector<32x128xf32>
    %30 = tpu.matmul %20, %24, %cst_15 {dimension_numbers = #tpu.dot_dimension_numbers<[1], [0], [0], [1], [0, 0, 1, 1], [], []>} : vector<32x128xf32>, vector<128x128xf32>, vector<32x128xf32> -> vector<32x128xf32>
    %31 = arith.mulf %30, %23 : vector<32x128xf32>
    %32 = arith.addf %29, %31 : vector<32x128xf32>
    %33 = tpu.iota {dimensions = array<i32: 0>} : vector<16x16xi32>
    %34 = tpu.iota {dimensions = array<i32: 1>} : vector<16x16xi32>
    %35 = arith.cmpi sge, %33, %34 : vector<16x16xi32>
    %c0_16 = arith.constant 0 : index
    %c0_17 = arith.constant 0 : index
    %36 = vector.load %arg2[%c0_16, %c0_17] : memref<2x16xi32, #tpu.memory_space<vmem>>, vector<2x16xi32>
    %37 = vector.extract_strided_slice %36 {offsets = [0, 0], sizes = [1, 16], strides = [1, 1]} : vector<2x16xi32> to vector<1x16xi32>
    %c0_i32 = arith.constant 0 : i32
    %38 = vector.broadcast %c0_i32 : i32 to vector<1x16xi32>
    %39 = arith.cmpi sgt, %37, %38 : vector<1x16xi32>
    %40 = vector.broadcast %39 : vector<1x16xi1> to vector<16x16xi1>
    %41 = arith.andi %35, %40 : vector<16x16xi1>
    %cst_18 = arith.constant 0.000000e+00 : f32
    %cst_19 = arith.constant -1.000000e+09 : f32
    %42 = vector.broadcast %cst_18 : f32 to vector<16x16xf32>
    %43 = vector.broadcast %cst_19 : f32 to vector<16x16xf32>
    %44 = arith.select %41, %42, %43 : vector<16x16xi1>, vector<16x16xf32>
    %45 = vector.extract_strided_slice %28 {offsets = [0, 0], sizes = [16, 32], strides = [1, 1]} : vector<32x128xf32> to vector<16x32xf32>
    %46 = vector.extract_strided_slice %32 {offsets = [0, 0], sizes = [16, 32], strides = [1, 1]} : vector<32x128xf32> to vector<16x32xf32>
    %47 = vector.extract_strided_slice %21 {offsets = [0, 0], sizes = [16, 32], strides = [1, 1]} : vector<32x128xf32> to vector<16x32xf32>
    %cst_20 = arith.constant dense<0.000000e+00> : vector<16x16xf32>
    %48 = tpu.matmul %45, %46, %cst_20 {dimension_numbers = #tpu.dot_dimension_numbers<[1], [1], [0], [0], [0, 0, 1, 0], [], []>} : vector<16x32xf32>, vector<16x32xf32>, vector<16x16xf32> -> vector<16x16xf32>
    %cst_21 = arith.constant 0.176776692 : f32
    %49 = vector.broadcast %cst_21 : f32 to vector<16x16xf32>
    %50 = arith.mulf %48, %49 : vector<16x16xf32>
    %51 = arith.addf %50, %44 : vector<16x16xf32>
    %cst_22 = arith.constant dense<0xFF800000> : vector<16xf32>
    %52 = vector.multi_reduction <maximumf>, %51, %cst_22 [1] : vector<16x16xf32> to vector<16xf32>
    %53 = vector.shape_cast %52 : vector<16xf32> to vector<16x1xf32>
    %54 = vector.broadcast %53 : vector<16x1xf32> to vector<16x16xf32>
    %55 = arith.subf %51, %54 : vector<16x16xf32>
    %56 = math.exp %55 : vector<16x16xf32>
    %cst_23 = arith.constant dense<0.000000e+00> : vector<16xf32>
    %57 = vector.multi_reduction <add>, %56, %cst_23 [1] : vector<16x16xf32> to vector<16xf32>
    %58 = vector.shape_cast %57 : vector<16xf32> to vector<16x1xf32>
    %59 = vector.broadcast %58 : vector<16x1xf32> to vector<16x16xf32>
    %60 = arith.divf %56, %59 : vector<16x16xf32>
    %cst_24 = arith.constant dense<0.000000e+00> : vector<16x32xf32>
    %61 = tpu.matmul %60, %47, %cst_24 {dimension_numbers = #tpu.dot_dimension_numbers<[1], [0], [0], [1], [0, 0, 1, 1], [], []>} : vector<16x16xf32>, vector<16x32xf32>, vector<16x32xf32> -> vector<16x32xf32>
    %62 = vector.extract_strided_slice %28 {offsets = [0, 32], sizes = [16, 32], strides = [1, 1]} : vector<32x128xf32> to vector<16x32xf32>
    %63 = vector.extract_strided_slice %32 {offsets = [0, 32], sizes = [16, 32], strides = [1, 1]} : vector<32x128xf32> to vector<16x32xf32>
    %64 = vector.extract_strided_slice %21 {offsets = [0, 32], sizes = [16, 32], strides = [1, 1]} : vector<32x128xf32> to vector<16x32xf32>
    %cst_25 = arith.constant dense<0.000000e+00> : vector<16x16xf32>
    %65 = tpu.matmul %62, %63, %cst_25 {dimension_numbers = #tpu.dot_dimension_numbers<[1], [1], [0], [0], [0, 0, 1, 0], [], []>} : vector<16x32xf32>, vector<16x32xf32>, vector<16x16xf32> -> vector<16x16xf32>
    %cst_26 = arith.constant 0.176776692 : f32
    %66 = vector.broadcast %cst_26 : f32 to vector<16x16xf32>
    %67 = arith.mulf %65, %66 : vector<16x16xf32>
    %68 = arith.addf %67, %44 : vector<16x16xf32>
    %cst_27 = arith.constant dense<0xFF800000> : vector<16xf32>
    %69 = vector.multi_reduction <maximumf>, %68, %cst_27 [1] : vector<16x16xf32> to vector<16xf32>
    %70 = vector.shape_cast %69 : vector<16xf32> to vector<16x1xf32>
    %71 = vector.broadcast %70 : vector<16x1xf32> to vector<16x16xf32>
    %72 = arith.subf %68, %71 : vector<16x16xf32>
    %73 = math.exp %72 : vector<16x16xf32>
    %cst_28 = arith.constant dense<0.000000e+00> : vector<16xf32>
    %74 = vector.multi_reduction <add>, %73, %cst_28 [1] : vector<16x16xf32> to vector<16xf32>
    %75 = vector.shape_cast %74 : vector<16xf32> to vector<16x1xf32>
    %76 = vector.broadcast %75 : vector<16x1xf32> to vector<16x16xf32>
    %77 = arith.divf %73, %76 : vector<16x16xf32>
    %cst_29 = arith.constant dense<0.000000e+00> : vector<16x32xf32>
    %78 = tpu.matmul %77, %64, %cst_29 {dimension_numbers = #tpu.dot_dimension_numbers<[1], [0], [0], [1], [0, 0, 1, 1], [], []>} : vector<16x16xf32>, vector<16x32xf32>, vector<16x32xf32> -> vector<16x32xf32>
    %79 = vector.extract_strided_slice %28 {offsets = [0, 64], sizes = [16, 32], strides = [1, 1]} : vector<32x128xf32> to vector<16x32xf32>
    %80 = vector.extract_strided_slice %32 {offsets = [0, 64], sizes = [16, 32], strides = [1, 1]} : vector<32x128xf32> to vector<16x32xf32>
    %81 = vector.extract_strided_slice %21 {offsets = [0, 64], sizes = [16, 32], strides = [1, 1]} : vector<32x128xf32> to vector<16x32xf32>
    %cst_30 = arith.constant dense<0.000000e+00> : vector<16x16xf32>
    %82 = tpu.matmul %79, %80, %cst_30 {dimension_numbers = #tpu.dot_dimension_numbers<[1], [1], [0], [0], [0, 0, 1, 0], [], []>} : vector<16x32xf32>, vector<16x32xf32>, vector<16x16xf32> -> vector<16x16xf32>
    %cst_31 = arith.constant 0.176776692 : f32
    %83 = vector.broadcast %cst_31 : f32 to vector<16x16xf32>
    %84 = arith.mulf %82, %83 : vector<16x16xf32>
    %85 = arith.addf %84, %44 : vector<16x16xf32>
    %cst_32 = arith.constant dense<0xFF800000> : vector<16xf32>
    %86 = vector.multi_reduction <maximumf>, %85, %cst_32 [1] : vector<16x16xf32> to vector<16xf32>
    %87 = vector.shape_cast %86 : vector<16xf32> to vector<16x1xf32>
    %88 = vector.broadcast %87 : vector<16x1xf32> to vector<16x16xf32>
    %89 = arith.subf %85, %88 : vector<16x16xf32>
    %90 = math.exp %89 : vector<16x16xf32>
    %cst_33 = arith.constant dense<0.000000e+00> : vector<16xf32>
    %91 = vector.multi_reduction <add>, %90, %cst_33 [1] : vector<16x16xf32> to vector<16xf32>
    %92 = vector.shape_cast %91 : vector<16xf32> to vector<16x1xf32>
    %93 = vector.broadcast %92 : vector<16x1xf32> to vector<16x16xf32>
    %94 = arith.divf %90, %93 : vector<16x16xf32>
    %cst_34 = arith.constant dense<0.000000e+00> : vector<16x32xf32>
    %95 = tpu.matmul %94, %81, %cst_34 {dimension_numbers = #tpu.dot_dimension_numbers<[1], [0], [0], [1], [0, 0, 1, 1], [], []>} : vector<16x16xf32>, vector<16x32xf32>, vector<16x32xf32> -> vector<16x32xf32>
    %96 = vector.extract_strided_slice %28 {offsets = [0, 96], sizes = [16, 32], strides = [1, 1]} : vector<32x128xf32> to vector<16x32xf32>
    %97 = vector.extract_strided_slice %32 {offsets = [0, 96], sizes = [16, 32], strides = [1, 1]} : vector<32x128xf32> to vector<16x32xf32>
    %98 = vector.extract_strided_slice %21 {offsets = [0, 96], sizes = [16, 32], strides = [1, 1]} : vector<32x128xf32> to vector<16x32xf32>
    %cst_35 = arith.constant dense<0.000000e+00> : vector<16x16xf32>
    %99 = tpu.matmul %96, %97, %cst_35 {dimension_numbers = #tpu.dot_dimension_numbers<[1], [1], [0], [0], [0, 0, 1, 0], [], []>} : vector<16x32xf32>, vector<16x32xf32>, vector<16x16xf32> -> vector<16x16xf32>
    %cst_36 = arith.constant 0.176776692 : f32
    %100 = vector.broadcast %cst_36 : f32 to vector<16x16xf32>
    %101 = arith.mulf %99, %100 : vector<16x16xf32>
    %102 = arith.addf %101, %44 : vector<16x16xf32>
    %cst_37 = arith.constant dense<0xFF800000> : vector<16xf32>
    %103 = vector.multi_reduction <maximumf>, %102, %cst_37 [1] : vector<16x16xf32> to vector<16xf32>
    %104 = vector.shape_cast %103 : vector<16xf32> to vector<16x1xf32>
    %105 = vector.broadcast %104 : vector<16x1xf32> to vector<16x16xf32>
    %106 = arith.subf %102, %105 : vector<16x16xf32>
    %107 = math.exp %106 : vector<16x16xf32>
    %cst_38 = arith.constant dense<0.000000e+00> : vector<16xf32>
    %108 = vector.multi_reduction <add>, %107, %cst_38 [1] : vector<16x16xf32> to vector<16xf32>
    %109 = vector.shape_cast %108 : vector<16xf32> to vector<16x1xf32>
    %110 = vector.broadcast %109 : vector<16x1xf32> to vector<16x16xf32>
    %111 = arith.divf %107, %110 : vector<16x16xf32>
    %cst_39 = arith.constant dense<0.000000e+00> : vector<16x32xf32>
    %112 = tpu.matmul %111, %98, %cst_39 {dimension_numbers = #tpu.dot_dimension_numbers<[1], [0], [0], [1], [0, 0, 1, 1], [], []>} : vector<16x16xf32>, vector<16x32xf32>, vector<16x32xf32> -> vector<16x32xf32>
    %113 = tpu.concatenate %61, %78, %95, %112 in 1 : vector<16x32xf32>, vector<16x32xf32>, vector<16x32xf32>, vector<16x32xf32> -> vector<16x128xf32>
    %114 = vector.extract_strided_slice %36 {offsets = [1, 0], sizes = [1, 16], strides = [1, 1]} : vector<2x16xi32> to vector<1x16xi32>
    %c0_i32_40 = arith.constant 0 : i32
    %115 = vector.broadcast %c0_i32_40 : i32 to vector<1x16xi32>
    %116 = arith.cmpi sgt, %114, %115 : vector<1x16xi32>
    %117 = vector.broadcast %116 : vector<1x16xi1> to vector<16x16xi1>
    %118 = arith.andi %35, %117 : vector<16x16xi1>
    %cst_41 = arith.constant 0.000000e+00 : f32
    %cst_42 = arith.constant -1.000000e+09 : f32
    %119 = vector.broadcast %cst_41 : f32 to vector<16x16xf32>
    %120 = vector.broadcast %cst_42 : f32 to vector<16x16xf32>
    %121 = arith.select %118, %119, %120 : vector<16x16xi1>, vector<16x16xf32>
    %122 = vector.extract_strided_slice %28 {offsets = [16, 0], sizes = [16, 32], strides = [1, 1]} : vector<32x128xf32> to vector<16x32xf32>
    %123 = vector.extract_strided_slice %32 {offsets = [16, 0], sizes = [16, 32], strides = [1, 1]} : vector<32x128xf32> to vector<16x32xf32>
    %124 = vector.extract_strided_slice %21 {offsets = [16, 0], sizes = [16, 32], strides = [1, 1]} : vector<32x128xf32> to vector<16x32xf32>
    %cst_43 = arith.constant dense<0.000000e+00> : vector<16x16xf32>
    %125 = tpu.matmul %122, %123, %cst_43 {dimension_numbers = #tpu.dot_dimension_numbers<[1], [1], [0], [0], [0, 0, 1, 0], [], []>} : vector<16x32xf32>, vector<16x32xf32>, vector<16x16xf32> -> vector<16x16xf32>
    %cst_44 = arith.constant 0.176776692 : f32
    %126 = vector.broadcast %cst_44 : f32 to vector<16x16xf32>
    %127 = arith.mulf %125, %126 : vector<16x16xf32>
    %128 = arith.addf %127, %121 : vector<16x16xf32>
    %cst_45 = arith.constant dense<0xFF800000> : vector<16xf32>
    %129 = vector.multi_reduction <maximumf>, %128, %cst_45 [1] : vector<16x16xf32> to vector<16xf32>
    %130 = vector.shape_cast %129 : vector<16xf32> to vector<16x1xf32>
    %131 = vector.broadcast %130 : vector<16x1xf32> to vector<16x16xf32>
    %132 = arith.subf %128, %131 : vector<16x16xf32>
    %133 = math.exp %132 : vector<16x16xf32>
    %cst_46 = arith.constant dense<0.000000e+00> : vector<16xf32>
    %134 = vector.multi_reduction <add>, %133, %cst_46 [1] : vector<16x16xf32> to vector<16xf32>
    %135 = vector.shape_cast %134 : vector<16xf32> to vector<16x1xf32>
    %136 = vector.broadcast %135 : vector<16x1xf32> to vector<16x16xf32>
    %137 = arith.divf %133, %136 : vector<16x16xf32>
    %cst_47 = arith.constant dense<0.000000e+00> : vector<16x32xf32>
    %138 = tpu.matmul %137, %124, %cst_47 {dimension_numbers = #tpu.dot_dimension_numbers<[1], [0], [0], [1], [0, 0, 1, 1], [], []>} : vector<16x16xf32>, vector<16x32xf32>, vector<16x32xf32> -> vector<16x32xf32>
    %139 = vector.extract_strided_slice %28 {offsets = [16, 32], sizes = [16, 32], strides = [1, 1]} : vector<32x128xf32> to vector<16x32xf32>
    %140 = vector.extract_strided_slice %32 {offsets = [16, 32], sizes = [16, 32], strides = [1, 1]} : vector<32x128xf32> to vector<16x32xf32>
    %141 = vector.extract_strided_slice %21 {offsets = [16, 32], sizes = [16, 32], strides = [1, 1]} : vector<32x128xf32> to vector<16x32xf32>
    %cst_48 = arith.constant dense<0.000000e+00> : vector<16x16xf32>
    %142 = tpu.matmul %139, %140, %cst_48 {dimension_numbers = #tpu.dot_dimension_numbers<[1], [1], [0], [0], [0, 0, 1, 0], [], []>} : vector<16x32xf32>, vector<16x32xf32>, vector<16x16xf32> -> vector<16x16xf32>
    %cst_49 = arith.constant 0.176776692 : f32
    %143 = vector.broadcast %cst_49 : f32 to vector<16x16xf32>
    %144 = arith.mulf %142, %143 : vector<16x16xf32>
    %145 = arith.addf %144, %121 : vector<16x16xf32>
    %cst_50 = arith.constant dense<0xFF800000> : vector<16xf32>
    %146 = vector.multi_reduction <maximumf>, %145, %cst_50 [1] : vector<16x16xf32> to vector<16xf32>
    %147 = vector.shape_cast %146 : vector<16xf32> to vector<16x1xf32>
    %148 = vector.broadcast %147 : vector<16x1xf32> to vector<16x16xf32>
    %149 = arith.subf %145, %148 : vector<16x16xf32>
    %150 = math.exp %149 : vector<16x16xf32>
    %cst_51 = arith.constant dense<0.000000e+00> : vector<16xf32>
    %151 = vector.multi_reduction <add>, %150, %cst_51 [1] : vector<16x16xf32> to vector<16xf32>
    %152 = vector.shape_cast %151 : vector<16xf32> to vector<16x1xf32>
    %153 = vector.broadcast %152 : vector<16x1xf32> to vector<16x16xf32>
    %154 = arith.divf %150, %153 : vector<16x16xf32>
    %cst_52 = arith.constant dense<0.000000e+00> : vector<16x32xf32>
    %155 = tpu.matmul %154, %141, %cst_52 {dimension_numbers = #tpu.dot_dimension_numbers<[1], [0], [0], [1], [0, 0, 1, 1], [], []>} : vector<16x16xf32>, vector<16x32xf32>, vector<16x32xf32> -> vector<16x32xf32>
    %156 = vector.extract_strided_slice %28 {offsets = [16, 64], sizes = [16, 32], strides = [1, 1]} : vector<32x128xf32> to vector<16x32xf32>
    %157 = vector.extract_strided_slice %32 {offsets = [16, 64], sizes = [16, 32], strides = [1, 1]} : vector<32x128xf32> to vector<16x32xf32>
    %158 = vector.extract_strided_slice %21 {offsets = [16, 64], sizes = [16, 32], strides = [1, 1]} : vector<32x128xf32> to vector<16x32xf32>
    %cst_53 = arith.constant dense<0.000000e+00> : vector<16x16xf32>
    %159 = tpu.matmul %156, %157, %cst_53 {dimension_numbers = #tpu.dot_dimension_numbers<[1], [1], [0], [0], [0, 0, 1, 0], [], []>} : vector<16x32xf32>, vector<16x32xf32>, vector<16x16xf32> -> vector<16x16xf32>
    %cst_54 = arith.constant 0.176776692 : f32
    %160 = vector.broadcast %cst_54 : f32 to vector<16x16xf32>
    %161 = arith.mulf %159, %160 : vector<16x16xf32>
    %162 = arith.addf %161, %121 : vector<16x16xf32>
    %cst_55 = arith.constant dense<0xFF800000> : vector<16xf32>
    %163 = vector.multi_reduction <maximumf>, %162, %cst_55 [1] : vector<16x16xf32> to vector<16xf32>
    %164 = vector.shape_cast %163 : vector<16xf32> to vector<16x1xf32>
    %165 = vector.broadcast %164 : vector<16x1xf32> to vector<16x16xf32>
    %166 = arith.subf %162, %165 : vector<16x16xf32>
    %167 = math.exp %166 : vector<16x16xf32>
    %cst_56 = arith.constant dense<0.000000e+00> : vector<16xf32>
    %168 = vector.multi_reduction <add>, %167, %cst_56 [1] : vector<16x16xf32> to vector<16xf32>
    %169 = vector.shape_cast %168 : vector<16xf32> to vector<16x1xf32>
    %170 = vector.broadcast %169 : vector<16x1xf32> to vector<16x16xf32>
    %171 = arith.divf %167, %170 : vector<16x16xf32>
    %cst_57 = arith.constant dense<0.000000e+00> : vector<16x32xf32>
    %172 = tpu.matmul %171, %158, %cst_57 {dimension_numbers = #tpu.dot_dimension_numbers<[1], [0], [0], [1], [0, 0, 1, 1], [], []>} : vector<16x16xf32>, vector<16x32xf32>, vector<16x32xf32> -> vector<16x32xf32>
    %173 = vector.extract_strided_slice %28 {offsets = [16, 96], sizes = [16, 32], strides = [1, 1]} : vector<32x128xf32> to vector<16x32xf32>
    %174 = vector.extract_strided_slice %32 {offsets = [16, 96], sizes = [16, 32], strides = [1, 1]} : vector<32x128xf32> to vector<16x32xf32>
    %175 = vector.extract_strided_slice %21 {offsets = [16, 96], sizes = [16, 32], strides = [1, 1]} : vector<32x128xf32> to vector<16x32xf32>
    %cst_58 = arith.constant dense<0.000000e+00> : vector<16x16xf32>
    %176 = tpu.matmul %173, %174, %cst_58 {dimension_numbers = #tpu.dot_dimension_numbers<[1], [1], [0], [0], [0, 0, 1, 0], [], []>} : vector<16x32xf32>, vector<16x32xf32>, vector<16x16xf32> -> vector<16x16xf32>
    %cst_59 = arith.constant 0.176776692 : f32
    %177 = vector.broadcast %cst_59 : f32 to vector<16x16xf32>
    %178 = arith.mulf %176, %177 : vector<16x16xf32>
    %179 = arith.addf %178, %121 : vector<16x16xf32>
    %cst_60 = arith.constant dense<0xFF800000> : vector<16xf32>
    %180 = vector.multi_reduction <maximumf>, %179, %cst_60 [1] : vector<16x16xf32> to vector<16xf32>
    %181 = vector.shape_cast %180 : vector<16xf32> to vector<16x1xf32>
    %182 = vector.broadcast %181 : vector<16x1xf32> to vector<16x16xf32>
    %183 = arith.subf %179, %182 : vector<16x16xf32>
    %184 = math.exp %183 : vector<16x16xf32>
    %cst_61 = arith.constant dense<0.000000e+00> : vector<16xf32>
    %185 = vector.multi_reduction <add>, %184, %cst_61 [1] : vector<16x16xf32> to vector<16xf32>
    %186 = vector.shape_cast %185 : vector<16xf32> to vector<16x1xf32>
    %187 = vector.broadcast %186 : vector<16x1xf32> to vector<16x16xf32>
    %188 = arith.divf %184, %187 : vector<16x16xf32>
    %cst_62 = arith.constant dense<0.000000e+00> : vector<16x32xf32>
    %189 = tpu.matmul %188, %175, %cst_62 {dimension_numbers = #tpu.dot_dimension_numbers<[1], [0], [0], [1], [0, 0, 1, 1], [], []>} : vector<16x16xf32>, vector<16x32xf32>, vector<16x32xf32> -> vector<16x32xf32>
    %190 = tpu.concatenate %138, %155, %172, %189 in 1 : vector<16x32xf32>, vector<16x32xf32>, vector<16x32xf32>, vector<16x32xf32> -> vector<16x128xf32>
    %191 = tpu.concatenate %113, %190 in 0 : vector<16x128xf32>, vector<16x128xf32> -> vector<32x128xf32>
    %192 = arith.truncf %191 : vector<32x128xf32> to vector<32x128xbf16>
    %c0_63 = arith.constant 0 : index
    %c0_64 = arith.constant 0 : index
    %193 = vector.load %arg9[%c0_63, %c0_64] : memref<128x128xbf16, #tpu.memory_space<vmem>>, vector<128x128xbf16>
    %cst_65 = arith.constant dense<0.000000e+00> : vector<32x128xf32>
    %194 = tpu.matmul %192, %193, %cst_65 {dimension_numbers = #tpu.dot_dimension_numbers<[1], [0], [0], [1], [0, 0, 1, 1], [], []>} : vector<32x128xbf16>, vector<128x128xbf16>, vector<32x128xf32> -> vector<32x128xf32>
    %195 = arith.addf %1, %194 : vector<32x128xf32>
    %196 = arith.mulf %195, %195 : vector<32x128xf32>
    %cst_66 = arith.constant dense<0.000000e+00> : vector<32xf32>
    %197 = vector.multi_reduction <add>, %196, %cst_66 [1] : vector<32x128xf32> to vector<32xf32>
    %198 = vector.shape_cast %197 : vector<32xf32> to vector<32x1xf32>
    %cst_67 = arith.constant 1.280000e+02 : f32
    %199 = vector.broadcast %cst_67 : f32 to vector<32x1xf32>
    %200 = arith.divf %198, %199 : vector<32x1xf32>
    %cst_68 = arith.constant 9.99999997E-7 : f32
    %201 = vector.broadcast %cst_68 : f32 to vector<32x1xf32>
    %202 = arith.addf %200, %201 : vector<32x1xf32>
    %203 = math.rsqrt %202 : vector<32x1xf32>
    %204 = vector.broadcast %203 : vector<32x1xf32> to vector<32x128xf32>
    %205 = arith.mulf %195, %204 : vector<32x128xf32>
    %c0_69 = arith.constant 0 : index
    %c0_70 = arith.constant 0 : index
    %206 = vector.load %arg7[%c0_69, %c0_70] : memref<1x128xbf16, #tpu.memory_space<vmem>>, vector<1x128xbf16>
    %207 = arith.extf %206 : vector<1x128xbf16> to vector<1x128xf32>
    %208 = vector.broadcast %207 : vector<1x128xf32> to vector<32x128xf32>
    %209 = arith.mulf %205, %208 : vector<32x128xf32>
    %210 = arith.truncf %209 : vector<32x128xf32> to vector<32x128xbf16>
    %c0_71 = arith.constant 0 : index
    %c0_72 = arith.constant 0 : index
    %211 = vector.load %arg10[%c0_71, %c0_72] : memref<128x512xbf16, #tpu.memory_space<vmem>>, vector<128x512xbf16>
    %cst_73 = arith.constant dense<0.000000e+00> : vector<32x512xf32>
    %212 = tpu.matmul %210, %211, %cst_73 {dimension_numbers = #tpu.dot_dimension_numbers<[1], [0], [0], [1], [0, 0, 1, 1], [], []>} : vector<32x128xbf16>, vector<128x512xbf16>, vector<32x512xf32> -> vector<32x512xf32>
    %213 = vector.extract_strided_slice %212 {offsets = [0, 0], sizes = [32, 256], strides = [1, 1]} : vector<32x512xf32> to vector<32x256xf32>
    %214 = vector.extract_strided_slice %212 {offsets = [0, 256], sizes = [32, 256], strides = [1, 1]} : vector<32x512xf32> to vector<32x256xf32>
    %215 = arith.negf %213 : vector<32x256xf32>
    %216 = math.exp %215 : vector<32x256xf32>
    %cst_74 = arith.constant 1.000000e+00 : f32
    %217 = vector.broadcast %cst_74 : f32 to vector<32x256xf32>
    %218 = arith.addf %217, %216 : vector<32x256xf32>
    %219 = arith.divf %217, %218 : vector<32x256xf32>
    %220 = arith.mulf %213, %219 : vector<32x256xf32>
    %221 = arith.mulf %220, %214 : vector<32x256xf32>
    %222 = arith.truncf %221 : vector<32x256xf32> to vector<32x256xbf16>
    %c0_75 = arith.constant 0 : index
    %c0_76 = arith.constant 0 : index
    %223 = vector.load %arg11[%c0_75, %c0_76] : memref<256x128xbf16, #tpu.memory_space<vmem>>, vector<256x128xbf16>
    %cst_77 = arith.constant dense<0.000000e+00> : vector<32x128xf32>
    %224 = tpu.matmul %222, %223, %cst_77 {dimension_numbers = #tpu.dot_dimension_numbers<[1], [0], [0], [1], [0, 0, 1, 1], [], []>} : vector<32x256xbf16>, vector<256x128xbf16>, vector<32x128xf32> -> vector<32x128xf32>
    %225 = arith.addf %195, %224 : vector<32x128xf32>
    %226 = arith.truncf %225 : vector<32x128xf32> to vector<32x128xbf16>
    %c0_78 = arith.constant 0 : index
    %c0_79 = arith.constant 0 : index
    %227 = vector.load %arg12[%c0_78, %c0_79] : memref<32x128xbf16, #tpu.memory_space<vmem>>, vector<32x128xbf16>
    tpu.vector_store %arg12[%c0_78, %c0_79], %226 {strides = array<i32>} : memref<32x128xbf16, #tpu.memory_space<vmem>>, vector<32x128xbf16>,
    return
  }
  func.func @transform_0(%arg0: i32) -> (i32, i32) {
    %c0_i32 = arith.constant 0 : i32
    %c0_i32_0 = arith.constant 0 : i32
    %c0_i32_1 = arith.constant 0 : i32
    return %c0_i32, %c0_i32_0 : i32, i32
  }
  func.func @transform_1(%arg0: i32) -> (i32, i32) {
    %c0_i32 = arith.constant 0 : i32
    %c0_i32_0 = arith.constant 0 : i32
    %c0_i32_1 = arith.constant 0 : i32
    return %c0_i32, %c0_i32_0 : i32, i32
  }
  func.func @transform_2(%arg0: i32) -> (i32, i32) {
    %c0_i32 = arith.constant 0 : i32
    %c0_i32_0 = arith.constant 0 : i32
    %c0_i32_1 = arith.constant 0 : i32
    return %c0_i32, %c0_i32_0 : i32, i32
  }
  func.func @transform_3(%arg0: i32) -> (i32, i32) {
    %c0_i32 = arith.constant 0 : i32
    %c0_i32_0 = arith.constant 0 : i32
    %c0_i32_1 = arith.constant 0 : i32
    return %c0_i32, %c0_i32_0 : i32, i32
  }
  func.func @transform_4(%arg0: i32) -> (i32, i32) {
    %c0_i32 = arith.constant 0 : i32
    %c0_i32_0 = arith.constant 0 : i32
    %c0_i32_1 = arith.constant 0 : i32
    return %c0_i32, %c0_i32_0 : i32, i32
  }
  func.func @transform_5(%arg0: i32) -> (i32, i32) {
    %c0_i32 = arith.constant 0 : i32
    %c0_i32_0 = arith.constant 0 : i32
    %c0_i32_1 = arith.constant 0 : i32
    return %c0_i32, %c0_i32_0 : i32, i32
  }
  func.func @transform_6(%arg0: i32) -> (i32, i32) {
    %c0_i32 = arith.constant 0 : i32
    %c0_i32_0 = arith.constant 0 : i32
    %c0_i32_1 = arith.constant 0 : i32
    return %c0_i32, %c0_i32_0 : i32, i32
  }
  func.func @transform_7(%arg0: i32) -> (i32, i32) {
    %c0_i32 = arith.constant 0 : i32
    %c0_i32_0 = arith.constant 0 : i32
    %c0_i32_1 = arith.constant 0 : i32
    return %c0_i32, %c0_i32_0 : i32, i32
  }
  func.func @transform_8(%arg0: i32) -> (i32, i32) {
    %c0_i32 = arith.constant 0 : i32
    %c0_i32_0 = arith.constant 0 : i32
    %c0_i32_1 = arith.constant 0 : i32
    return %c0_i32, %c0_i32_0 : i32, i32
  }
  func.func @transform_9(%arg0: i32) -> (i32, i32) {
    %c0_i32 = arith.constant 0 : i32
    %c0_i32_0 = arith.constant 0 : i32
    %c0_i32_1 = arith.constant 0 : i32
    return %c0_i32, %c0_i32_0 : i32, i32
  }
  func.func @transform_10(%arg0: i32) -> (i32, i32) {
    %c0_i32 = arith.constant 0 : i32
    %c0_i32_0 = arith.constant 0 : i32
    %c0_i32_1 = arith.constant 0 : i32
    return %c0_i32, %c0_i32_0 : i32, i32
  }
  func.func @transform_11(%arg0: i32) -> (i32, i32) {
    %c0_i32 = arith.constant 0 : i32
    %c0_i32_0 = arith.constant 0 : i32
    %c0_i32_1 = arith.constant 0 : i32
    return %c0_i32, %c0_i32_0 : i32, i32
  }
}

module attributes {stable_mosaic.version = 11 : i64} {
  func.func @_head_kernel(%arg0: i32, %arg1: memref<32x128xbf16, #tpu.memory_space<vmem>>, %arg2: memref<1x128xbf16, #tpu.memory_space<vmem>>, %arg3: memref<128x256xbf16, #tpu.memory_space<vmem>>, %arg4: memref<128x64xbf16, #tpu.memory_space<vmem>>, %arg5: memref<64x32xbf16, #tpu.memory_space<vmem>>, %arg6: memref<32x1xi32, #tpu.memory_space<vmem>>, %arg7: memref<32x1xf32, #tpu.memory_space<vmem>>, %arg8: memref<32x1xi32, #tpu.memory_space<vmem>>, %arg9: memref<32x1xf32, #tpu.memory_space<vmem>>, %arg10: memref<32x256xf32, #tpu.memory_space<vmem>>, %arg11: memref<1x1xf32, #tpu.memory_space<vmem>>) attributes {dimension_semantics = [#tpu.dimension_semantics<arbitrary>], iteration_bounds = array<i64: 1>, scalar_prefetch = 0 : i64, scratch_operands = 0 : i64, tpu.core_type = #tpu.core_type<tc>, window_params = [{pipeline_mode = #tpu.pipeline_mode<synchronous>, transform_indices = @transform_0, window_bounds = array<i64: 32, 128>}, {pipeline_mode = #tpu.pipeline_mode<synchronous>, transform_indices = @transform_1, window_bounds = array<i64: 1, 128>}, {pipeline_mode = #tpu.pipeline_mode<synchronous>, transform_indices = @transform_2, window_bounds = array<i64: 128, 256>}, {pipeline_mode = #tpu.pipeline_mode<synchronous>, transform_indices = @transform_3, window_bounds = array<i64: 128, 64>}, {pipeline_mode = #tpu.pipeline_mode<synchronous>, transform_indices = @transform_4, window_bounds = array<i64: 64, 32>}, {pipeline_mode = #tpu.pipeline_mode<synchronous>, transform_indices = @transform_5, window_bounds = array<i64: 32, 1>}, {pipeline_mode = #tpu.pipeline_mode<synchronous>, transform_indices = @transform_6, window_bounds = array<i64: 32, 1>}, {pipeline_mode = #tpu.pipeline_mode<synchronous>, transform_indices = @transform_7, window_bounds = array<i64: 32, 1>}, {pipeline_mode = #tpu.pipeline_mode<synchronous>, transform_indices = @transform_8, window_bounds = array<i64: 32, 1>}, {pipeline_mode = #tpu.pipeline_mode<synchronous>, transform_indices = @transform_9, window_bounds = array<i64: 32, 256>}, {pipeline_mode = #tpu.pipeline_mode<synchronous>, transform_indices = @transform_10, window_bounds = array<i64: 1, 1>}]} {
    %c0 = arith.constant 0 : index
    %c0_0 = arith.constant 0 : index
    %0 = vector.load %arg1[%c0, %c0_0] : memref<32x128xbf16, #tpu.memory_space<vmem>>, vector<32x128xbf16>
    %1 = arith.extf %0 : vector<32x128xbf16> to vector<32x128xf32>
    %2 = arith.mulf %1, %1 : vector<32x128xf32>
    %cst = arith.constant dense<0.000000e+00> : vector<32xf32>
    %3 = vector.multi_reduction <add>, %2, %cst [1] : vector<32x128xf32> to vector<32xf32>
    %4 = vector.shape_cast %3 : vector<32xf32> to vector<32x1xf32>
    %cst_1 = arith.constant 1.280000e+02 : f32
    %5 = vector.broadcast %cst_1 : f32 to vector<32x1xf32>
    %6 = arith.divf %4, %5 : vector<32x1xf32>
    %cst_2 = arith.constant 9.99999997E-7 : f32
    %7 = vector.broadcast %cst_2 : f32 to vector<32x1xf32>
    %8 = arith.addf %6, %7 : vector<32x1xf32>
    %9 = math.rsqrt %8 : vector<32x1xf32>
    %10 = vector.broadcast %9 : vector<32x1xf32> to vector<32x128xf32>
    %11 = arith.mulf %1, %10 : vector<32x128xf32>
    %c0_3 = arith.constant 0 : index
    %c0_4 = arith.constant 0 : index
    %12 = vector.load %arg2[%c0_3, %c0_4] : memref<1x128xbf16, #tpu.memory_space<vmem>>, vector<1x128xbf16>
    %13 = arith.extf %12 : vector<1x128xbf16> to vector<1x128xf32>
    %14 = vector.broadcast %13 : vector<1x128xf32> to vector<32x128xf32>
    %15 = arith.mulf %11, %14 : vector<32x128xf32>
    %16 = arith.truncf %15 : vector<32x128xf32> to vector<32x128xbf16>
    %c0_5 = arith.constant 0 : index
    %c0_6 = arith.constant 0 : index
    %17 = vector.load %arg3[%c0_5, %c0_6] : memref<128x256xbf16, #tpu.memory_space<vmem>>, vector<128x256xbf16>
    %cst_7 = arith.constant dense<0.000000e+00> : vector<32x256xf32>
    %18 = tpu.matmul %16, %17, %cst_7 {dimension_numbers = #tpu.dot_dimension_numbers<[1], [0], [0], [1], [0, 0, 1, 1], [], []>} : vector<32x128xbf16>, vector<128x256xbf16>, vector<32x256xf32> -> vector<32x256xf32>
    %c0_8 = arith.constant 0 : index
    %c0_9 = arith.constant 0 : index
    %19 = vector.load %arg10[%c0_8, %c0_9] : memref<32x256xf32, #tpu.memory_space<vmem>>, vector<32x256xf32>
    tpu.vector_store %arg10[%c0_8, %c0_9], %18 {strides = array<i32>} : memref<32x256xf32, #tpu.memory_space<vmem>>, vector<32x256xf32>,
    %c0_10 = arith.constant 0 : index
    %c0_11 = arith.constant 0 : index
    %20 = vector.load %arg6[%c0_10, %c0_11] : memref<32x1xi32, #tpu.memory_space<vmem>>, vector<32x1xi32>
    %c0_12 = arith.constant 0 : index
    %c0_13 = arith.constant 0 : index
    %21 = vector.load %arg7[%c0_12, %c0_13] : memref<32x1xf32, #tpu.memory_space<vmem>>, vector<32x1xf32>
    %cst_14 = arith.constant dense<0xFF800000> : vector<32xf32>
    %22 = vector.multi_reduction <maximumf>, %18, %cst_14 [1] : vector<32x256xf32> to vector<32xf32>
    %23 = vector.shape_cast %22 : vector<32xf32> to vector<32x1xf32>
    %24 = vector.broadcast %23 : vector<32x1xf32> to vector<32x256xf32>
    %25 = arith.subf %18, %24 : vector<32x256xf32>
    %26 = math.exp %25 : vector<32x256xf32>
    %cst_15 = arith.constant dense<0.000000e+00> : vector<32xf32>
    %27 = vector.multi_reduction <add>, %26, %cst_15 [1] : vector<32x256xf32> to vector<32xf32>
    %28 = vector.shape_cast %27 : vector<32xf32> to vector<32x1xf32>
    %29 = math.log %28 : vector<32x1xf32>
    %30 = arith.addf %29, %23 : vector<32x1xf32>
    %31 = tpu.iota {dimensions = array<i32: 1>} : vector<32x256xi32>
    %32 = vector.broadcast %20 : vector<32x1xi32> to vector<32x256xi32>
    %33 = arith.cmpi eq, %31, %32 : vector<32x256xi32>
    %cst_16 = arith.constant 0.000000e+00 : f32
    %34 = vector.broadcast %cst_16 : f32 to vector<32x256xf32>
    %35 = arith.select %33, %18, %34 : vector<32x256xi1>, vector<32x256xf32>
    %cst_17 = arith.constant dense<0.000000e+00> : vector<32xf32>
    %36 = vector.multi_reduction <add>, %35, %cst_17 [1] : vector<32x256xf32> to vector<32xf32>
    %37 = vector.shape_cast %36 : vector<32xf32> to vector<32x1xf32>
    %38 = arith.subf %30, %37 : vector<32x1xf32>
    %39 = arith.mulf %38, %21 : vector<32x1xf32>
    %cst_18 = arith.constant dense<0.000000e+00> : vector<1xf32>
    %40 = vector.multi_reduction <add>, %39, %cst_18 [0] : vector<32x1xf32> to vector<1xf32>
    %41 = vector.shape_cast %40 : vector<1xf32> to vector<1x1xf32>
    %cst_19 = arith.constant dense<0.000000e+00> : vector<1xf32>
    %42 = vector.multi_reduction <add>, %21, %cst_19 [0] : vector<32x1xf32> to vector<1xf32>
    %43 = vector.shape_cast %42 : vector<1xf32> to vector<1x1xf32>
    %cst_20 = arith.constant 1.000000e+00 : f32
    %44 = vector.broadcast %cst_20 : f32 to vector<1x1xf32>
    %45 = arith.maximumf %43, %44 : vector<1x1xf32>
    %46 = arith.divf %41, %45 : vector<1x1xf32>
    %c0_21 = arith.constant 0 : index
    %c0_22 = arith.constant 0 : index
    %47 = vector.load %arg4[%c0_21, %c0_22] : memref<128x64xbf16, #tpu.memory_space<vmem>>, vector<128x64xbf16>
    %cst_23 = arith.constant dense<0.000000e+00> : vector<32x64xf32>
    %48 = tpu.matmul %16, %47, %cst_23 {dimension_numbers = #tpu.dot_dimension_numbers<[1], [0], [0], [1], [0, 0, 1, 1], [], []>} : vector<32x128xbf16>, vector<128x64xbf16>, vector<32x64xf32> -> vector<32x64xf32>
    %49 = arith.truncf %48 : vector<32x64xf32> to vector<32x64xbf16>
    %c0_24 = arith.constant 0 : index
    %c0_25 = arith.constant 0 : index
    %50 = vector.load %arg5[%c0_24, %c0_25] : memref<64x32xbf16, #tpu.memory_space<vmem>>, vector<64x32xbf16>
    %cst_26 = arith.constant dense<0.000000e+00> : vector<32x32xf32>
    %51 = tpu.matmul %49, %50, %cst_26 {dimension_numbers = #tpu.dot_dimension_numbers<[1], [0], [0], [1], [0, 0, 1, 1], [], []>} : vector<32x64xbf16>, vector<64x32xbf16>, vector<32x32xf32> -> vector<32x32xf32>
    %c0_27 = arith.constant 0 : index
    %c0_28 = arith.constant 0 : index
    %52 = vector.load %arg8[%c0_27, %c0_28] : memref<32x1xi32, #tpu.memory_space<vmem>>, vector<32x1xi32>
    %c0_29 = arith.constant 0 : index
    %c0_30 = arith.constant 0 : index
    %53 = vector.load %arg9[%c0_29, %c0_30] : memref<32x1xf32, #tpu.memory_space<vmem>>, vector<32x1xf32>
    %cst_31 = arith.constant dense<0xFF800000> : vector<32xf32>
    %54 = vector.multi_reduction <maximumf>, %51, %cst_31 [1] : vector<32x32xf32> to vector<32xf32>
    %55 = vector.shape_cast %54 : vector<32xf32> to vector<32x1xf32>
    %56 = vector.broadcast %55 : vector<32x1xf32> to vector<32x32xf32>
    %57 = arith.subf %51, %56 : vector<32x32xf32>
    %58 = math.exp %57 : vector<32x32xf32>
    %cst_32 = arith.constant dense<0.000000e+00> : vector<32xf32>
    %59 = vector.multi_reduction <add>, %58, %cst_32 [1] : vector<32x32xf32> to vector<32xf32>
    %60 = vector.shape_cast %59 : vector<32xf32> to vector<32x1xf32>
    %61 = math.log %60 : vector<32x1xf32>
    %62 = arith.addf %61, %55 : vector<32x1xf32>
    %63 = tpu.iota {dimensions = array<i32: 1>} : vector<32x32xi32>
    %64 = vector.broadcast %52 : vector<32x1xi32> to vector<32x32xi32>
    %65 = arith.cmpi eq, %63, %64 : vector<32x32xi32>
    %cst_33 = arith.constant 0.000000e+00 : f32
    %66 = vector.broadcast %cst_33 : f32 to vector<32x32xf32>
    %67 = arith.select %65, %51, %66 : vector<32x32xi1>, vector<32x32xf32>
    %cst_34 = arith.constant dense<0.000000e+00> : vector<32xf32>
    %68 = vector.multi_reduction <add>, %67, %cst_34 [1] : vector<32x32xf32> to vector<32xf32>
    %69 = vector.shape_cast %68 : vector<32xf32> to vector<32x1xf32>
    %70 = arith.subf %62, %69 : vector<32x1xf32>
    %71 = arith.mulf %70, %53 : vector<32x1xf32>
    %cst_35 = arith.constant dense<0.000000e+00> : vector<1xf32>
    %72 = vector.multi_reduction <add>, %71, %cst_35 [0] : vector<32x1xf32> to vector<1xf32>
    %73 = vector.shape_cast %72 : vector<1xf32> to vector<1x1xf32>
    %cst_36 = arith.constant dense<0.000000e+00> : vector<1xf32>
    %74 = vector.multi_reduction <add>, %53, %cst_36 [0] : vector<32x1xf32> to vector<1xf32>
    %75 = vector.shape_cast %74 : vector<1xf32> to vector<1x1xf32>
    %cst_37 = arith.constant 1.000000e+00 : f32
    %76 = vector.broadcast %cst_37 : f32 to vector<1x1xf32>
    %77 = arith.maximumf %75, %76 : vector<1x1xf32>
    %78 = arith.divf %73, %77 : vector<1x1xf32>
    %79 = arith.addf %46, %78 : vector<1x1xf32>
    %c0_38 = arith.constant 0 : index
    %c0_39 = arith.constant 0 : index
    %80 = vector.load %arg11[%c0_38, %c0_39] : memref<1x1xf32, #tpu.memory_space<vmem>>, vector<1x1xf32>
    tpu.vector_store %arg11[%c0_38, %c0_39], %79 {strides = array<i32>} : memref<1x1xf32, #tpu.memory_space<vmem>>, vector<1x1xf32>,
    return
  }
  func.func @transform_0(%arg0: i32) -> (i32, i32) {
    %c0_i32 = arith.constant 0 : i32
    %c0_i32_0 = arith.constant 0 : i32
    %c0_i32_1 = arith.constant 0 : i32
    return %c0_i32, %c0_i32_0 : i32, i32
  }
  func.func @transform_1(%arg0: i32) -> (i32, i32) {
    %c0_i32 = arith.constant 0 : i32
    %c0_i32_0 = arith.constant 0 : i32
    %c0_i32_1 = arith.constant 0 : i32
    return %c0_i32, %c0_i32_0 : i32, i32
  }
  func.func @transform_2(%arg0: i32) -> (i32, i32) {
    %c0_i32 = arith.constant 0 : i32
    %c0_i32_0 = arith.constant 0 : i32
    %c0_i32_1 = arith.constant 0 : i32
    return %c0_i32, %c0_i32_0 : i32, i32
  }
  func.func @transform_3(%arg0: i32) -> (i32, i32) {
    %c0_i32 = arith.constant 0 : i32
    %c0_i32_0 = arith.constant 0 : i32
    %c0_i32_1 = arith.constant 0 : i32
    return %c0_i32, %c0_i32_0 : i32, i32
  }
  func.func @transform_4(%arg0: i32) -> (i32, i32) {
    %c0_i32 = arith.constant 0 : i32
    %c0_i32_0 = arith.constant 0 : i32
    %c0_i32_1 = arith.constant 0 : i32
    return %c0_i32, %c0_i32_0 : i32, i32
  }
  func.func @transform_5(%arg0: i32) -> (i32, i32) {
    %c0_i32 = arith.constant 0 : i32
    %c0_i32_0 = arith.constant 0 : i32
    %c0_i32_1 = arith.constant 0 : i32
    return %c0_i32, %c0_i32_0 : i32, i32
  }
  func.func @transform_6(%arg0: i32) -> (i32, i32) {
    %c0_i32 = arith.constant 0 : i32
    %c0_i32_0 = arith.constant 0 : i32
    %c0_i32_1 = arith.constant 0 : i32
    return %c0_i32, %c0_i32_0 : i32, i32
  }
  func.func @transform_7(%arg0: i32) -> (i32, i32) {
    %c0_i32 = arith.constant 0 : i32
    %c0_i32_0 = arith.constant 0 : i32
    %c0_i32_1 = arith.constant 0 : i32
    return %c0_i32, %c0_i32_0 : i32, i32
  }
  func.func @transform_8(%arg0: i32) -> (i32, i32) {
    %c0_i32 = arith.constant 0 : i32
    %c0_i32_0 = arith.constant 0 : i32
    %c0_i32_1 = arith.constant 0 : i32
    return %c0_i32, %c0_i32_0 : i32, i32
  }
  func.func @transform_9(%arg0: i32) -> (i32, i32) {
    %c0_i32 = arith.constant 0 : i32
    %c0_i32_0 = arith.constant 0 : i32
    %c0_i32_1 = arith.constant 0 : i32
    return %c0_i32, %c0_i32_0 : i32, i32
  }
  func.func @transform_10(%arg0: i32) -> (i32, i32) {
    %c0_i32 = arith.constant 0 : i32
    %c0_i32_0 = arith.constant 0 : i32
    %c0_i32_1 = arith.constant 0 : i32
    return %c0_i32, %c0_i32_0 : i32, i32
  }
}

</mosaic_0001>

<bundles_post_ra>
// kernel: prot_llm_forward.4
= control target key start
LH: loop header
LB: loop body
LE: loop exit
PB: predicated region body
PF: predicated region fallthrough
CT: control target
= control target key end

     0   :  { %v256_v1 = vmov 0   ;;  %vm73_vm0 = vcmask 523264   ;;  %v35_v15 = vlaneseq  ;;  %s334_s2 = inlined_call_operand.vmem [shape: bf16[64,128], index: 2, kind: input, shape index: {}]   ;;  %s335_s1 = inlined_call_operand.vmem [shape: bf16[32,64], index: 1, kind: input, shape index: {}]   ;;  %s336_s4 = inlined_call_operand.vmem [shape: s32[32,1], index: 4, kind: input, shape index: {}]   ;;  %s337_s3 = inlined_call_operand.vmem [shape: bf16[1,128], index: 3, kind: input, shape index: {}]   ;;  %s338_s0 = inlined_call_operand.vmem [shape: bf16[32,128], index: 0, kind: input, shape index: {}]   ;;  %s339_s5 = inlined_call_operand.vmem [shape: bf16[32,128], index: 5, kind: output, shape index: {}]  }
   0x1   :  { %v250_v0 = vld [vmem:[%s334_s2] sm:$0xff]   ;;  %249 = vset.pattern.permute.xlu1 %v256_v1  ;;  %248 = vset.pattern.permute.xlu0 %v256_v1  ;;  %v251_v2 = vld [vmem:[%s334_s2 + $0x8] sm:$0xff]   ;;  %v252_v3 = vld [vmem:[%s334_s2 + $0x10] sm:$0xff]  }
   0x2   :  { %235 = vmatprep.subr.bf16.mxu0 %v250_v0  ;;  %v254_v4 = vld [vmem:[%s335_s1] sm:$0xff]   ;;  %v139_v5 = vld [vmem:[%s336_s4 + $0x10] sm:$0xff]  ;;  %v140_v7 = vld [vmem:[%s336_s4 + $0x18] sm:$0xff]  ;;  %v36_v16 = vshrl.u32 %v35_v15, 7 }
   0x3   :  { %236 = vmatpush3.bf16.msra.mxu0 %v250_v0  ;;  %243 = vmatprep.mubr.msk.bf16.mxu0 %vm73_vm0, %v254_v4  ;;  %v137_v6 = vld [vmem:[%s336_s4] sm:$0xff]  ;;  %vm143_vm1 = vcmp.gt.s32.totalorder %v139_v5, 0  ;;  %vm144_vm3 = vcmp.gt.s32.totalorder %v140_v7, 0  ;;  %v138_v8 = vld [vmem:[%s336_s4 + $0x8] sm:$0xff]  ;;  %v253_v9 = vld [vmem:[%s334_s2 + $0x18] sm:$0xff]  }
   0x4   :  { %237 = vmatprep.subr.bf16.mxu0 %v251_v2  ;;  %vm141_vm2 = vcmp.gt.s32.totalorder %v137_v6, 0  ;;  %v147_v10 = vsel %vm143_vm1, 1, %v256_v1  ;;  %vm142_vm4 = vcmp.gt.s32.totalorder %v138_v8, 0  ;;  %v148_v12 = vsel %vm144_vm3, 1, %v256_v1  ;;  %v255_v14 = vld [vmem:[%s335_s1 + $0x8] sm:$0xff]   ;;  %v210_v24 = vld [vmem:[%s338_s0] sm:$0xff]  }
   0x5   :  { %v145_v11 = vsel %vm141_vm2, 1, %v256_v1  ;;  %156 = vperm.xlu1 %249, %v147_v10   ;;  %v146_v13 = vsel %vm142_vm4, 1, %v256_v1  ;;  %v33_v17 = vld [vmem:[%s337_s3] sm:$0x1]  ;;  %v37_v19 = vsub.s32 0, %v36_v16  ;;  %v227_v23 = vld [vmem:[%s338_s0 + $0x8] sm:$0xff]   ;;  %v211_v33 = vunpack.c.l.bf16 %v210_v24 }
   0x6   :  { %150 = vperm.xlu0 %248, %v145_v11   ;;  %v34_v18 = vunpack.c.l.bf16 %v33_v17  ;;  %v215_v28 = vunpack.c.l.bf16 %v227_v23  ;;  %v216_v30 = vunpack.c.h.bf16 %v227_v23  ;;  %v212_v35 = vunpack.c.h.bf16 %v210_v24 }
   0x7   :  { %238 = vmatpush3.bf16.msra.mxu0 %v251_v2 }
   0x8   :  { %239 = vmatprep.subr.bf16.mxu0 %v252_v3  ;;  %v38_v22 = vrot.slane %v34_v18, %v37_v19 }
   0x9   :  { %159 = vperm.xlu1 %249, %v148_v12  }
   0xa   :  { %153 = vperm.xlu0 %248, %v146_v13  }
   0xb   :  { %240 = vmatpush3.bf16.msra.mxu0 %v252_v3 }
   0xc   :  { %241 = vmatprep.subr.bf16.mxu0 %v253_v9 }
   0xf   :  { %242 = vmatpush3.bf16.msra.mxu0 %v253_v9 }
  0x12   :  { %244 = vmatmul.mubr.msk.bf16.vlgmr.msra.gmra.mrb[0].mxu0 %vm73_vm0, %v255_v14 }
  0x84   :  { %v157_v20 = vpop.permute.xlu1 %156 }
  0x85   :  { %v151_v21 = vpop.permute.xlu0 %150  ;;  %vm163_vm5 = vcmp.eq.s32.totalorder %v157_v20, 1 }
  0x86   :  { %vm161_vm7 = vcmp.eq.s32.totalorder %v151_v21, 1 }
  0x88   :  { %v160_v26 = vpop.permute.xlu1 %159 }
  0x89   :  { %v154_v31 = vpop.permute.xlu0 %153  ;;  %vm164_vm6 = vcmp.eq.s32.totalorder %v160_v26, 1 }
  0x8a   :  { %vm162_vm8 = vcmp.eq.s32.totalorder %v154_v31, 1 }
  0xe5   :  { %v245_v25 = vpop.f32.mrb[0].mxu0 }
  0xe6   :  { %v123_v27 = vadd.f32 %v245_v25, %v38_v22  ;;  %v114_v29 = vpop.f32.mrb[1].mxu0 }
  0xe7   :  { %v115_v32 = vadd.f32 %v114_v29, %v38_v22  ;;  %v246_v34 = vpop.f32.mrb[2].mxu0 }
  0xe8   :  { %v126_v36 = vadd.f32 %v246_v34, %v38_v22  ;;  %v117_v37 = vpop.f32.mrb[3].mxu0  ;;  %v167_v39 = vsel %vm163_vm5, %v123_v27, %v215_v28 }
  0xe9   :  { %v118_v38 = vadd.f32 %v117_v37, %v38_v22  ;;  %v165_v41 = vsel %vm161_vm7, %v115_v32, %v211_v33 }
  0xea   :  { %v168_v40 = vsel %vm164_vm6, %v126_v36, %v216_v30 }
  0xeb   :  { %v225_v42 = vpack.c.bf16 %v168_v40, %v167_v39  ;;  %v166_v43 = vsel %vm162_vm8, %v118_v38, %v212_v35 }
  0xec   :  { %v220_v44 = vpack.c.bf16 %v166_v43, %v165_v41 }
  0xed   :  { %228 = vst [vmem:[%s339_s5 + $0x8] sm:$0xff] %v225_v42  }
  0xee   :  { %221 = vst [vmem:[%s339_s5] sm:$0xff] %v220_v44  }

// kernel: prot_llm_forward.7
= control target key start
LH: loop header
LB: loop body
LE: loop exit
PB: predicated region body
PF: predicated region fallthrough
CT: control target
= control target key end

     0   :  { %16 = vsyncpa [#allocation3], 0  ;;  %s1408_s0 = inlined_call_operand.vmem [shape: bf16[32,128], index: 0, kind: input, shape index: {}]   ;;  %s1409_s1 = inlined_call_operand.vmem [shape: bf16[1,128], index: 1, kind: input, shape index: {}]   ;;  %s1410_s2 = inlined_call_operand.vmem [shape: bf16[128,256], index: 2, kind: input, shape index: {}]   ;;  %s1411_s3 = inlined_call_operand.vmem [shape: bf16[128,64], index: 3, kind: input, shape index: {}]   ;;  %s1412_s4 = inlined_call_operand.vmem [shape: bf16[64,32], index: 4, kind: input, shape index: {}]   ;;  %s1413_s5 = inlined_call_operand.vmem [shape: s32[32,1], index: 5, kind: input, shape index: {}]   ;;  %s1414_s6 = inlined_call_operand.vmem [shape: f32[32,1], index: 6, kind: input, shape index: {}]   ;;  %s1415_s7 = inlined_call_operand.vmem [shape: s32[32,1], index: 7, kind: input, shape index: {}]   ;;  %s1416_s8 = inlined_call_operand.vmem [shape: f32[32,1], index: 8, kind: input, shape index: {}]   ;;  %s1417_s9 = inlined_call_operand.hbm [shape: f32[32,256], index: 9, kind: output, shape index: {0}]   ;;  %s1418_s10 = inlined_call_operand.hbm [shape: f32[1,1], index: 10, kind: output, shape index: {1}]  }
   0x1   :  { %v792_v0 = vld [vmem:[%s1408_s0 + $0x8] sm:$0xff]   ;;  %v785_v1 = vld [vmem:[%s1408_s0] sm:$0xff]   ;;  %v852_v11 = vld [vmem:[%s1410_s2 + $0x14] ss:$8 sps:$4 sm:$0xff]  }
   0x2   :  { %v1050_v2 = vunpack.c.l.bf16 %v792_v0  ;;  %v1052_v3 = vunpack.c.l.bf16 %v785_v1  ;;  %v1054_v4 = vunpack.c.h.bf16 %v792_v0  ;;  %v1056_v5 = vunpack.c.h.bf16 %v785_v1  ;;  %v848_v6 = vld [vmem:[%s1410_s2 + $0x4] ss:$8 sps:$4 sm:$0xff]   ;;  %v850_v7 = vld [vmem:[%s1410_s2] ss:$8 sps:$4 sm:$0xff]   ;;  %v854_v12 = vld [vmem:[%s1410_s2 + $0x10] ss:$8 sps:$4 sm:$0xff]  }
   0x3   :  { %v851_v8 = vld [vmem:[%s1411_s3] sm:$0xff]   ;;  %182 = vmatprep.subr.bf16.mxu0 %v848_v6  ;;  %v855_v15 = vld [vmem:[%s1411_s3 + $0x8] sm:$0xff]  }
   0x4   :  { %v47_v9 = vmul.f32 %v1050_v2, %v1050_v2  ;;  %v45_v10 = vmul.f32 %v1052_v3, %v1052_v3  ;;  %183 = vmatpush1.bf16.msra.mxu0 %v850_v7  ;;  %809 = vmatprep.subr.bf16.mxu1 %v851_v8  ;;  %v48_v13 = vmul.f32 %v1054_v4, %v1054_v4 }
   0x5   :  { %v46_v14 = vmul.f32 %v1056_v5, %v1056_v5  ;;  %810 = vmatpush3.bf16.msra.mxu1 %v851_v8  ;;  %184 = vmatprep.subr.bf16.mxu0 %v852_v11 }
   0x6   :  { %53 = vadd.xlane.f32.xlu1 %v47_v9  ;;  %49 = vadd.xlane.f32.xlu0 %v45_v10 }
   0x7   :  { %811 = vmatprep.subr.bf16.mxu1 %v855_v15 }
   0x8   :  { %185 = vmatpush1.bf16.msra.mxu0 %v854_v12 }
   0x9   :  { %812 = vmatpush3.bf16.msra.mxu1 %v855_v15 }
   0xa   :  { %55 = vadd.xlane.f32.xlu1 %v48_v13  ;;  %51 = vadd.xlane.f32.xlu0 %v46_v14 }
   0xb   :  { %17 = vsyncpa [#allocation5], 0  ;;  %v856_v16 = vld [vmem:[%s1410_s2 + $0x24] ss:$8 sps:$4 sm:$0xff]   ;;  %v858_v17 = vld [vmem:[%s1410_s2 + $0x20] ss:$8 sps:$4 sm:$0xff]   ;;  %v76_v46 = vlaneseq }
   0xc   :  { %v859_v18 = vld [vmem:[%s1411_s3 + $0x10] sm:$0xff]   ;;  %186 = vmatprep.subr.bf16.mxu0 %v856_v16  ;;  %v863_v21 = vld [vmem:[%s1411_s3 + $0x18] sm:$0xff]   ;;  %v864_v22 = vld [vmem:[%s1410_s2 + $0x44] ss:$8 sps:$4 sm:$0xff]   ;;  %v984_v27 = vmov 0   ;;  %vm539_vm0 = vcmask 523264  }
   0xd   :  { %187 = vmatpush1.bf16.msra.mxu0 %v858_v17  ;;  %813 = vmatprep.subr.bf16.mxu1 %v859_v18  ;;  %v860_v19 = vld [vmem:[%s1410_s2 + $0x34] ss:$8 sps:$4 sm:$0xff]   ;;  %v862_v20 = vld [vmem:[%s1410_s2 + $0x30] ss:$8 sps:$4 sm:$0xff]   ;;  %v866_v23 = vld [vmem:[%s1410_s2 + $0x40] ss:$8 sps:$4 sm:$0xff]  }
   0xe   :  { %814 = vmatpush3.bf16.msra.mxu1 %v859_v18  ;;  %188 = vmatprep.subr.bf16.mxu0 %v860_v19  ;;  %v867_v24 = vld [vmem:[%s1411_s3 + $0x20] sm:$0xff]   ;;  %v868_v25 = vld [vmem:[%s1410_s2 + $0x54] ss:$8 sps:$4 sm:$0xff]   ;;  %v871_v26 = vld [vmem:[%s1411_s3 + $0x28] sm:$0xff]   ;;  %v77_v49 = vshrl.u32 %v76_v46, 7  ;;  %vm603_vm1 = vcmask 261120  }
   0xf   :  { %815 = vmatprep.subr.bf16.mxu1 %v863_v21  ;;  %214 = vmatprep.mubr.bf16.mxu0 %v984_v27  ;;  %v870_v28 = vld [vmem:[%s1410_s2 + $0x50] ss:$8 sps:$4 sm:$0xff]   ;;  %v872_v29 = vld [vmem:[%s1410_s2 + $0x64] ss:$8 sps:$4 sm:$0xff]   ;;  %v874_v31 = vld [vmem:[%s1410_s2 + $0x60] ss:$8 sps:$4 sm:$0xff]  }
  0x10   :  { %v875_v30 = vld [vmem:[%s1411_s3 + $0x30] sm:$0xff]   ;;  %847 = vset.pattern.permute.xlu1 %v984_v27  ;;  %846 = vset.pattern.permute.xlu0 %v984_v27  ;;  %v879_v33 = vld [vmem:[%s1411_s3 + $0x38] sm:$0xff]   ;;  %v880_v35 = vld [vmem:[%s1412_s4] sm:$0xff]   ;;  %v78_v52 = vsub.s32 0, %v77_v49 }
  0x11   :  { %189 = vmatpush1.bf16.msra.mxu0 %v862_v20  ;;  %v876_v32 = vld [vmem:[%s1410_s2 + $0x74] ss:$8 sps:$4 sm:$0xff]   ;;  %v878_v34 = vld [vmem:[%s1410_s2 + $0x70] ss:$8 sps:$4 sm:$0xff]   ;;  %v74_v50 = vld [vmem:[%s1409_s1] sm:$0x1] }
  0x12   :  { %816 = vmatpush3.bf16.msra.mxu1 %v863_v21  ;;  %190 = vmatprep.subr.bf16.mxu0 %v864_v22  ;;  %v75_v51 = vunpack.c.l.bf16 %v74_v50  ;;  %v881_v8 = vld [vmem:[%s1412_s4 + $0x8] sm:$0xff]  }
  0x13   :  { %817 = vmatprep.subr.bf16.mxu1 %v867_v24 }
  0x14   :  { %v79_v55 = vrot.slane %v75_v51, %v78_v52 }
  0x15   :  { %191 = vmatpush1.bf16.msra.mxu0 %v866_v23 }
  0x16   :  { %818 = vmatpush3.bf16.msra.mxu1 %v867_v24  ;;  %192 = vmatprep.subr.bf16.mxu0 %v868_v25 }
  0x17   :  { %819 = vmatprep.subr.bf16.mxu1 %v871_v26 }
  0x19   :  { %193 = vmatpush1.bf16.msra.mxu0 %v870_v28 }
  0x1a   :  { %820 = vmatpush3.bf16.msra.mxu1 %v871_v26  ;;  %194 = vmatprep.subr.bf16.mxu0 %v872_v29 }
  0x1b   :  { %821 = vmatprep.subr.bf16.mxu1 %v875_v30 }
  0x1d   :  { %195 = vmatpush1.bf16.msra.mxu0 %v874_v31 }
  0x1e   :  { %822 = vmatpush3.bf16.msra.mxu1 %v875_v30  ;;  %196 = vmatprep.subr.bf16.mxu0 %v876_v32 }
  0x1f   :  { %823 = vmatprep.subr.bf16.mxu1 %v879_v33 }
  0x21   :  { %197 = vmatpush1.bf16.msra.mxu0 %v878_v34 }
  0x22   :  { %824 = vmatpush3.bf16.msra.mxu1 %v879_v33  ;;  %829 = vmatprep.subr.bf16.mxu0 %v880_v35 }
  0x93   :  { %v54_v36 = vpop.xlane.xlu1 %53  ;;  %v50_v37 = vpop.xlane.xlu0 %49 }
  0x94   :  { %v60_v38 = vmul.f32 0.0078125, %v54_v36  ;;  %v58_v39 = vmul.f32 0.0078125, %v50_v37 }
  0x96   :  { %v64_v40 = vadd.f32 1e-06, %v60_v38  ;;  %v62_v41 = vadd.f32 1e-06, %v58_v39 }
  0x97   :  { %v56_v42 = vpop.xlane.xlu1 %55  ;;  %v52_v43 = vpop.xlane.xlu0 %51 }
  0x98   :  { %884 = vrsqrt.f32 %v64_v40  ;;  %v61_v44 = vmul.f32 0.0078125, %v56_v42  ;;  %v59_v45 = vmul.f32 0.0078125, %v52_v43 }
  0x99   :  { %886 = vrsqrt.f32 %v62_v41 }
  0x9a   :  { %v65_v47 = vadd.f32 1e-06, %v61_v44  ;;  %v63_v48 = vadd.f32 1e-06, %v59_v45 }
  0x9c   :  { %888 = vrsqrt.f32 %v65_v47 }
  0x9d   :  { %890 = vrsqrt.f32 %v63_v48 }
  0xa2   :  { %v885_v53 = vpop.eup %884 }
  0xa3   :  { %v887_v54 = vpop.eup %886  ;;  %v72_v56 = vmul.f32 %v885_v53, %v1050_v2  ;;  %v882_v2 = vld [vmem:[%s1412_s4 + $0x10] sm:$0xff]  }
  0xa4   :  { %v70_v58 = vmul.f32 %v887_v54, %v1052_v3  ;;  %v883_v3 = vld [vmem:[%s1412_s4 + $0x18] sm:$0xff]  }
  0xa5   :  { %v82_v62 = vmul.f32 %v79_v55, %v72_v56  ;;  %v244_v56 = vld [vmem:[%s1413_s5 + $0x8] sm:$0xff] }
  0xa6   :  { %v889_v57 = vpop.eup %888  ;;  %v80_v0 = vmul.f32 %v79_v55, %v70_v58  ;;  %v596_v58 = vld [vmem:[%s1415_s7 + $0x8] sm:$0xff] }
  0xa7   :  { %v891_v59 = vpop.eup %890  ;;  %v73_v60 = vmul.f32 %v889_v57, %v1054_v4  ;;  %v595_v57 = vld [vmem:[%s1415_s7] sm:$0xff] }
  0xa8   :  { %v71_v61 = vmul.f32 %v891_v59, %v1056_v5  ;;  %v243_v59 = vld [vmem:[%s1413_s5] sm:$0xff] }
  0xa9   :  { %v83_v63 = vmul.f32 %v79_v55, %v73_v60  ;;  %v245_v60 = vld [vmem:[%s1413_s5 + $0x10] sm:$0xff] }
  0xaa   :  { %v81_v1 = vmul.f32 %v79_v55, %v71_v61  ;;  %v597_v61 = vld [vmem:[%s1415_s7 + $0x10] sm:$0xff] }
  0xab   :  { %v85_v6 = vpack.c.bf16 %v83_v63, %v82_v62 }
  0xac   :  { %v84_v7 = vpack.c.bf16 %v81_v1, %v80_v0  ;;  %v246_v0 = vld [vmem:[%s1413_s5 + $0x18] sm:$0xff]  ;;  %s985_s5 = smov [#allocation2]  }
  0xad   :  { %v598_v1 = vld [vmem:[%s1415_s7 + $0x18] sm:$0xff]  ;;  %s729_s7 = sshll.u32 %s985_s5, 4  ;;  %s730_s7 = int_to_ptr.vmem [resolvable:$true] %s729_s7 }
  0xae   :  { %215 = vmatmul.mubr.bf16.vlgmr.msra.gmra.mrb[0].mxu0 %v84_v7  ;;  %825 = vmatprep.mubr.bf16.mxu1 %v84_v7  ;;  %s936_s23 = scalar_lea.vmem %s730_s7, 1024  ;;  %p941_p1 = scmp.lt.s32.totalorder %s730_s7, %s730_s7 }
  0xaf   :  { %826 = vmatmul.mubr.bf16.vlgmr.msra.gmra.mrb[0].mxu1 %v85_v6  ;;  %224 = vmatprep.mubr.bf16.mxu0 %v984_v27  ;;  %p937_p0 = scmp.ne.s32.totalorder %s730_s7, %s936_s23  ;;  %p942_p2 = scmp.lt.s32.totalorder %s936_s23, %s936_s23 }
  0xb0   :  { %830 = vmatpush3.bf16.msra.mxu0 %v880_v35 }
  0xb1   :  { %831 = vmatprep.subr.bf16.mxu0 %v881_v8  ;;  %p943_p3 = por %p942_p2, %p941_p1 }
  0xb3   :  { %p944_p4 = pnand %p943_p3, %p937_p0 }
  0xb4   :  { %832 = vmatpush3.bf16.msra.mxu0 %v881_v8 }
  0xb5   :  { %833 = vmatprep.subr.bf16.mxu0 %v882_v2 }
  0xb6   :  { %225 = vmatmul.mubr.bf16.gmra.mrb[4].mxu0 %v85_v6  ;;  %v1253_v6 = vand.u32 127, %v76_v46 }
  0xb8   :  { %834 = vmatpush3.bf16.msra.mxu0 %v882_v2 }
  0xb9   :  { %835 = vmatprep.subr.bf16.mxu0 %v883_v3 }
  0xbc   :  { %836 = vmatpush3.bf16.msra.mxu0 %v883_v3  ;;  %v1262_v3 = vadd.s32 128, %v1253_v6 }
 0x181   :  { %v1162_v4 = vpop.f32.mrb[0].mxu0 }
 0x182   :  { %235 = vst [vmem:[#allocation2] sm:$0xff] %v1162_v4  ;;  %v1165_v5 = vpop.f32.mrb[1].mxu0  ;;  %v827_v9 = vpop.f32.mrb[0].mxu1 }
 0x183   :  { %236 = vst [vmem:[#allocation2 + $0x8] sm:$0xff] %v1165_v5  ;;  %v1168_v10 = vpop.f32.mrb[2].mxu0  ;;  %v490_v11 = vpop.f32.mrb[1].mxu1  ;;  %v251_v12 = vmax.f32 %v1162_v4, %v1165_v5 }
 0x184   :  { %237 = vst [vmem:[#allocation2 + $0x10] sm:$0xff] %v1168_v10  ;;  %v1173_v13 = vpop.f32.mrb[3].mxu0  ;;  %v828_v14 = vpop.f32.mrb[2].mxu1 }
 0x185   :  { %238 = vst [vmem:[#allocation2 + $0x18] sm:$0xff] %v1173_v13  ;;  %v506_v15 = vpack.c.bf16 %v828_v14, %v827_v9  ;;  %v493_v16 = vpop.f32.mrb[3].mxu1  ;;  %252 = vmax.xlane.f32.xlu0 %v251_v12  ;;  %v254_v17 = vmax.f32 %v1168_v10, %v1173_v13 }
 0x186   :  { %v505_v18 = vpack.c.bf16 %v493_v16, %v490_v11 }
 0x187   :  { %255 = vmax.xlane.f32.xlu1 %v254_v17 }
 0x188   :  { %837 = vmatprep.mubr.msk.bf16.mxu0 %vm539_vm0, %v505_v18 }
 0x189   :  { %v1178_v19 = vpop.f32.mrb[4].mxu0  ;;  %838 = vmatmul.mubr.msk.bf16.vlgmr.msra.gmra.mrb[8].mxu0 %vm539_vm0, %v506_v15 }
 0x18a   :  { %239 = vst [vmem:[#allocation2 + $0x20] sm:$0xff] %v1178_v19  ;;  %v1181_v20 = vpop.f32.mrb[5].mxu0 }
 0x18b   :  { %240 = vst [vmem:[#allocation2 + $0x28] sm:$0xff] %v1181_v20  ;;  %v1184_v21 = vpop.f32.mrb[6].mxu0  ;;  %v257_v22 = vmax.f32 %v1178_v19, %v1181_v20 }
 0x18c   :  { %241 = vst [vmem:[#allocation2 + $0x30] sm:$0xff] %v1184_v21  ;;  %v1189_v23 = vpop.f32.mrb[7].mxu0 }
 0x18d   :  { %242 = vst [vmem:[#allocation2 + $0x38] sm:$0xff] %v1189_v23  ;;  %258 = vmax.xlane.f32.xlu0 %v257_v22  ;;  %v260_v24 = vmax.f32 %v1184_v21, %v1189_v23 }
 0x212   :  { %v1194_v25 = vpop.xlane.xlu0 %252 }
 0x213   :  { %v263_v26 = vsub.f32 %v1162_v4, %v1194_v25  ;;  %v264_v27 = vsub.f32 %v1165_v5, %v1194_v25 }
 0x214   :  { %v1200_v28 = vpop.xlane.xlu1 %255 }
 0x215   :  { %v271_v29 = vmul.f32 1.442695, %v263_v26  ;;  %v273_v30 = vmul.f32 1.442695, %v264_v27  ;;  %v265_v31 = vsub.f32 %v1168_v10, %v1200_v28  ;;  %v266_v32 = vsub.f32 %v1173_v13, %v1200_v28 }
 0x217   :  { %892 = vpow2.f32 %v271_v29  ;;  %v275_v33 = vmul.f32 1.442695, %v265_v31  ;;  %v277_v34 = vmul.f32 1.442695, %v266_v32 }
 0x218   :  { %894 = vpow2.f32 %v273_v30 }
 0x219   :  { %896 = vpow2.f32 %v275_v33 }
 0x21a   :  { %898 = vpow2.f32 %v277_v34  ;;  %v1206_v35 = vpop.xlane.xlu0 %258 }
 0x21b   :  { %v267_v36 = vsub.f32 %v1178_v19, %v1206_v35  ;;  %v268_v37 = vsub.f32 %v1181_v20, %v1206_v35 }
 0x21d   :  { %v279_v38 = vmul.f32 1.442695, %v267_v36  ;;  %v281_v39 = vmul.f32 1.442695, %v268_v37 }
 0x21f   :  { %900 = vpow2.f32 %v279_v38 }
 0x220   :  { %902 = vpow2.f32 %v281_v39 }
 0x221   :  { %v893_v40 = vpop.eup %892 }
 0x222   :  { %v895_v41 = vpop.eup %894 }
 0x223   :  { %v897_v42 = vpop.eup %896  ;;  %v287_v43 = vadd.f32 %v895_v41, %v893_v40 }
 0x224   :  { %v899_v44 = vpop.eup %898 }
 0x225   :  { %v290_v45 = vadd.f32 %v899_v44, %v897_v42 }
 0x229   :  { %v901_v47 = vpop.eup %900 }
 0x22a   :  { %v903_v48 = vpop.eup %902 }
 0x22b   :  { %v293_v49 = vadd.f32 %v903_v48, %v901_v47 }
 0x25c   :  { %v1212_v50 = vpop.f32.mrb[8].mxu0 }
 0x25d   :  { %v1214_v51 = vpop.f32.mrb[9].mxu0  ;;  %v610_v52 = vsel %vm603_vm1, %v1212_v50, -inf }
 0x25e   :  { %611 = vmax.xlane.f32.xlu1 %v610_v52  ;;  %v1218_v53 = vpop.f32.mrb[10].mxu0  ;;  %v604_v54 = vsel %vm603_vm1, %v1214_v51, -inf }
 0x25f   :  { %605 = vmax.xlane.f32.xlu0 %v604_v54  ;;  %v1222_v55 = vpop.f32.mrb[11].mxu0  ;;  %v613_v62 = vsel %vm603_vm1, %v1218_v53, -inf }
 0x260   :  { %v607_v63 = vsel %vm603_vm1, %v1222_v55, -inf }
 0x263   :  { %261 = vmax.xlane.f32.xlu0 %v260_v24 }
 0x26f   :  { %318 = vperm.xlu1 %847, %v244_v56  }
 0x273   :  { %653 = vperm.xlu1 %847, %v595_v57  }
 0x277   :  { %656 = vperm.xlu1 %847, %v596_v58  }
 0x279   :  { %315 = vperm.xlu0 %846, %v243_v59  }
 0x27b   :  { %321 = vperm.xlu1 %847, %v245_v60  }
 0x27f   :  { %659 = vperm.xlu1 %847, %v597_v61  }
 0x298   :  { %291 = vadd.xlane.f32.xlu0 %v290_v45 }
 0x29c   :  { %294 = vadd.xlane.f32.xlu0 %v293_v49 }
 0x2a3   :  { %614 = vmax.xlane.f32.xlu1 %v613_v62 }
 0x2a7   :  { %608 = vmax.xlane.f32.xlu1 %v607_v63 }
 0x2b8   :  { %324 = vperm.xlu1 %847, %v246_v0  }
 0x2bc   :  { %662 = vperm.xlu1 %847, %v598_v1  }
 0x2e0   :  { %288 = vadd.xlane.f32.xlu1 %v287_v43 }
 0x2eb   :  { %v1255_v7 = vpop.xlane.xlu1 %611 }
 0x2ec   :  { %v618_v8 = vsub.f32 %v1212_v50, %v1255_v7  ;;  %v1259_v2 = vpop.xlane.xlu0 %605 }
 0x2ed   :  { %v616_v9 = vsub.f32 %v1214_v51, %v1259_v2 }
 0x2ee   :  { %v624_v11 = vmul.f32 1.442695, %v618_v8 }
 0x2ef   :  { %v620_v12 = vmul.f32 1.442695, %v616_v9  ;;  %v319_v14 = vpop.permute.xlu1 %318 }
 0x2f0   :  { %904 = vpow2.f32 %v624_v11  ;;  %vm328_vm2 = vcmp.eq.s32.totalorder %v1253_v6, %v319_v14  ;;  %vm329_vm3 = vcmp.eq.s32.totalorder %v1262_v3, %v319_v14  ;;  %v1268_v46 = vpop.xlane.xlu0 %261 }
 0x2f1   :  { %906 = vpow2.f32 %v620_v12  ;;  %v269_v15 = vsub.f32 %v1184_v21, %v1268_v46  ;;  %v270_v16 = vsub.f32 %v1189_v23, %v1268_v46  ;;  %v336_v17 = vsel %vm328_vm2, %v1168_v10, 0.0 }
 0x2f2   :  { %v337_v18 = vsel %vm329_vm3, %v1173_v13, 0.0 }
 0x2f3   :  { %v283_v22 = vmul.f32 1.442695, %v269_v15  ;;  %v285_v24 = vmul.f32 1.442695, %v270_v16  ;;  %v654_v26 = vpop.permute.xlu1 %653  ;;  %v345_v27 = vadd.f32 %v337_v18, %v336_v17 }
 0x2f4   :  { %vm664_vm9 = vcmp.eq.s32.totalorder %v1253_v6, %v654_v26 }
 0x2f5   :  { %908 = vpow2.f32 %v283_v22  ;;  %v668_v43 = vsel %vm664_vm9, %v1214_v51, 0.0 }
 0x2f6   :  { %910 = vpow2.f32 %v285_v24  ;;  %v672_v44 = vsel %vm603_vm1, %v668_v43, 0.0 }
 0x2f7   :  { %v657_v29 = vpop.permute.xlu1 %656 }
 0x2f8   :  { %vm665_vm4 = vcmp.eq.s32.totalorder %v1253_v6, %v657_v29  ;;  %v316_v30 = vpop.permute.xlu0 %315 }
 0x2f9   :  { %vm326_vm5 = vcmp.eq.s32.totalorder %v1253_v6, %v316_v30  ;;  %vm327_vm6 = vcmp.eq.s32.totalorder %v1262_v3, %v316_v30  ;;  %v669_v31 = vsel %vm665_vm4, %v1222_v55, 0.0 }
 0x2fa   :  { %v905_v32 = vpop.eup %904  ;;  %v334_v10 = vsel %vm326_vm5, %v1162_v4, 0.0  ;;  %v335_v13 = vsel %vm327_vm6, %v1165_v5, 0.0  ;;  %v675_v62 = vsel %vm603_vm1, %v669_v31, 0.0 }
 0x2fb   :  { %v907_v33 = vpop.eup %906  ;;  %v322_v34 = vpop.permute.xlu1 %321  ;;  %v634_v36 = vsel %vm603_vm1, %v905_v32, 0.0  ;;  %v342_v37 = vadd.f32 %v335_v13, %v334_v10 }
 0x2fc   :  { %vm330_vm7 = vcmp.eq.s32.totalorder %v1253_v6, %v322_v34  ;;  %vm331_vm8 = vcmp.eq.s32.totalorder %v1262_v3, %v322_v34  ;;  %635 = vadd.xlane.f32.xlu1 %v634_v36  ;;  %v628_v38 = vsel %vm603_vm1, %v907_v33, 0.0 }
 0x2fd   :  { %629 = vadd.xlane.f32.xlu0 %v628_v38  ;;  %v338_v39 = vsel %vm330_vm7, %v1178_v19, 0.0  ;;  %v339_v40 = vsel %vm331_vm8, %v1181_v20, 0.0 }
 0x2fe   :  { %v348_v4 = vadd.f32 %v339_v40, %v338_v39 }
 0x2ff   :  { %v909_v41 = vpop.eup %908  ;;  %v660_v45 = vpop.permute.xlu1 %659 }
 0x300   :  { %v911_v5 = vpop.eup %910  ;;  %vm666_vm12 = vcmp.eq.s32.totalorder %v1253_v6, %v660_v45 }
 0x301   :  { %v296_v42 = vadd.f32 %v911_v5, %v909_v41 }
 0x303   :  { %297 = vadd.xlane.f32.xlu0 %v296_v42 }
 0x307   :  { %343 = vadd.xlane.f32.xlu0 %v342_v37 }
 0x30b   :  { %673 = vadd.xlane.f32.xlu0 %v672_v44 }
 0x30f   :  { %349 = vadd.xlane.f32.xlu0 %v348_v4 }
 0x330   :  { %v1291_v47 = vpop.xlane.xlu1 %614 }
 0x331   :  { %v619_v19 = vsub.f32 %v1218_v53, %v1291_v47 }
 0x333   :  { %v626_v49 = vmul.f32 1.442695, %v619_v19 }
 0x334   :  { %v1295_v20 = vpop.xlane.xlu1 %608 }
 0x335   :  { %v617_v48 = vsub.f32 %v1222_v55, %v1295_v20 }
 0x337   :  { %v622_v52 = vmul.f32 1.442695, %v617_v48 }
 0x338   :  { %v325_v54 = vpop.permute.xlu1 %324 }
 0x339   :  { %912 = vpow2.f32 %v622_v52  ;;  %vm332_vm10 = vcmp.eq.s32.totalorder %v1253_v6, %v325_v54  ;;  %vm333_vm11 = vcmp.eq.s32.totalorder %v1262_v3, %v325_v54 }
 0x33a   :  { %v340_v51 = vsel %vm332_vm10, %v1184_v21, 0.0  ;;  %v341_v56 = vsel %vm333_vm11, %v1189_v23, 0.0  ;;  %914 = vpow2.f32 %v626_v49  ;;  %v670_v21 = vsel %vm666_vm12, %v1212_v50, 0.0 }
 0x33b   :  { %v351_v57 = vadd.f32 %v341_v56, %v340_v51  ;;  %v678_v23 = vsel %vm603_vm1, %v670_v21, 0.0 }
 0x33c   :  { %v663_v61 = vpop.permute.xlu1 %662 }
 0x33d   :  { %352 = vadd.xlane.f32.xlu0 %v351_v57  ;;  %vm667_vm13 = vcmp.eq.s32.totalorder %v1253_v6, %v663_v61 }
 0x33e   :  { %v671_v63 = vsel %vm667_vm13, %v1218_v53, 0.0 }
 0x33f   :  { %v681_v0 = vsel %vm603_vm1, %v671_v63, 0.0 }
 0x343   :  { %v913_v58 = vpop.eup %912 }
 0x344   :  { %v631_v59 = vsel %vm603_vm1, %v913_v58, 0.0  ;;  %v915_v60 = vpop.eup %914 }
 0x345   :  { %632 = vadd.xlane.f32.xlu1 %v631_v59  ;;  %v637_v55 = vsel %vm603_vm1, %v915_v60, 0.0 }
 0x349   :  { %638 = vadd.xlane.f32.xlu1 %v637_v55 }
 0x34d   :  { %346 = vadd.xlane.f32.xlu1 %v345_v27 }
 0x351   :  { %676 = vadd.xlane.f32.xlu1 %v675_v62 }
 0x355   :  { %679 = vadd.xlane.f32.xlu1 %v678_v23 }
 0x359   :  { %682 = vadd.xlane.f32.xlu1 %v681_v0 }
 0x35a   :  { %947 = shalt.err (!%p944_p4)
}
 0x35b   :  { %s948_s1 = scalar_lea.hbm %s1417_s9, 1024 }
 0x35c   :  { %p949_p5 = scmp.ne.s32.totalorder %s1417_s9, %s948_s1  ;;  %p952_p6 = scmp.lt.u32.totalorder %s948_s1, %s1417_s9 }
 0x35e   :  { %p954_p7 = pnand %p952_p6, %p949_p5 }
 0x360   :  { %957 = shalt.err (!%p954_p7)
}
 0x361   :  { %s986_s28 = smov 256   ;;  %s987_s4 = smov 16   ;;  %v292_v50 = vpop.xlane.xlu0 %291  ;;  %v1327_v6 = vld [vmem:[%s1414_s6 + $0x8] sm:$0xff]  ;;  %v1337_v3 = vld [vmem:[%s1414_s6] sm:$0xff]  ;;  %vm362_vm14 = vcmask 7168   ;;  %v1355_v18 = vld [vmem:[%s1416_s8 + $0x10] sm:$0xff] }
 0x362   :  { %735 = dma.vmem_to_hbm [thread:$0]  %s730_s7, 1024, %s1417_s9, [#allocation3], %s986_s28, %s986_s28, %s987_s4   ;;  %v376_v11 = vsel %vm362_vm14, %v1337_v3, 0.0  ;;  %v377_v14 = vsel %vm362_vm14, %v1327_v6, 0.0  ;;  %v708_v29 = vsel %vm362_vm14, %v1355_v18, 0.0  ;;  %vm722_vm15 = vcmask 0  }
 0x363   :  { %v1332_v8 = vld [vmem:[%s1416_s8 + $0x8] sm:$0xff]  ;;  %v1344_v12 = vld [vmem:[%s1416_s8] sm:$0xff]  ;;  %v249_v22 = vld [vmem:[%s1414_s6 + $0x10] sm:$0xff]  ;;  %v378_v24 = vadd.f32 %v377_v14, %v376_v11 }
 0x364   :  { %v705_v16 = vsel %vm362_vm14, %v1344_v12, 0.0  ;;  %v706_v17 = vsel %vm362_vm14, %v1332_v8, 0.0  ;;  %v379_v26 = vsel %vm362_vm14, %v249_v22, 0.0  ;;  %v1366_v30 = vld [vmem:[%s1416_s8 + $0x18] sm:$0xff] }
 0x365   :  { %v295_v53 = vpop.xlane.xlu0 %294  ;;  %v707_v27 = vadd.f32 %v706_v17, %v705_v16  ;;  %v250_v32 = vld [vmem:[%s1414_s6 + $0x18] sm:$0xff]  ;;  %v380_v10 = vadd.f32 %v379_v26, %v378_v24  ;;  %v710_v34 = vsel %vm362_vm14, %v1366_v30, 0.0  ;;  %s988_s6 = smov [#allocation4]  }
 0x366   :  { %v381_v13 = vsel %vm362_vm14, %v250_v32, 0.0  ;;  %s742_s8 = sshll.u32 %s988_s6, 4  ;;  %s743_s8 = int_to_ptr.vmem [resolvable:$true] %s742_s8 }
 0x367   :  { %v709_v33 = vadd.f32 %v708_v29, %v707_v27  ;;  %v382_v36 = vadd.f32 %v381_v13, %v380_v10  ;;  %s958_s23 = scalar_lea.vmem %s743_s8, 16  ;;  %s962_s2 = scalar_lea.vmem %s743_s8, 32 }
 0x368   :  { %p959_p8 = scmp.ne.s32.totalorder %s743_s8, %s958_s23  ;;  %p963_p9 = scmp.lt.s32.totalorder %s743_s8, %s743_s8 }
 0x369   :  { %v711_v38 = vadd.f32 %v710_v34, %v709_v33  ;;  %v383_v41 = vrot.slane %v382_v36, 4  ;;  %p964_p10 = scmp.lt.s32.totalorder %s962_s2, %s958_s23 }
 0x36b   :  { %v712_v43 = vrot.slane %v711_v38, 4  ;;  %v384_v52 = vadd.f32 %v383_v41, %v382_v36  ;;  %p965_p11 = por %p964_p10, %p963_p9 }
 0x36d   :  { %v289_v9 = vpop.xlane.xlu1 %288  ;;  %v713_v57 = vadd.f32 %v712_v43, %v711_v38  ;;  %v385_v62 = vrot.slane %v384_v52, 2  ;;  %p966_p12 = pnand %p965_p11, %p959_p8 }
 0x36e   :  { %916 = vlog2.f32 %v289_v9 }
 0x36f   :  { %918 = vlog2.f32 %v295_v53  ;;  %v714_v0 = vrot.slane %v713_v57, 2  ;;  %v386_v14 = vadd.f32 %v385_v62, %v384_v52 }
 0x370   :  { %920 = vlog2.f32 %v292_v50 }
 0x371   :  { %v715_v24 = vadd.f32 %v714_v0, %v713_v57 }
 0x373   :  { %v716_v34 = vrot.slane %v715_v24, 1 }
 0x375   :  { %v717_v43 = vadd.f32 %v716_v34, %v715_v24 }
 0x378   :  { %v917_v39 = vpop.eup %916 }
 0x379   :  { %v919_v4 = vpop.eup %918  ;;  %v300_v42 = vmul.f32 0.6931472, %v917_v39 }
 0x37a   :  { %v921_v5 = vpop.eup %920  ;;  %v304_v48 = vmul.f32 0.6931472, %v919_v4 }
 0x37b   :  { %v302_v54 = vmul.f32 0.6931472, %v921_v5  ;;  %v307_v56 = vadd.f32 %v300_v42, %v1194_v25 }
 0x37c   :  { %v309_v55 = vadd.f32 %v304_v48, %v1206_v35 }
 0x37d   :  { %v308_v63 = vadd.f32 %v302_v54, %v1200_v28 }
 0x389   :  { %v636_v37 = vpop.xlane.xlu1 %635 }
 0x38a   :  { %v630_v1 = vpop.xlane.xlu0 %629 }
 0x390   :  { %v298_v15 = vpop.xlane.xlu0 %297 }
 0x391   :  { %922 = vlog2.f32 %v298_v15 }
 0x392   :  { %924 = vlog2.f32 %v630_v1 }
 0x393   :  { %926 = vlog2.f32 %v636_v37 }
 0x394   :  { %v344_v31 = vpop.xlane.xlu0 %343 }
 0x395   :  { %v354_v60 = vsub.f32 %v307_v56, %v344_v31  ;;  %v387_v31 = vrot.slane %v386_v14, 1  ;;  %v718_v56 = vmax.f32 %v717_v43, 1.0 }
 0x397   :  { %v358_v25 = vmul.f32 %v354_v60, %v1337_v3  ;;  %v388_v4 = vadd.f32 %v387_v31, %v386_v14 }
 0x398   :  { %v674_v40 = vpop.xlane.xlu0 %673 }
 0x399   :  { %v363_v28 = vsel %vm362_vm14, %v358_v25, 0.0  ;;  %v389_v52 = vmax.f32 %v388_v4, 1.0 }
 0x39b   :  { %v923_v44 = vpop.eup %922 }
 0x39c   :  { %v925_v19 = vpop.eup %924  ;;  %v350_v49 = vpop.xlane.xlu0 %349  ;;  %v306_v51 = vmul.f32 0.6931472, %v923_v44 }
 0x39d   :  { %v641_v58 = vmul.f32 0.6931472, %v925_v19  ;;  %v356_v21 = vsub.f32 %v309_v55, %v350_v49  ;;  %v927_v50 = vpop.eup %926 }
 0x39e   :  { %v310_v23 = vadd.f32 %v306_v51, %v1268_v46  ;;  %v645_v35 = vmul.f32 0.6931472, %v927_v50 }
 0x39f   :  { %v648_v53 = vadd.f32 %v641_v58, %v1259_v2  ;;  %v360_v16 = vmul.f32 %v356_v21, %v249_v22 }
 0x3a0   :  { %v650_v22 = vadd.f32 %v645_v35, %v1255_v7 }
 0x3a1   :  { %v684_v26 = vsub.f32 %v648_v53, %v674_v40  ;;  %v366_v33 = vsel %vm362_vm14, %v360_v16, 0.0 }
 0x3ca   :  { %v353_v61 = vpop.xlane.xlu0 %352 }
 0x3cb   :  { %v357_v9 = vsub.f32 %v310_v23, %v353_v61 }
 0x3cd   :  { %v361_v29 = vmul.f32 %v357_v9, %v250_v32 }
 0x3cf   :  { %v368_v32 = vsel %vm362_vm14, %v361_v29, 0.0 }
 0x3d2   :  { %v633_v45 = vpop.xlane.xlu1 %632 }
 0x3d3   :  { %928 = vlog2.f32 %v633_v45 }
 0x3d6   :  { %v639_v59 = vpop.xlane.xlu1 %638 }
 0x3d7   :  { %930 = vlog2.f32 %v639_v59 }
 0x3d8   :  { %932 = vrcp.f32 %v389_v52 }
 0x3d9   :  { %934 = vrcp.f32 %v718_v56 }
 0x3da   :  { %v347_v1 = vpop.xlane.xlu1 %346 }
 0x3db   :  { %v355_v11 = vsub.f32 %v308_v63, %v347_v1 }
 0x3dd   :  { %v929_v15 = vpop.eup %928  ;;  %v359_v17 = vmul.f32 %v355_v11, %v1327_v6  ;;  %v688_v6 = vmul.f32 %v684_v26, %v1344_v12 }
 0x3de   :  { %v643_v46 = vmul.f32 0.6931472, %v929_v15  ;;  %v677_v27 = vpop.xlane.xlu1 %676 }
 0x3df   :  { %v364_v2 = vsel %vm362_vm14, %v359_v17, 0.0  ;;  %v692_v7 = vsel %vm362_vm14, %v688_v6, 0.0 }
 0x3e0   :  { %v365_v10 = vadd.f32 %v364_v2, %v363_v28  ;;  %v649_v3 = vadd.f32 %v643_v46, %v1295_v20 }
 0x3e1   :  { %v931_v13 = vpop.eup %930 }
 0x3e2   :  { %v647_v36 = vmul.f32 0.6931472, %v931_v13  ;;  %v367_v37 = vadd.f32 %v366_v33, %v365_v10  ;;  %v685_v38 = vsub.f32 %v649_v3, %v677_v27  ;;  %v680_v39 = vpop.xlane.xlu1 %679  ;;  %v933_v21 = vpop.eup %932 }
 0x3e3   :  { %v686_v40 = vsub.f32 %v650_v22, %v680_v39  ;;  %v935_v0 = vpop.eup %934 }
 0x3e4   :  { %v369_v41 = vadd.f32 %v368_v32, %v367_v37  ;;  %v689_v5 = vmul.f32 %v685_v38, %v1332_v8  ;;  %v651_v20 = vadd.f32 %v647_v36, %v1291_v47 }
 0x3e5   :  { %v690_v42 = vmul.f32 %v686_v40, %v1355_v18 }
 0x3e6   :  { %v370_v44 = vrot.slane %v369_v41, 4  ;;  %v693_v12 = vsel %vm362_vm14, %v689_v5, 0.0  ;;  %v683_v45 = vpop.xlane.xlu1 %682 }
 0x3e7   :  { %v694_v19 = vadd.f32 %v693_v12, %v692_v7  ;;  %v695_v48 = vsel %vm362_vm14, %v690_v42, 0.0  ;;  %v687_v49 = vsub.f32 %v651_v20, %v683_v45 }
 0x3e8   :  { %v371_v54 = vadd.f32 %v370_v44, %v369_v41 }
 0x3e9   :  { %v696_v51 = vadd.f32 %v695_v48, %v694_v19  ;;  %v691_v8 = vmul.f32 %v687_v49, %v1366_v30 }
 0x3ea   :  { %v372_v47 = vrot.slane %v371_v54, 2 }
 0x3eb   :  { %v697_v18 = vsel %vm362_vm14, %v691_v8, 0.0 }
 0x3ec   :  { %v698_v57 = vadd.f32 %v697_v18, %v696_v51  ;;  %v373_v59 = vadd.f32 %v372_v47, %v371_v54 }
 0x3ee   :  { %v699_v58 = vrot.slane %v698_v57, 4  ;;  %v374_v61 = vrot.slane %v373_v59, 1 }
 0x3f0   :  { %v700_v60 = vadd.f32 %v699_v58, %v698_v57  ;;  %v375_v23 = vadd.f32 %v374_v61, %v373_v59 }
 0x3f2   :  { %v701_v55 = vrot.slane %v700_v60, 2  ;;  %v391_v30 = vmul.f32 %v933_v21, %v375_v23 }
 0x3f4   :  { %v702_v62 = vadd.f32 %v701_v55, %v700_v60 }
 0x3f6   :  { %v703_v63 = vrot.slane %v702_v62, 1 }
 0x3f8   :  { %v704_v50 = vadd.f32 %v703_v63, %v702_v62 }
 0x3fa   :  { %v720_v53 = vmul.f32 %v935_v0, %v704_v50 }
 0x3fc   :  { %v721_v1 = vadd.f32 %v720_v53, %v391_v30 }
 0x3fe   :  { %723 = vst.msk [vmem:[#allocation4] sm:$0x1] %vm722_vm15, %v721_v1 }
 0x3ff   :  { %969 = shalt.err (!%p966_p12)
}
 0x400   :  { %s970_s24 = scalar_lea.hbm %s1418_s10, 16 }
 0x401   :  { %p971_p13 = scmp.ne.s32.totalorder %s1418_s10, %s970_s24  ;;  %p974_p0 = scmp.lt.u32.totalorder %s970_s24, %s1418_s10 }
 0x403   :  { %p976_p1 = pnand %p974_p0, %p971_p13 }
 0x405   :  { %979 = shalt.err (!%p976_p1)
}
 0x406   :  { %745 = dma.vmem_to_hbm [thread:$0]  %s743_s8, 16, %s1418_s10, [#allocation5]  }
 0x407   :  { %980 = dma.done.wait [#allocation3], 1024  }
 0x408   :  { %981 = vsyncadd [#allocation3], 4294966272 }
 0x409   :  { %982 = dma.done.wait [#allocation5], 16  }
 0x40a   :  { %983 = vsyncadd [#allocation5], 4294967280 }
 0x40b   :  { %752 = vsyncpa [#allocation3], 1 }
 0x40c   :  { %753 = vsyncpa [#allocation5], 1 }

// kernel: prot_llm_forward.5
= control target key start
LH: loop header
LB: loop body
LE: loop exit
PB: predicated region body
PF: predicated region fallthrough
CT: control target
= control target key end

     0   :  { %v4005_v23 = vmov 0   ;;  %v78_v48 = vlaneseq  ;;  %vm587_vm0 = vcmask 261120   ;;  %vm679_vm8 = vcmask 130048   ;;  %s4776_s0 = inlined_call_operand.vmem [shape: bf16[32,128], index: 0, kind: input, shape index: {}]   ;;  %s4777_s7 = inlined_call_operand.vmem [shape: bf16[128,384], index: 7, kind: input, shape index: {}]   ;;  %s4778_s4 = inlined_call_operand.vmem [shape: f32[128,128], index: 4, kind: input, shape index: {}]   ;;  %s4779_s5 = inlined_call_operand.vmem [shape: bf16[1,128], index: 5, kind: input, shape index: {}]   ;;  %s4780_s2 = inlined_call_operand.vmem [shape: f32[32,128], index: 2, kind: input, shape index: {}]   ;;  %s4781_s3 = inlined_call_operand.vmem [shape: f32[32,128], index: 3, kind: input, shape index: {}]   ;;  %s4782_s1 = inlined_call_operand.vmem [shape: s32[2,16], index: 1, kind: input, shape index: {}]   ;;  %s4783_s8 = inlined_call_operand.vmem [shape: bf16[128,128], index: 8, kind: input, shape index: {}]   ;;  %s4784_s9 = inlined_call_operand.vmem [shape: bf16[128,512], index: 9, kind: input, shape index: {}]   ;;  %s4785_s6 = inlined_call_operand.vmem [shape: bf16[1,128], index: 6, kind: input, shape index: {}]   ;;  %s4786_s10 = inlined_call_operand.vmem [shape: bf16[256,128], index: 10, kind: input, shape index: {}]   ;;  %s4787_s11 = inlined_call_operand.vmem [shape: bf16[32,128], index: 11, kind: output, shape index: {}]  }
   0x1   :  { %v3151_v0 = vld [vmem:[%s4776_s0] sm:$0xff]   ;;  %v3168_v1 = vld [vmem:[%s4776_s0 + $0x8] sm:$0xff]   ;;  %v3797_v15 = vld [vmem:[%s4777_s7 + $0x30] ss:$12 sps:$4 sm:$0xff]   ;;  %280 = vmatprep.mubr.bf16.mxu0 %v4005_v23  ;;  %vm1423_vm12 = vcmask 523264   ;;  %vm1426_vm13 = vcmask 785408  }
   0x2   :  { %v4076_v2 = vunpack.c.l.bf16 %v3151_v0  ;;  %v4078_v3 = vunpack.c.h.bf16 %v3151_v0  ;;  %v4080_v4 = vunpack.c.l.bf16 %v3168_v1  ;;  %v4082_v5 = vunpack.c.h.bf16 %v3168_v1  ;;  %v3789_v6 = vld [vmem:[%s4777_s7 + $0x4] ss:$12 sps:$4 sm:$0xff]   ;;  %v3791_v7 = vld [vmem:[%s4777_s7] ss:$12 sps:$4 sm:$0xff]   ;;  %v3792_v8 = vld [vmem:[%s4777_s7 + $0x1c] ss:$12 sps:$4 sm:$0xff]  }
   0x3   :  { %248 = vmatprep.subr.bf16.mxu0 %v3789_v6  ;;  %v3794_v11 = vld [vmem:[%s4777_s7 + $0x18] ss:$12 sps:$4 sm:$0xff]   ;;  %v3795_v14 = vld [vmem:[%s4777_s7 + $0x34] ss:$12 sps:$4 sm:$0xff]   ;;  %v3804_v20 = vld [vmem:[%s4777_s7 + $0x7c] ss:$12 sps:$4 sm:$0xff]  }
   0x4   :  { %v47_v9 = vmul.f32 %v4076_v2, %v4076_v2  ;;  %v49_v10 = vmul.f32 %v4080_v4, %v4080_v4  ;;  %249 = vmatpush1.bf16.msra.mxu0 %v3791_v7  ;;  %v48_v12 = vmul.f32 %v4078_v3, %v4078_v3  ;;  %v50_v13 = vmul.f32 %v4082_v5, %v4082_v5  ;;  %v3798_v16 = vld [vmem:[%s4777_s7 + $0x4c] ss:$12 sps:$4 sm:$0xff]   ;;  %v3800_v17 = vld [vmem:[%s4777_s7 + $0x48] ss:$12 sps:$4 sm:$0xff]   ;;  %v3801_v18 = vld [vmem:[%s4777_s7 + $0x64] ss:$12 sps:$4 sm:$0xff]  }
   0x5   :  { %250 = vmatprep.subr.bf16.mxu0 %v3792_v8  ;;  %v3803_v19 = vld [vmem:[%s4777_s7 + $0x60] ss:$12 sps:$4 sm:$0xff]   ;;  %v3806_v21 = vld [vmem:[%s4777_s7 + $0x78] ss:$12 sps:$4 sm:$0xff]   ;;  %v3809_v24 = vld [vmem:[%s4777_s7 + $0x90] ss:$12 sps:$4 sm:$0xff]  }
   0x6   :  { %51 = vadd.xlane.f32.xlu0 %v47_v9  ;;  %55 = vadd.xlane.f32.xlu1 %v49_v10  ;;  %v3807_v22 = vld [vmem:[%s4777_s7 + $0x94] ss:$12 sps:$4 sm:$0xff]   ;;  %v3810_v25 = vld [vmem:[%s4777_s7 + $0xac] ss:$12 sps:$4 sm:$0xff]   ;;  %v3816_v33 = vld [vmem:[%s4777_s7 + $0x50] ss:$12 sps:$4 sm:$0xff]  }
   0x7   :  { %v3812_v26 = vld [vmem:[%s4777_s7 + $0xa8] ss:$12 sps:$4 sm:$0xff]   ;;  %v3814_v28 = vld [vmem:[%s4777_s7 + $0x20] ss:$12 sps:$4 sm:$0xff]   ;;  %v3815_v31 = vld [vmem:[%s4777_s7 + $0x38] ss:$12 sps:$4 sm:$0xff]  }
   0x8   :  { %251 = vmatpush1.bf16.msra.mxu0 %v3794_v11  ;;  %v3813_v27 = vld [vmem:[%s4777_s7 + $0x8] ss:$12 sps:$4 sm:$0xff]   ;;  %v358_v29 = vld [vmem:[%s4778_s4] sm:$0xff]  ;;  %v3820_v37 = vld [vmem:[%s4777_s7 + $0xb0] ss:$12 sps:$4 sm:$0xff]   ;;  %v4176_v51 = vshrl.u32 %v78_v48, 7 }
   0x9   :  { %252 = vmatprep.subr.bf16.mxu0 %v3795_v14  ;;  %3322 = vmatprep.subr.bf16.mxu1 %v3813_v27  ;;  %v359_v30 = vld [vmem:[%s4778_s4 + $0x8] sm:$0xff]  ;;  %v3819_v36 = vld [vmem:[%s4777_s7 + $0x98] ss:$12 sps:$4 sm:$0xff]   ;;  %v76_v52 = vld [vmem:[%s4779_s5] sm:$0x1]  ;;  %s4009_s5 = smov 32  }
   0xa   :  { %53 = vadd.xlane.f32.xlu0 %v48_v12  ;;  %57 = vadd.xlane.f32.xlu1 %v50_v13  ;;  %v4156_v32 = vpack.c.bf16 %v359_v30, %v358_v29  ;;  %v3817_v34 = vld [vmem:[%s4777_s7 + $0x68] ss:$12 sps:$4 sm:$0xff]   ;;  %v3818_v35 = vld [vmem:[%s4777_s7 + $0x80] ss:$12 sps:$4 sm:$0xff]   ;;  %v77_v53 = vunpack.c.l.bf16 %v76_v52  ;;  %v4182_v54 = vsub.s32 0, %v4176_v51  ;;  %v361_v8 = vld [vmem:[%s4778_s4 + $0x18] sm:$0xff] }
   0xb   :  { %3323 = vmatpush3.bf16.msra.mxu1 %v3813_v27  ;;  %v360_v7 = vld [vmem:[%s4778_s4 + $0x10] sm:$0xff]  ;;  %v362_v13 = vld [vmem:[%s4778_s4 + $0x20] sm:$0xff]  ;;  %v363_v14 = vld [vmem:[%s4778_s4 + $0x28] sm:$0xff] }
   0xc   :  { %253 = vmatpush1.bf16.msra.mxu0 %v3797_v15  ;;  %3324 = vmatprep.subr.bf16.mxu1 %v3814_v28  ;;  %v81_v59 = vrot.slane %v77_v53, %v4182_v54  ;;  %v3554_v12 = vpack.c.bf16 %v361_v8, %v360_v7  ;;  %v3558_v15 = vpack.c.bf16 %v363_v14, %v362_v13  ;;  %v371_v27 = vld [vmem:[%s4778_s4 + $0x68] sm:$0xff]  ;;  %v372_v29 = vld [vmem:[%s4778_s4 + $0x70] sm:$0xff]  ;;  %v373_v30 = vld [vmem:[%s4778_s4 + $0x78] sm:$0xff] }
   0xd   :  { %254 = vmatprep.subr.bf16.mxu0 %v3798_v16  ;;  %v364_v16 = vld [vmem:[%s4778_s4 + $0x30] sm:$0xff]  ;;  %vm4271_vm1 = vmpackc.low %vm587_vm0, %vm587_vm0 }
   0xf   :  { %3325 = vmatpush3.bf16.msra.mxu1 %v3814_v28 }
  0x10   :  { %255 = vmatpush1.bf16.msra.mxu0 %v3800_v17  ;;  %3326 = vmatprep.subr.bf16.mxu1 %v3815_v31  ;;  %v365_v17 = vld [vmem:[%s4778_s4 + $0x38] sm:$0xff] }
  0x11   :  { %256 = vmatprep.subr.bf16.mxu0 %v3801_v18  ;;  %v3562_v18 = vpack.c.bf16 %v365_v17, %v364_v16  ;;  %v357_v17 = vld [vmem:[%s4781_s3 + $0x18] sm:$0xff] }
  0x13   :  { %3327 = vmatpush3.bf16.msra.mxu1 %v3815_v31  ;;  %v3578_v31 = vpack.c.bf16 %v373_v30, %v372_v29 }
  0x14   :  { %257 = vmatpush1.bf16.msra.mxu0 %v3803_v19  ;;  %3328 = vmatprep.subr.bf16.mxu1 %v3816_v33  ;;  %v366_v19 = vld [vmem:[%s4778_s4 + $0x40] sm:$0xff] }
  0x15   :  { %258 = vmatprep.subr.bf16.mxu0 %v3804_v20  ;;  %v367_v20 = vld [vmem:[%s4778_s4 + $0x48] sm:$0xff] }
  0x17   :  { %3329 = vmatpush3.bf16.msra.mxu1 %v3816_v33 }
  0x18   :  { %259 = vmatpush1.bf16.msra.mxu0 %v3806_v21  ;;  %3330 = vmatprep.subr.bf16.mxu1 %v3817_v34  ;;  %v3566_v21 = vpack.c.bf16 %v367_v20, %v366_v19  ;;  %v356_v20 = vld [vmem:[%s4781_s3 + $0x10] sm:$0xff] }
  0x19   :  { %260 = vmatprep.subr.bf16.mxu0 %v3807_v22  ;;  %v368_v22 = vld [vmem:[%s4778_s4 + $0x50] sm:$0xff] }
  0x1b   :  { %3331 = vmatpush3.bf16.msra.mxu1 %v3817_v34 }
  0x1c   :  { %261 = vmatpush1.bf16.msra.mxu0 %v3809_v24  ;;  %3332 = vmatprep.subr.bf16.mxu1 %v3818_v35  ;;  %v369_v24 = vld [vmem:[%s4778_s4 + $0x58] sm:$0xff] }
  0x1d   :  { %262 = vmatprep.subr.bf16.mxu0 %v3810_v25  ;;  %v3570_v25 = vpack.c.bf16 %v369_v24, %v368_v22 }
  0x1f   :  { %3333 = vmatpush3.bf16.msra.mxu1 %v3818_v35 }
  0x20   :  { %263 = vmatpush1.bf16.msra.mxu0 %v3812_v26  ;;  %3334 = vmatprep.subr.bf16.mxu1 %v3819_v36  ;;  %v370_v26 = vld [vmem:[%s4778_s4 + $0x60] sm:$0xff] }
  0x21   :  { %3551 = vmatprep.subr.bf16.mxu0 %v4156_v32  ;;  %v3574_v28 = vpack.c.bf16 %v371_v27, %v370_v26 }
  0x23   :  { %3335 = vmatpush3.bf16.msra.mxu1 %v3819_v36 }
  0x24   :  { %3336 = vmatprep.subr.bf16.mxu1 %v3820_v37 }
  0x27   :  { %3337 = vmatpush3.bf16.msra.mxu1 %v3820_v37 }
  0x28   :  { %3583 = vmatprep.subr.bf16.mxu1 %v4156_v32 }
  0x93   :  { %v52_v38 = vpop.xlane.xlu0 %51  ;;  %v56_v39 = vpop.xlane.xlu1 %55 }
  0x94   :  { %v60_v40 = vmul.f32 0.0078125, %v52_v38  ;;  %v62_v41 = vmul.f32 0.0078125, %v56_v39 }
  0x96   :  { %v64_v42 = vadd.f32 1e-06, %v60_v40  ;;  %v66_v43 = vadd.f32 1e-06, %v62_v41  ;;  %v352_v41 = vld [vmem:[%s4780_s2 + $0x10] sm:$0xff] }
  0x97   :  { %v54_v44 = vpop.xlane.xlu0 %53  ;;  %v58_v45 = vpop.xlane.xlu1 %57 }
  0x98   :  { %3893 = vrsqrt.f32 %v64_v42  ;;  %v61_v46 = vmul.f32 0.0078125, %v54_v44  ;;  %v63_v47 = vmul.f32 0.0078125, %v58_v45 }
  0x99   :  { %3895 = vrsqrt.f32 %v66_v43  ;;  %v353_v43 = vld [vmem:[%s4780_s2 + $0x18] sm:$0xff] }
  0x9a   :  { %v65_v49 = vadd.f32 1e-06, %v61_v46  ;;  %v67_v50 = vadd.f32 1e-06, %v63_v47 }
  0x9c   :  { %3897 = vrsqrt.f32 %v65_v49 }
  0x9d   :  { %3899 = vrsqrt.f32 %v67_v50 }
  0xa2   :  { %v3894_v55 = vpop.eup %3893 }
  0xa3   :  { %v3896_v56 = vpop.eup %3895  ;;  %v72_v58 = vmul.f32 %v3894_v55, %v4076_v2 }
  0xa4   :  { %v74_v57 = vmul.f32 %v3896_v56, %v4080_v4 }
  0xa5   :  { %v82_v1 = vmul.f32 %v81_v59, %v72_v58  ;;  %v355_v58 = vld [vmem:[%s4781_s3 + $0x8] sm:$0xff] }
  0xa6   :  { %v3898_v60 = vpop.eup %3897  ;;  %v84_v0 = vmul.f32 %v81_v59, %v74_v57  ;;  %v351_v57 = vld [vmem:[%s4780_s2 + $0x8] sm:$0xff] }
  0xa7   :  { %v3900_v61 = vpop.eup %3899  ;;  %v73_v62 = vmul.f32 %v3898_v60, %v4078_v3  ;;  %v354_v60 = vld [vmem:[%s4781_s3] sm:$0xff] }
  0xa8   :  { %v75_v63 = vmul.f32 %v3900_v61, %v4082_v5 }
  0xa9   :  { %v83_v6 = vmul.f32 %v81_v59, %v73_v62 }
  0xaa   :  { %v85_v9 = vmul.f32 %v81_v59, %v75_v63  ;;  %v350_v59 = vld [vmem:[%s4780_s2] sm:$0xff]  ;;  %s4006_s2 = smov 96  }
  0xab   :  { %v86_v10 = vpack.c.bf16 %v83_v6, %v82_v1 }
  0xac   :  { %v87_v11 = vpack.c.bf16 %v85_v9, %v84_v0 }
  0xad   :  { %281 = vmatmul.mubr.bf16.vlgmr.msra.gmra.mrb[0].mxu0 %v86_v10  ;;  %3338 = vmatprep.mubr.bf16.mxu1 %v86_v10 }
  0xae   :  { %290 = vmatprep.mubr.bf16.mxu0 %v4005_v23  ;;  %3339 = vmatmul.mubr.bf16.vlgmr.msra.gmra.mrb[0].mxu1 %v87_v11 }
  0xaf   :  { %3553 = vmatpush3.bf16.msra.mxu0 %v4156_v32  ;;  %3585 = vmatpush3.bf16.msra.mxu1 %v4156_v32 }
  0xb0   :  { %3555 = vmatprep.subr.bf16.mxu0 %v3554_v12  ;;  %3587 = vmatprep.subr.bf16.mxu1 %v3554_v12 }
  0xb3   :  { %3557 = vmatpush3.bf16.msra.mxu0 %v3554_v12  ;;  %3589 = vmatpush3.bf16.msra.mxu1 %v3554_v12 }
  0xb4   :  { %3559 = vmatprep.subr.bf16.mxu0 %v3558_v15  ;;  %3591 = vmatprep.subr.bf16.mxu1 %v3558_v15 }
  0xb5   :  { %291 = vmatmul.mubr.bf16.gmra.mrb[4].mxu0 %v87_v11 }
  0xb7   :  { %3561 = vmatpush3.bf16.msra.mxu0 %v3558_v15  ;;  %3593 = vmatpush3.bf16.msra.mxu1 %v3558_v15 }
  0xb8   :  { %3563 = vmatprep.subr.bf16.mxu0 %v3562_v18  ;;  %3595 = vmatprep.subr.bf16.mxu1 %v3562_v18 }
  0xbb   :  { %3565 = vmatpush3.bf16.msra.mxu0 %v3562_v18  ;;  %3597 = vmatpush3.bf16.msra.mxu1 %v3562_v18 }
  0xbc   :  { %3567 = vmatprep.subr.bf16.mxu0 %v3566_v21  ;;  %3599 = vmatprep.subr.bf16.mxu1 %v3566_v21 }
  0xbf   :  { %3569 = vmatpush3.bf16.msra.mxu0 %v3566_v21  ;;  %3601 = vmatpush3.bf16.msra.mxu1 %v3566_v21 }
  0xc0   :  { %3571 = vmatprep.subr.bf16.mxu0 %v3570_v25  ;;  %3603 = vmatprep.subr.bf16.mxu1 %v3570_v25 }
  0xc3   :  { %3573 = vmatpush3.bf16.msra.mxu0 %v3570_v25  ;;  %3605 = vmatpush3.bf16.msra.mxu1 %v3570_v25 }
  0xc4   :  { %3575 = vmatprep.subr.bf16.mxu0 %v3574_v28  ;;  %3607 = vmatprep.subr.bf16.mxu1 %v3574_v28 }
  0xc7   :  { %3577 = vmatpush3.bf16.msra.mxu0 %v3574_v28  ;;  %3609 = vmatpush3.bf16.msra.mxu1 %v3574_v28 }
  0xc8   :  { %3579 = vmatprep.subr.bf16.mxu0 %v3578_v31  ;;  %3611 = vmatprep.subr.bf16.mxu1 %v3578_v31 }
  0xcb   :  { %3581 = vmatpush3.bf16.msra.mxu0 %v3578_v31  ;;  %3613 = vmatpush3.bf16.msra.mxu1 %v3578_v31 }
 0x180   :  { %v282_v32 = vpop.f32.mrb[0].mxu0 }
 0x181   :  { %v284_v33 = vpop.f32.mrb[1].mxu0  ;;  %3374 = vmatprep.mubr.f32.mxu0 %v282_v32  ;;  %v3340_v34 = vpop.f32.mrb[0].mxu1  ;;  %v374_v6 = vmul.f32 %v350_v59, %v282_v32 }
 0x182   :  { %v286_v35 = vpop.f32.mrb[2].mxu0  ;;  %3412 = vmatprep.mubr.f32.mxu1 %v284_v33  ;;  %v335_v36 = vpop.f32.mrb[1].mxu1  ;;  %v471_v11 = vmul.f32 %v350_v59, %v284_v33 }
 0x183   :  { %v288_v37 = vpop.f32.mrb[3].mxu0  ;;  %3375 = vmatmul.mubr.f32.vlgmr.msra.gmra.mrb[8].mxu0 %v286_v35  ;;  %v3341_v38 = vpop.f32.mrb[2].mxu1  ;;  %v375_v62 = vmul.f32 %v351_v57, %v286_v35 }
 0x184   :  { %3413 = vmatmul.mubr.f32.vlgmr.msra.gmra.mrb[4].mxu1 %v288_v37  ;;  %v338_v39 = vpop.f32.mrb[3].mxu1  ;;  %v4242_v55 = vpack.c.bf16 %v3341_v38, %v3340_v34  ;;  %v4244_v56 = vpack.i.bf16 %v3341_v38, %v3340_v34  ;;  %v472_v7 = vmul.f32 %v351_v57, %v288_v37 }
 0x185   :  { %v3620_v40 = vpack.c.bf16 %v338_v39, %v335_v36  ;;  %v4240_v53 = vpack.i.bf16 %v338_v39, %v335_v36 }
 0x187   :  { %3621 = vmatprep.subr.bf16.mxu1 %v3620_v40 }
 0x188   :  { %v292_v42 = vpop.f32.mrb[4].mxu0  ;;  %3623 = vmatpush3.bf16.msra.mxu1 %v3620_v40 }
 0x189   :  { %v376_v44 = vmul.f32 %v352_v41, %v292_v42  ;;  %v294_v45 = vpop.f32.mrb[5].mxu0  ;;  %3377 = vmatprep.mubr.f32.mxu0 %v292_v42 }
 0x18a   :  { %v473_v46 = vmul.f32 %v352_v41, %v294_v45  ;;  %v296_v47 = vpop.f32.mrb[6].mxu0  ;;  %3415 = vmatprep.mubr.f32.mxu1 %v294_v45  ;;  %v4311_v45 = vadd.s32 8, %v4176_v51 }
 0x18b   :  { %v377_v49 = vmul.f32 %v353_v43, %v296_v47  ;;  %v298_v50 = vpop.f32.mrb[7].mxu0  ;;  %3378 = vmatmul.mubr.f32.gmra.mrb[10].mxu0 %v296_v47 }
 0x18c   :  { %v474_v52 = vmul.f32 %v353_v43, %v298_v50  ;;  %3416 = vmatmul.mubr.f32.gmra.mrb[6].mxu1 %v298_v50  ;;  %v575_v43 = vld [vmem:[%s4782_s1] sm:$0x3]  ;;  %s4008_s1 = smov 64  }
 0x18d   :  { %vm576_vm2 = vcmp.gt.s32.totalorder %v575_v43, 0 }
 0x256   :  { %v3376_v61 = vpop.f32.mrb[8].mxu0 }
 0x257   :  { %v464_v63 = vmul.f32 %v3376_v61, %v355_v58  ;;  %v444_v0 = vpop.f32.mrb[9].mxu0  ;;  %v3414_v1 = vpop.f32.mrb[4].mxu1 }
 0x258   :  { %v463_v8 = vmul.f32 %v444_v0, %v354_v60  ;;  %v561_v9 = vmul.f32 %v3414_v1, %v355_v58  ;;  %v541_v10 = vpop.f32.mrb[5].mxu1 }
 0x259   :  { %v4258_v12 = vadd.f32 %v464_v63, %v375_v62  ;;  %v560_v13 = vmul.f32 %v541_v10, %v354_v60 }
 0x25a   :  { %v4260_v14 = vadd.f32 %v463_v8, %v374_v6  ;;  %v565_v15 = vadd.f32 %v561_v9, %v472_v7 }
 0x25b   :  { %v564_v16 = vadd.f32 %v560_v13, %v471_v11 }
 0x25c   :  { %783 = vrot.lane.b32.xlu1 %v4260_v14, %s4006_s2  ;;  %3422 = vmatprep.mubr.msk.f32.mxu0 %vm587_vm0, %v4260_v14 }
 0x25d   :  { %v4275_v19 = vpack.i.bf16 %v565_v15, %v564_v16  ;;  %v3614_v21 = vpack.c.bf16 %v565_v15, %v564_v16 }
 0x25e   :  { %v3379_v22 = vpop.f32.mrb[10].mxu0 }
 0x25f   :  { %v466_v24 = vmul.f32 %v3379_v22, %v357_v17  ;;  %3700 = vrot.lane.b32.xlu0 %v4275_v19, %s4006_s2  ;;  %v454_v25 = vpop.f32.mrb[11].mxu0  ;;  %v3417_v26 = vpop.f32.mrb[6].mxu1  ;;  %3616 = vmatprep.subr.msk.bf16.mxu0 %vm4271_vm1, %v3614_v21 }
 0x260   :  { %v465_v27 = vmul.f32 %v454_v25, %v356_v20  ;;  %v563_v28 = vmul.f32 %v3417_v26, %v357_v17  ;;  %v551_v29 = vpop.f32.mrb[7].mxu1  ;;  %3619 = vmatpush3.bf16.xpose.msk.msra.mxu0 %vm4271_vm1, %v3614_v21  ;;  %785 = vrot.lane.b32.xlu1 %v4258_v12, %s4006_s2 }
 0x261   :  { %v4288_v30 = vadd.f32 %v466_v24, %v377_v49  ;;  %v562_v31 = vmul.f32 %v551_v29, %v356_v20  ;;  %v4007_v49 = vmov -1e+09  }
 0x262   :  { %v4290_v32 = vadd.f32 %v465_v27, %v376_v44  ;;  %v567_v33 = vadd.f32 %v563_v28, %v474_v52  ;;  %v4308_v44 = vsel %vm576_vm2, 1, %v4005_v23 }
 0x263   :  { %v566_v34 = vadd.f32 %v562_v31, %v473_v46  ;;  %v4314_v46 = vand.u32 127, %v78_v48  ;;  %v581_v47 = vrot.slane %v4308_v44, %v4182_v54 }
 0x265   :  { %v4292_v35 = vpack.i.bf16 %v567_v33, %v566_v34  ;;  %v4294_v36 = vpack.c.bf16 %v567_v33, %v566_v34  ;;  %vm574_vm3 = vcmp.ge.s32.totalorder %v4311_v45, %v4314_v46  ;;  %vm582_vm4 = vcmp.eq.s32.totalorder %v581_v47, 1 }
 0x266   :  { %vm573_vm5 = vcmp.ge.s32.totalorder %v4176_v51, %v4314_v46  ;;  %vm584_vm6 = vmand %vm574_vm3, %vm582_vm4 }
 0x267   :  { %3423 = vmatmul.mubr.msk.f32.vlgmr.msra.gmra.mrb[12].mxu0 %vm587_vm0, %v4258_v12  ;;  %vm583_vm7 = vmand %vm573_vm5, %vm582_vm4  ;;  %v4329_v50 = vsel %vm584_vm6, 0.0, %v4007_v49 }
 0x268   :  { %v4332_v58 = vsel %vm583_vm7, 0.0, %v4007_v49 }
 0x2ce   :  { %v784_v37 = vpop.permute.xlu1 %783 }
 0x2cf   :  { %3436 = vmatprep.mubr.msk.f32.mxu0 %vm587_vm0, %v784_v37 }
 0x2d1   :  { %v3701_v38 = vpop.permute.xlu0 %3700 }
 0x2d2   :  { %v3703_v39 = vunpack.i.h.bf16 %v3701_v38  ;;  %v3702_v40 = vunpack.i.l.bf16 %v3701_v38  ;;  %v786_v42 = vpop.permute.xlu1 %785 }
 0x2d4   :  { %v3624_v41 = vpack.c.bf16 %v3703_v39, %v3702_v40 }
 0x2d6   :  { %3626 = vmatprep.subr.msk.bf16.mxu0 %vm4271_vm1, %v3624_v41 }
 0x2d7   :  { %3629 = vmatpush3.bf16.xpose.msk.msra.mxu0 %vm4271_vm1, %v3624_v41 }
 0x2de   :  { %3437 = vmatmul.mubr.msk.f32.vlgmr.msra.gmra.mrb[14].mxu0 %vm587_vm0, %v786_v42 }
 0x33a   :  { %v3424_v48 = vpop.f32.mrb[12].mxu0 }
 0x33b   :  { %v676_v52 = vmul.f32 0.17677669, %v3424_v48  ;;  %v666_v57 = vpop.f32.mrb[13].mxu0 }
 0x33c   :  { %v675_v59 = vmul.f32 0.17677669, %v666_v57 }
 0x33d   :  { %v678_v60 = vadd.f32 %v676_v52, %v4329_v50 }
 0x33e   :  { %v677_v61 = vadd.f32 %v675_v59, %v4332_v58 }
 0x33f   :  { %v683_v62 = vsel %vm679_vm8, %v678_v60, -inf }
 0x340   :  { %684 = vmax.xlane.f32.xlu0 %v683_v62  ;;  %v680_v63 = vsel %vm679_vm8, %v677_v61, -inf }
 0x341   :  { %681 = vmax.xlane.f32.xlu1 %v680_v63 }
 0x352   :  { %3705 = vrot.lane.b32.xlu1 %v4240_v53, %s4006_s2 }
 0x3b1   :  { %v3438_v0 = vpop.f32.mrb[14].mxu0 }
 0x3b2   :  { %v865_v1 = vpop.f32.mrb[15].mxu0  ;;  %v875_v6 = vmul.f32 0.17677669, %v3438_v0 }
 0x3b3   :  { %v874_v7 = vmul.f32 0.17677669, %v865_v1 }
 0x3b4   :  { %v877_v10 = vadd.f32 %v875_v6, %v4329_v50 }
 0x3b5   :  { %v876_v8 = vadd.f32 %v874_v7, %v4332_v58 }
 0x3b6   :  { %v881_v11 = vsel %vm679_vm8, %v877_v10, -inf }
 0x3b7   :  { %v878_v9 = vsel %vm679_vm8, %v876_v8, -inf }
 0x3b8   :  { %879 = vmax.xlane.f32.xlu0 %v878_v9 }
 0x3bc   :  { %882 = vmax.xlane.f32.xlu0 %v881_v11 }
 0x3cd   :  { %v685_v13 = vpop.xlane.xlu0 %684 }
 0x3ce   :  { %v687_v15 = vsub.f32 %v678_v60, %v685_v13  ;;  %v682_v16 = vpop.xlane.xlu1 %681 }
 0x3cf   :  { %v686_v17 = vsub.f32 %v677_v61, %v682_v16 }
 0x3d0   :  { %v690_v20 = vmul.f32 1.442695, %v687_v15 }
 0x3d1   :  { %v688_v21 = vmul.f32 1.442695, %v686_v17 }
 0x3d2   :  { %3901 = vpow2.f32 %v690_v20  ;;  %v3706_v22 = vpop.permute.xlu1 %3705 }
 0x3d3   :  { %3903 = vpow2.f32 %v688_v21  ;;  %v3708_v24 = vunpack.i.h.bf16 %v3706_v22  ;;  %v3707_v25 = vunpack.i.l.bf16 %v3706_v22 }
 0x3d5   :  { %v3630_v26 = vpack.c.bf16 %v3708_v24, %v3707_v25 }
 0x3d7   :  { %3631 = vmatprep.subr.bf16.mxu1 %v3630_v26 }
 0x3dc   :  { %v3902_v27 = vpop.eup %3901 }
 0x3dd   :  { %v3904_v28 = vpop.eup %3903  ;;  %v695_v29 = vsel %vm679_vm8, %v3902_v27, 0.0 }
 0x3de   :  { %696 = vadd.xlane.f32.xlu0 %v695_v29  ;;  %v692_v31 = vsel %vm679_vm8, %v3904_v28, 0.0 }
 0x3df   :  { %693 = vadd.xlane.f32.xlu1 %v692_v31 }
 0x3f0   :  { %989 = vrot.lane.b32.xlu1 %v4260_v14, %s4008_s1 }
 0x445   :  { %v880_v33 = vpop.xlane.xlu0 %879 }
 0x446   :  { %v884_v34 = vsub.f32 %v876_v8, %v880_v33 }
 0x448   :  { %v886_v37 = vmul.f32 1.442695, %v884_v34 }
 0x449   :  { %v883_v38 = vpop.xlane.xlu0 %882 }
 0x44a   :  { %3905 = vpow2.f32 %v886_v37  ;;  %v885_v39 = vsub.f32 %v877_v10, %v883_v38 }
 0x44c   :  { %v888_v40 = vmul.f32 1.442695, %v885_v39 }
 0x44e   :  { %3907 = vpow2.f32 %v888_v40 }
 0x454   :  { %v3906_v41 = vpop.eup %3905 }
 0x455   :  { %v890_v42 = vsel %vm679_vm8, %v3906_v41, 0.0 }
 0x456   :  { %891 = vadd.xlane.f32.xlu1 %v890_v42 }
 0x458   :  { %v3908_v43 = vpop.eup %3907 }
 0x459   :  { %v893_v47 = vsel %vm679_vm8, %v3908_v43, 0.0 }
 0x45a   :  { %894 = vadd.xlane.f32.xlu0 %v893_v47 }
 0x467   :  { %991 = vrot.lane.b32.xlu1 %v4258_v12, %s4008_s1 }
 0x46b   :  { %v697_v48 = vpop.xlane.xlu0 %696 }
 0x46c   :  { %3909 = vrcp.f32 %v697_v48  ;;  %v694_v52 = vpop.xlane.xlu1 %693 }
 0x46d   :  { %3911 = vrcp.f32 %v694_v52 }
 0x470   :  { %3710 = vrot.lane.b32.xlu0 %v4275_v19, %s4008_s1  ;;  %v990_v62 = vpop.permute.xlu1 %989 }
 0x476   :  { %v3910_v57 = vpop.eup %3909 }
 0x477   :  { %v3912_v59 = vpop.eup %3911  ;;  %v701_v61 = vmul.f32 %v3910_v57, %v3902_v27 }
 0x478   :  { %v699_v60 = vmul.f32 %v3912_v59, %v3904_v28 }
 0x47a   :  { %3429 = vmatprep.mubr.msk.f32.mxu1 %vm679_vm8, %v699_v60 }
 0x47b   :  { %3430 = vmatmul.mubr.msk.f32.vlgmr.msra.gmra.mrb[8].mxu1 %vm679_vm8, %v701_v61 }
 0x47c   :  { %3633 = vmatpush3.bf16.msra.mxu1 %v3630_v26 }
 0x4e3   :  { %v892_v63 = vpop.xlane.xlu1 %891 }
 0x4e4   :  { %3913 = vrcp.f32 %v892_v63 }
 0x4e7   :  { %v895_v0 = vpop.xlane.xlu0 %894  ;;  %v992_v15 = vpop.permute.xlu1 %991 }
 0x4e8   :  { %3915 = vrcp.f32 %v895_v0 }
 0x4eb   :  { %v3711_v1 = vpop.permute.xlu0 %3710 }
 0x4ec   :  { %v3713_v6 = vunpack.i.h.bf16 %v3711_v1  ;;  %v3712_v7 = vunpack.i.l.bf16 %v3711_v1 }
 0x4ee   :  { %v3914_v8 = vpop.eup %3913  ;;  %v3634_v9 = vpack.c.bf16 %v3713_v6, %v3712_v7 }
 0x4ef   :  { %v897_v10 = vmul.f32 %v3914_v8, %v3906_v41 }
 0x4f0   :  { %3636 = vmatprep.subr.msk.bf16.mxu1 %vm4271_vm1, %v3634_v9 }
 0x4f1   :  { %3443 = vmatprep.mubr.msk.f32.mxu1 %vm679_vm8, %v897_v10 }
 0x4f2   :  { %v3916_v11 = vpop.eup %3915 }
 0x4f3   :  { %v899_v13 = vmul.f32 %v3916_v11, %v3908_v43 }
 0x4f5   :  { %3444 = vmatmul.mubr.msk.f32.vlgmr.msra.gmra.mrb[10].mxu1 %vm679_vm8, %v899_v13 }
 0x4f6   :  { %3639 = vmatpush3.bf16.xpose.msk.msra.mxu1 %vm4271_vm1, %v3634_v9  ;;  %3450 = vmatprep.mubr.msk.f32.mxu1 %vm587_vm0, %v990_v62 }
 0x4fd   :  { %3451 = vmatmul.mubr.msk.f32.vlgmr.msra.gmra.mrb[12].mxu1 %vm587_vm0, %v992_v15 }
 0x54e   :  { %v4364_v16 = vpop.f32.mrb[8].mxu1 }
 0x54f   :  { %v4366_v17 = vpop.f32.mrb[9].mxu1 }
 0x5c8   :  { %v4368_v20 = vpop.f32.mrb[10].mxu1 }
 0x5c9   :  { %v4370_v21 = vpop.f32.mrb[11].mxu1 }
 0x5ca   :  { %v3759_v22 = vpack.i.bf16 %v4368_v20, %v4370_v21 }
 0x5d0   :  { %v3452_v24 = vpop.f32.mrb[12].mxu1 }
 0x5d1   :  { %v1081_v25 = vmul.f32 0.17677669, %v3452_v24  ;;  %v1071_v26 = vpop.f32.mrb[13].mxu1 }
 0x5d2   :  { %v1080_v27 = vmul.f32 0.17677669, %v1071_v26 }
 0x5d3   :  { %v1083_v28 = vadd.f32 %v1081_v25, %v4329_v50 }
 0x5d4   :  { %v1082_v29 = vadd.f32 %v1080_v27, %v4332_v58 }
 0x5d5   :  { %v1087_v31 = vsel %vm679_vm8, %v1083_v28, -inf }
 0x5d6   :  { %1088 = vmax.xlane.f32.xlu0 %v1087_v31  ;;  %v1084_v33 = vsel %vm679_vm8, %v1082_v29, -inf }
 0x5d7   :  { %1085 = vmax.xlane.f32.xlu1 %v1084_v33 }
 0x5e8   :  { %3715 = vrot.lane.b32.xlu1 %v4240_v53, %s4008_s1 }
 0x5ec   :  { %1193 = vrot.lane.b32.xlu1 %v4260_v14, %s4009_s5 }
 0x5f0   :  { %1195 = vrot.lane.b32.xlu1 %v4258_v12, %s4009_s5 }
 0x663   :  { %v1089_v34 = vpop.xlane.xlu0 %1088 }
 0x664   :  { %v1091_v37 = vsub.f32 %v1083_v28, %v1089_v34  ;;  %v1086_v38 = vpop.xlane.xlu1 %1085 }
 0x665   :  { %v1090_v39 = vsub.f32 %v1082_v29, %v1086_v38 }
 0x666   :  { %v1094_v40 = vmul.f32 1.442695, %v1091_v37 }
 0x667   :  { %v1092_v41 = vmul.f32 1.442695, %v1090_v39 }
 0x668   :  { %3917 = vpow2.f32 %v1094_v40  ;;  %v3716_v42 = vpop.permute.xlu1 %3715 }
 0x669   :  { %v3718_v43 = vunpack.i.h.bf16 %v3716_v42  ;;  %v3717_v47 = vunpack.i.l.bf16 %v3716_v42  ;;  %3919 = vpow2.f32 %v1092_v41 }
 0x66b   :  { %v3640_v48 = vpack.c.bf16 %v3718_v43, %v3717_v47 }
 0x66c   :  { %v1194_v9 = vpop.permute.xlu1 %1193 }
 0x66d   :  { %3641 = vmatprep.subr.bf16.mxu0 %v3640_v48 }
 0x66e   :  { %3643 = vmatpush3.bf16.msra.mxu0 %v3640_v48 }
 0x672   :  { %v3918_v52 = vpop.eup %3917 }
 0x673   :  { %v1099_v14 = vsel %vm679_vm8, %v3918_v52, 0.0  ;;  %v3920_v57 = vpop.eup %3919 }
 0x674   :  { %1100 = vadd.xlane.f32.xlu0 %v1099_v14  ;;  %v1096_v12 = vsel %vm679_vm8, %v3920_v57, 0.0 }
 0x678   :  { %1097 = vadd.xlane.f32.xlu0 %v1096_v12 }
 0x68e   :  { %3720 = vrot.lane.b32.xlu0 %v4275_v19, %s4009_s5  ;;  %v1196_v19 = vpop.permute.xlu1 %1195 }
 0x701   :  { %v1101_v59 = vpop.xlane.xlu0 %1100 }
 0x702   :  { %3921 = vrcp.f32 %v1101_v59 }
 0x705   :  { %v1098_v60 = vpop.xlane.xlu0 %1097 }
 0x706   :  { %3923 = vrcp.f32 %v1098_v60 }
 0x709   :  { %v3721_v61 = vpop.permute.xlu0 %3720 }
 0x70a   :  { %v3723_v62 = vunpack.i.h.bf16 %v3721_v61  ;;  %v3722_v63 = vunpack.i.l.bf16 %v3721_v61 }
 0x70c   :  { %v3644_v0 = vpack.c.bf16 %v3723_v62, %v3722_v63  ;;  %v3922_v1 = vpop.eup %3921 }
 0x70d   :  { %v1105_v8 = vmul.f32 %v3922_v1, %v3918_v52 }
 0x70e   :  { %3646 = vmatprep.subr.msk.bf16.mxu0 %vm4271_vm1, %v3644_v0 }
 0x710   :  { %v3924_v6 = vpop.eup %3923 }
 0x711   :  { %v1103_v7 = vmul.f32 %v3924_v6, %v3920_v57 }
 0x713   :  { %3457 = vmatprep.mubr.msk.f32.mxu0 %vm679_vm8, %v1103_v7 }
 0x714   :  { %3458 = vmatmul.mubr.msk.f32.vlgmr.msra.gmra.mrb[16].mxu0 %vm679_vm8, %v1105_v8 }
 0x715   :  { %3649 = vmatpush3.bf16.xpose.msk.msra.mxu0 %vm4271_vm1, %v3644_v0  ;;  %3464 = vmatprep.mubr.msk.f32.mxu0 %vm587_vm0, %v1194_v9  ;;  %v1431_v0 = vsub.s32 1, %v4176_v51 }
 0x716   :  { %3661 = vmatprep.subr.bf16.mxu0 %v4242_v55 }
 0x717   :  { %v1432_v1 = vrot.slane %v4308_v44, %v1431_v0 }
 0x719   :  { %vm1433_vm9 = vcmp.eq.s32.totalorder %v1432_v1, 1 }
 0x71a   :  { %vm1434_vm10 = vmand %vm573_vm5, %vm1433_vm9 }
 0x71b   :  { %vm1435_vm11 = vmand %vm574_vm3, %vm1433_vm9  ;;  %v4448_v44 = vsel %vm1434_vm10, 0.0, %v4007_v49 }
 0x71c   :  { %3465 = vmatmul.mubr.msk.f32.vlgmr.msra.gmra.mrb[18].mxu0 %vm587_vm0, %v1196_v19 }
 0x71d   :  { %3663 = vmatpush3.bf16.msra.mxu0 %v4242_v55 }
 0x7e7   :  { %v4398_v10 = vpop.f32.mrb[16].mxu0 }
 0x7e8   :  { %v4400_v11 = vpop.f32.mrb[17].mxu0 }
 0x7e9   :  { %v3764_v13 = vpack.i.bf16 %v4398_v10, %v4400_v11 }
 0x7ef   :  { %v3466_v15 = vpop.f32.mrb[18].mxu0 }
 0x7f0   :  { %v1285_v24 = vmul.f32 0.17677669, %v3466_v15  ;;  %v1275_v25 = vpop.f32.mrb[19].mxu0 }
 0x7f1   :  { %v1284_v26 = vmul.f32 0.17677669, %v1275_v25 }
 0x7f2   :  { %v1287_v27 = vadd.f32 %v1285_v24, %v4329_v50  ;;  %v4451_v24 = vsel %vm1435_vm11, 0.0, %v4007_v49 }
 0x7f3   :  { %v1286_v28 = vadd.f32 %v1284_v26, %v4332_v58 }
 0x7f4   :  { %v1291_v29 = vsel %vm679_vm8, %v1287_v27, -inf }
 0x7f5   :  { %1292 = vmax.xlane.f32.xlu0 %v1291_v29  ;;  %v1288_v55 = vsel %vm679_vm8, %v1286_v28, -inf }
 0x7f6   :  { %1289 = vmax.xlane.f32.xlu1 %v1288_v55 }
 0x807   :  { %3725 = vrot.lane.b32.xlu1 %v4240_v53, %s4009_s5 }
 0x80b   :  { %3730 = vrot.lane.b32.xlu1 %v4292_v35, %s4006_s2 }
 0x80f   :  { %1634 = vrot.lane.b32.xlu1 %v4288_v30, %s4006_s2 }
 0x882   :  { %v1293_v31 = vpop.xlane.xlu0 %1292 }
 0x883   :  { %v1295_v33 = vsub.f32 %v1287_v27, %v1293_v31  ;;  %v1290_v50 = vpop.xlane.xlu1 %1289 }
 0x884   :  { %v1294_v34 = vsub.f32 %v1286_v28, %v1290_v50 }
 0x885   :  { %v1298_v58 = vmul.f32 1.442695, %v1295_v33 }
 0x886   :  { %v1296_v37 = vmul.f32 1.442695, %v1294_v34 }
 0x887   :  { %v3726_v38 = vpop.permute.xlu1 %3725 }
 0x888   :  { %3925 = vpow2.f32 %v1296_v37  ;;  %v3728_v39 = vunpack.i.h.bf16 %v3726_v38  ;;  %v3727_v40 = vunpack.i.l.bf16 %v3726_v38 }
 0x889   :  { %3927 = vpow2.f32 %v1298_v58 }
 0x88a   :  { %v3650_v41 = vpack.c.bf16 %v3728_v39, %v3727_v40 }
 0x88b   :  { %v3731_v42 = vpop.permute.xlu1 %3730 }
 0x88c   :  { %v3733_v53 = vunpack.i.h.bf16 %v3731_v42  ;;  %v3732_v43 = vunpack.i.l.bf16 %v3731_v42  ;;  %3651 = vmatprep.subr.bf16.mxu1 %v3650_v41 }
 0x88d   :  { %3653 = vmatpush3.bf16.msra.mxu1 %v3650_v41 }
 0x88e   :  { %v4414_v47 = vpack.c.bf16 %v3733_v53, %v3732_v43  ;;  %3656 = vmatprep.subr.msk.bf16.mxu1 %vm4271_vm1, %v4294_v36 }
 0x88f   :  { %v1635_v53 = vpop.permute.xlu1 %1634 }
 0x890   :  { %3666 = vmatprep.subr.msk.bf16.mxu0 %vm4271_vm1, %v4414_v47 }
 0x892   :  { %v3926_v48 = vpop.eup %3925 }
 0x893   :  { %v1300_v52 = vsel %vm679_vm8, %v3926_v48, 0.0  ;;  %v3928_v14 = vpop.eup %3927 }
 0x894   :  { %1301 = vadd.xlane.f32.xlu0 %v1300_v52  ;;  %v1303_v57 = vsel %vm679_vm8, %v3928_v14, 0.0 }
 0x898   :  { %1304 = vadd.xlane.f32.xlu0 %v1303_v57 }
 0x921   :  { %v1302_v12 = vpop.xlane.xlu0 %1301 }
 0x922   :  { %3929 = vrcp.f32 %v1302_v12 }
 0x925   :  { %v1305_v59 = vpop.xlane.xlu0 %1304 }
 0x926   :  { %3931 = vrcp.f32 %v1305_v59 }
 0x92c   :  { %v3930_v60 = vpop.eup %3929 }
 0x92d   :  { %v1307_v61 = vmul.f32 %v3930_v60, %v3926_v48 }
 0x92f   :  { %3471 = vmatprep.mubr.msk.f32.mxu1 %vm679_vm8, %v1307_v61 }
 0x930   :  { %v3932_v62 = vpop.eup %3931 }
 0x931   :  { %v1309_v63 = vmul.f32 %v3932_v62, %v3928_v14 }
 0x933   :  { %3472 = vmatmul.mubr.msk.f32.vlgmr.msra.gmra.mrb[14].mxu1 %vm679_vm8, %v1309_v63 }
 0x934   :  { %3659 = vmatpush3.bf16.xpose.msk.msra.mxu1 %vm4271_vm1, %v4294_v36  ;;  %3478 = vmatprep.mubr.msk.f32.mxu1 %vm587_vm0, %v4290_v32 }
 0x93b   :  { %3479 = vmatmul.mubr.msk.f32.vlgmr.msra.gmra.mrb[16].mxu1 %vm587_vm0, %v4288_v30 }
 0xa06   :  { %v4435_v6 = vpop.f32.mrb[14].mxu1 }
 0xa07   :  { %v4437_v7 = vpop.f32.mrb[15].mxu1 }
 0xa08   :  { %v3774_v8 = vpack.i.bf16 %v4435_v6, %v4437_v7 }
 0xa0e   :  { %v3480_v36 = vpop.f32.mrb[16].mxu1 }
 0xa0f   :  { %v1516_v9 = vpop.f32.mrb[17].mxu1  ;;  %v1526_v19 = vmul.f32 0.17677669, %v3480_v36 }
 0xa10   :  { %v1525_v15 = vmul.f32 0.17677669, %v1516_v9 }
 0xa11   :  { %v1528_v51 = vadd.f32 %v1526_v19, %v4451_v24 }
 0xa12   :  { %v1527_v25 = vadd.f32 %v1525_v15, %v4448_v44 }
 0xa13   :  { %v1532_v27 = vsel %vm679_vm8, %v1528_v51, -inf }
 0xa14   :  { %v1529_v26 = vsel %vm679_vm8, %v1527_v25, -inf }
 0xa15   :  { %1530 = vmax.xlane.f32.xlu0 %v1529_v26 }
 0xa19   :  { %1533 = vmax.xlane.f32.xlu0 %v1532_v27 }
 0xaa2   :  { %v1531_v45 = vpop.xlane.xlu0 %1530 }
 0xaa3   :  { %v1535_v46 = vsub.f32 %v1527_v25, %v1531_v45 }
 0xaa5   :  { %v1537_v28 = vmul.f32 1.442695, %v1535_v46 }
 0xaa6   :  { %v1534_v29 = vpop.xlane.xlu0 %1533 }
 0xaa7   :  { %3933 = vpow2.f32 %v1537_v28  ;;  %v1536_v55 = vsub.f32 %v1528_v51, %v1534_v29 }
 0xaa9   :  { %v1539_v31 = vmul.f32 1.442695, %v1536_v55 }
 0xaab   :  { %3935 = vpow2.f32 %v1539_v31 }
 0xab1   :  { %v3934_v49 = vpop.eup %3933 }
 0xab2   :  { %v1541_v33 = vsel %vm679_vm8, %v3934_v49, 0.0 }
 0xab3   :  { %1542 = vadd.xlane.f32.xlu0 %v1541_v33 }
 0xab5   :  { %v3936_v50 = vpop.eup %3935 }
 0xab6   :  { %v1544_v34 = vsel %vm679_vm8, %v3936_v50, 0.0 }
 0xab7   :  { %1545 = vadd.xlane.f32.xlu0 %v1544_v34 }
 0xacd   :  { %1632 = vrot.lane.b32.xlu0 %v4290_v32, %s4006_s2 }
 0xb40   :  { %v1543_v58 = vpop.xlane.xlu0 %1542 }
 0xb41   :  { %3937 = vrcp.f32 %v1543_v58 }
 0xb44   :  { %v1546_v37 = vpop.xlane.xlu0 %1545 }
 0xb45   :  { %3939 = vrcp.f32 %v1546_v37 }
 0xb48   :  { %v1633_v42 = vpop.permute.xlu0 %1632 }
 0xb4b   :  { %v3938_v38 = vpop.eup %3937 }
 0xb4c   :  { %v1548_v39 = vmul.f32 %v3938_v38, %v3934_v49 }
 0xb4e   :  { %3485 = vmatprep.mubr.msk.f32.mxu0 %vm679_vm8, %v1548_v39 }
 0xb4f   :  { %v3940_v40 = vpop.eup %3939 }
 0xb50   :  { %v1550_v41 = vmul.f32 %v3940_v40, %v3936_v50 }
 0xb52   :  { %3486 = vmatmul.mubr.msk.f32.vlgmr.msra.gmra.mrb[20].mxu0 %vm679_vm8, %v1550_v41 }
 0xb53   :  { %3669 = vmatpush3.bf16.xpose.msk.msra.mxu0 %vm4271_vm1, %v4414_v47  ;;  %3492 = vmatprep.mubr.msk.f32.mxu0 %vm587_vm0, %v1633_v42 }
 0xb5a   :  { %3493 = vmatmul.mubr.msk.f32.vlgmr.msra.gmra.mrb[22].mxu0 %vm587_vm0, %v1635_v53 }
 0xc25   :  { %v4468_v43 = vpop.f32.mrb[20].mxu0 }
 0xc26   :  { %v4470_v48 = vpop.f32.mrb[21].mxu0 }
 0xc2d   :  { %v3494_v52 = vpop.f32.mrb[22].mxu0 }
 0xc2e   :  { %v1724_v14 = vmul.f32 0.17677669, %v3494_v52  ;;  %v1714_v57 = vpop.f32.mrb[23].mxu0 }
 0xc2f   :  { %v1723_v12 = vmul.f32 0.17677669, %v1714_v57 }
 0xc30   :  { %v1726_v59 = vadd.f32 %v1724_v14, %v4451_v24 }
 0xc31   :  { %v1725_v60 = vadd.f32 %v1723_v12, %v4448_v44 }
 0xc32   :  { %v1730_v61 = vsel %vm679_vm8, %v1726_v59, -inf }
 0xc33   :  { %1731 = vmax.xlane.f32.xlu0 %v1730_v61  ;;  %v1727_v47 = vsel %vm679_vm8, %v1725_v60, -inf }
 0xc34   :  { %1728 = vmax.xlane.f32.xlu1 %v1727_v47 }
 0xc45   :  { %3735 = vrot.lane.b32.xlu1 %v4244_v56, %s4006_s2 }
 0xc49   :  { %3740 = vrot.lane.b32.xlu0 %v4292_v35, %s4008_s1  ;;  %1838 = vrot.lane.b32.xlu1 %v4290_v32, %s4008_s1 }
 0xcc0   :  { %v1732_v62 = vpop.xlane.xlu0 %1731 }
 0xcc1   :  { %v1734_v63 = vsub.f32 %v1726_v59, %v1732_v62  ;;  %v1729_v0 = vpop.xlane.xlu1 %1728 }
 0xcc2   :  { %v1733_v1 = vsub.f32 %v1725_v60, %v1729_v0 }
 0xcc3   :  { %v1737_v36 = vmul.f32 1.442695, %v1734_v63 }
 0xcc4   :  { %v1735_v9 = vmul.f32 1.442695, %v1733_v1  ;;  %v3741_v19 = vpop.permute.xlu0 %3740 }
 0xcc5   :  { %3941 = vpow2.f32 %v1737_v36  ;;  %v3736_v15 = vpop.permute.xlu1 %3735  ;;  %v3743_v25 = vunpack.i.h.bf16 %v3741_v19  ;;  %v3742_v26 = vunpack.i.l.bf16 %v3741_v19 }
 0xcc6   :  { %v3738_v51 = vunpack.i.h.bf16 %v3736_v15  ;;  %v3737_v27 = vunpack.i.l.bf16 %v3736_v15  ;;  %3943 = vpow2.f32 %v1735_v9 }
 0xcc7   :  { %v3674_v46 = vpack.c.bf16 %v3743_v25, %v3742_v26 }
 0xcc8   :  { %v3670_v45 = vpack.c.bf16 %v3738_v51, %v3737_v27 }
 0xcc9   :  { %v1839_v49 = vpop.permute.xlu1 %1838 }
 0xcca   :  { %3671 = vmatprep.subr.bf16.mxu1 %v3670_v45 }
 0xccb   :  { %3673 = vmatpush3.bf16.msra.mxu1 %v3670_v45 }
 0xccc   :  { %3676 = vmatprep.subr.msk.bf16.mxu1 %vm4271_vm1, %v3674_v46 }
 0xccf   :  { %v3942_v28 = vpop.eup %3941 }
 0xcd0   :  { %v1742_v29 = vsel %vm679_vm8, %v3942_v28, 0.0  ;;  %v3944_v55 = vpop.eup %3943 }
 0xcd1   :  { %1743 = vadd.xlane.f32.xlu1 %v1742_v29  ;;  %v1739_v31 = vsel %vm679_vm8, %v3944_v55, 0.0 }
 0xcd5   :  { %1740 = vadd.xlane.f32.xlu1 %v1739_v31 }
 0xce6   :  { %1840 = vrot.lane.b32.xlu1 %v4288_v30, %s4008_s1 }
 0xd5e   :  { %v1744_v33 = vpop.xlane.xlu1 %1743 }
 0xd5f   :  { %3945 = vrcp.f32 %v1744_v33 }
 0xd62   :  { %v1741_v50 = vpop.xlane.xlu1 %1740 }
 0xd63   :  { %3947 = vrcp.f32 %v1741_v50 }
 0xd66   :  { %v1841_v39 = vpop.permute.xlu1 %1840 }
 0xd69   :  { %v3946_v34 = vpop.eup %3945 }
 0xd6a   :  { %v1748_v38 = vmul.f32 %v3946_v34, %v3942_v28 }
 0xd6d   :  { %v3948_v58 = vpop.eup %3947 }
 0xd6e   :  { %v1746_v37 = vmul.f32 %v3948_v58, %v3944_v55 }
 0xd70   :  { %3499 = vmatprep.mubr.msk.f32.mxu1 %vm679_vm8, %v1746_v37 }
 0xd71   :  { %3500 = vmatmul.mubr.msk.f32.vlgmr.msra.gmra.mrb[18].mxu1 %vm679_vm8, %v1748_v38 }
 0xd72   :  { %3679 = vmatpush3.bf16.xpose.msk.msra.mxu1 %vm4271_vm1, %v3674_v46  ;;  %3506 = vmatprep.mubr.msk.f32.mxu1 %vm587_vm0, %v1839_v49 }
 0xd79   :  { %3507 = vmatmul.mubr.msk.f32.vlgmr.msra.gmra.mrb[20].mxu1 %vm587_vm0, %v1841_v39 }
 0xe44   :  { %v4494_v40 = vpop.f32.mrb[18].mxu1 }
 0xe45   :  { %v4496_v41 = vpop.f32.mrb[19].mxu1 }
 0xe46   :  { %v3769_v42 = vpack.i.bf16 %v4494_v40, %v4496_v41 }
 0xe4c   :  { %v3508_v53 = vpop.f32.mrb[20].mxu1 }
 0xe4d   :  { %v1930_v52 = vmul.f32 0.17677669, %v3508_v53  ;;  %v1920_v14 = vpop.f32.mrb[21].mxu1 }
 0xe4e   :  { %v1929_v57 = vmul.f32 0.17677669, %v1920_v14 }
 0xe4f   :  { %v1932_v12 = vadd.f32 %v1930_v52, %v4451_v24 }
 0xe50   :  { %v1931_v59 = vadd.f32 %v1929_v57, %v4448_v44 }
 0xe51   :  { %v1936_v60 = vsel %vm679_vm8, %v1932_v12, -inf }
 0xe52   :  { %1937 = vmax.xlane.f32.xlu0 %v1936_v60  ;;  %v1933_v61 = vsel %vm679_vm8, %v1931_v59, -inf }
 0xe53   :  { %1934 = vmax.xlane.f32.xlu1 %v1933_v61 }
 0xe64   :  { %3745 = vrot.lane.b32.xlu1 %v4244_v56, %s4008_s1 }
 0xe68   :  { %2042 = vrot.lane.b32.xlu1 %v4290_v32, %s4009_s5 }
 0xe6c   :  { %2044 = vrot.lane.b32.xlu1 %v4288_v30, %s4009_s5 }
 0xedf   :  { %v1938_v47 = vpop.xlane.xlu0 %1937 }
 0xee0   :  { %v1940_v62 = vsub.f32 %v1932_v12, %v1938_v47  ;;  %v1935_v63 = vpop.xlane.xlu1 %1934 }
 0xee1   :  { %v1939_v0 = vsub.f32 %v1931_v59, %v1935_v63 }
 0xee2   :  { %v1943_v1 = vmul.f32 1.442695, %v1940_v62 }
 0xee3   :  { %v1941_v36 = vmul.f32 1.442695, %v1939_v0 }
 0xee4   :  { %3949 = vpow2.f32 %v1943_v1  ;;  %v3746_v9 = vpop.permute.xlu1 %3745 }
 0xee5   :  { %v3748_v19 = vunpack.i.h.bf16 %v3746_v9  ;;  %v3747_v15 = vunpack.i.l.bf16 %v3746_v9  ;;  %3951 = vpow2.f32 %v1941_v36 }
 0xee7   :  { %v3680_v25 = vpack.c.bf16 %v3748_v19, %v3747_v15 }
 0xee8   :  { %v2043_v34 = vpop.permute.xlu1 %2042 }
 0xee9   :  { %3681 = vmatprep.subr.bf16.mxu0 %v3680_v25 }
 0xeea   :  { %3683 = vmatpush3.bf16.msra.mxu0 %v3680_v25 }
 0xeee   :  { %v3950_v26 = vpop.eup %3949 }
 0xeef   :  { %v1948_v32 = vsel %vm679_vm8, %v3950_v26, 0.0  ;;  %v3952_v51 = vpop.eup %3951 }
 0xef0   :  { %1949 = vadd.xlane.f32.xlu0 %v1948_v32  ;;  %v1945_v30 = vsel %vm679_vm8, %v3952_v51, 0.0 }
 0xef4   :  { %1946 = vadd.xlane.f32.xlu0 %v1945_v30 }
 0xf0a   :  { %3750 = vrot.lane.b32.xlu0 %v4292_v35, %s4009_s5  ;;  %v2045_v35 = vpop.permute.xlu1 %2044 }
 0xf7d   :  { %v1950_v27 = vpop.xlane.xlu0 %1949 }
 0xf7e   :  { %3953 = vrcp.f32 %v1950_v27 }
 0xf81   :  { %v1947_v45 = vpop.xlane.xlu0 %1946 }
 0xf82   :  { %3955 = vrcp.f32 %v1947_v45 }
 0xf85   :  { %v3751_v46 = vpop.permute.xlu0 %3750 }
 0xf86   :  { %v3753_v28 = vunpack.i.h.bf16 %v3751_v46  ;;  %v3752_v29 = vunpack.i.l.bf16 %v3751_v46 }
 0xf88   :  { %v3684_v55 = vpack.c.bf16 %v3753_v28, %v3752_v29  ;;  %v3954_v31 = vpop.eup %3953 }
 0xf89   :  { %v1954_v50 = vmul.f32 %v3954_v31, %v3950_v26 }
 0xf8a   :  { %3686 = vmatprep.subr.msk.bf16.mxu0 %vm4271_vm1, %v3684_v55 }
 0xf8c   :  { %v3956_v49 = vpop.eup %3955 }
 0xf8d   :  { %v1952_v33 = vmul.f32 %v3956_v49, %v3952_v51 }
 0xf8f   :  { %3513 = vmatprep.mubr.msk.f32.mxu0 %vm679_vm8, %v1952_v33 }
 0xf90   :  { %3514 = vmatmul.mubr.msk.f32.vlgmr.msra.gmra.mrb[24].mxu0 %vm679_vm8, %v1954_v50 }
 0xf91   :  { %3689 = vmatpush3.bf16.xpose.msk.msra.mxu0 %vm4271_vm1, %v3684_v55  ;;  %3520 = vmatprep.mubr.msk.f32.mxu0 %vm587_vm0, %v2043_v34 }
 0xf98   :  { %3521 = vmatmul.mubr.msk.f32.vlgmr.msra.gmra.mrb[26].mxu0 %vm587_vm0, %v2045_v35  ;;  %v3821_v35 = vld [vmem:[%s4783_s8] sm:$0xff]  }
 0xf99   :  { %2659 = vmatprep.mubr.bf16.mxu0 %v4005_v23 }
0x1063   :  { %v3515_v58 = vpop.f32.mrb[24].mxu0 }
0x1064   :  { %v2033_v37 = vpop.f32.mrb[25].mxu0 }
0x1065   :  { %v3779_v38 = vpack.i.bf16 %v3515_v58, %v2033_v37  ;;  %v3822_v58 = vld [vmem:[%s4783_s8 + $0x8] sm:$0xff]   ;;  %v3823_v37 = vld [vmem:[%s4783_s8 + $0x10] sm:$0xff]  }
0x106b   :  { %v3522_v39 = vpop.f32.mrb[26].mxu0 }
0x106c   :  { %v2134_v53 = vmul.f32 0.17677669, %v3522_v39  ;;  %v2124_v52 = vpop.f32.mrb[27].mxu0  ;;  %v3825_v39 = vld [vmem:[%s4783_s8 + $0x20] sm:$0xff]  }
0x106d   :  { %v2133_v14 = vmul.f32 0.17677669, %v2124_v52  ;;  %v3827_v52 = vld [vmem:[%s4783_s8 + $0x30] sm:$0xff]  }
0x106e   :  { %v2136_v57 = vadd.f32 %v2134_v53, %v4451_v24  ;;  %v3826_v53 = vld [vmem:[%s4783_s8 + $0x28] sm:$0xff]  }
0x106f   :  { %v2135_v12 = vadd.f32 %v2133_v14, %v4448_v44  ;;  %v3828_v14 = vld [vmem:[%s4783_s8 + $0x38] sm:$0xff]  }
0x1070   :  { %v2140_v18 = vsel %vm679_vm8, %v2136_v57, -inf }
0x1071   :  { %2141 = vmax.xlane.f32.xlu0 %v2140_v18  ;;  %v2137_v59 = vsel %vm679_vm8, %v2135_v12, -inf }
0x1072   :  { %2138 = vmax.xlane.f32.xlu1 %v2137_v59 }
0x1083   :  { %3755 = vrot.lane.b32.xlu1 %v4244_v56, %s4009_s5 }
0x1087   :  { %3765 = vrot.lane.b32.xlu1 %v3764_v13, %s4008_s1 }
0x108b   :  { %3770 = vrot.lane.b32.xlu1 %v3769_v42, %s4009_s5 }
0x108f   :  { %3775 = vrot.lane.b32.xlu1 %v3774_v8, %s4006_s2 }
0x10fe   :  { %v2142_v44 = vpop.xlane.xlu0 %2141 }
0x10ff   :  { %v2144_v24 = vsub.f32 %v2136_v57, %v2142_v44  ;;  %v2139_v60 = vpop.xlane.xlu1 %2138 }
0x1100   :  { %v2143_v61 = vsub.f32 %v2135_v12, %v2139_v60 }
0x1101   :  { %v2147_v56 = vmul.f32 1.442695, %v2144_v24 }
0x1102   :  { %v2145_v47 = vmul.f32 1.442695, %v2143_v61 }
0x1103   :  { %v3756_v62 = vpop.permute.xlu1 %3755 }
0x1104   :  { %3957 = vpow2.f32 %v2145_v47  ;;  %v3758_v10 = vunpack.i.h.bf16 %v3756_v62  ;;  %v3757_v11 = vunpack.i.l.bf16 %v3756_v62  ;;  %v3829_v47 = vld [vmem:[%s4784_s9] ss:$16 sps:$4 sm:$0xff]   ;;  %v3831_v62 = vld [vmem:[%s4784_s9 + $0x4] ss:$16 sps:$4 sm:$0xff]  }
0x1105   :  { %3959 = vpow2.f32 %v2147_v56  ;;  %2627 = vmatprep.subr.bf16.mxu0 %v3831_v62 }
0x1106   :  { %v3690_v13 = vpack.c.bf16 %v3758_v10, %v3757_v11  ;;  %v3832_v10 = vld [vmem:[%s4784_s9 + $0x8] ss:$16 sps:$4 sm:$0xff]   ;;  %v3834_v11 = vld [vmem:[%s4784_s9 + $0xc] ss:$16 sps:$4 sm:$0xff]   ;;  %2628 = vmatpush1.bf16.msra.mxu0 %v3829_v47 }
0x1107   :  { %v3766_v63 = vpop.permute.xlu1 %3765 }
0x1108   :  { %3691 = vmatprep.subr.bf16.mxu1 %v3690_v13  ;;  %v3768_v26 = vunpack.i.h.bf16 %v3766_v63  ;;  %v3767_v32 = vunpack.i.l.bf16 %v3766_v63  ;;  %v3837_v63 = vld [vmem:[%s4784_s9 + $0x24] ss:$16 sps:$4 sm:$0xff]  }
0x1109   :  { %3693 = vmatpush3.bf16.msra.mxu1 %v3690_v13  ;;  %v3835_v13 = vld [vmem:[%s4784_s9 + $0x20] ss:$16 sps:$4 sm:$0xff]   ;;  %2629 = vmatprep.subr.bf16.mxu0 %v3837_v63 }
0x110a   :  { %3530 = vmatprep.subr.bf16.mxu1 %v3821_v35  ;;  %2630 = vmatpush1.bf16.msra.mxu0 %v3835_v13 }
0x110b   :  { %v3771_v40 = vpop.permute.xlu1 %3770 }
0x110c   :  { %v3773_v41 = vunpack.i.h.bf16 %v3771_v40  ;;  %v3772_v42 = vunpack.i.l.bf16 %v3771_v40  ;;  %v3838_v40 = vld [vmem:[%s4784_s9 + $0x28] ss:$16 sps:$4 sm:$0xff]  }
0x110e   :  { %v3958_v6 = vpop.eup %3957  ;;  %v2271_v7 = vsel %vm587_vm0, %v4468_v43, %v3773_v41  ;;  %v2270_v8 = vsel %vm587_vm0, %v4470_v48, %v3772_v42  ;;  %v3840_v41 = vld [vmem:[%s4784_s9 + $0x2c] ss:$16 sps:$4 sm:$0xff]   ;;  %v3841_v42 = vld [vmem:[%s4784_s9 + $0x40] ss:$16 sps:$4 sm:$0xff]  }
0x110f   :  { %v2149_v0 = vsel %vm679_vm8, %v3958_v6, 0.0  ;;  %v3960_v1 = vpop.eup %3959  ;;  %v3776_v19 = vpop.permute.xlu1 %3775 }
0x1110   :  { %2150 = vadd.xlane.f32.xlu0 %v2149_v0  ;;  %v2152_v36 = vsel %vm679_vm8, %v3960_v1, 0.0  ;;  %v3778_v30 = vunpack.i.h.bf16 %v3776_v19  ;;  %v3777_v27 = vunpack.i.l.bf16 %v3776_v19 }
0x1114   :  { %2153 = vadd.xlane.f32.xlu0 %v2152_v36 }
0x112a   :  { %3760 = vrot.lane.b32.xlu0 %v3759_v22, %s4009_s5 }
0x112e   :  { %3780 = vrot.lane.b32.xlu0 %v3779_v38, %s4008_s1  ;;  %v3824_v38 = vld [vmem:[%s4783_s8 + $0x18] sm:$0xff]  }
0x119d   :  { %v2151_v9 = vpop.xlane.xlu0 %2150 }
0x119e   :  { %3961 = vrcp.f32 %v2151_v9 }
0x11a1   :  { %v2154_v43 = vpop.xlane.xlu0 %2153 }
0x11a2   :  { %3963 = vrcp.f32 %v2154_v43 }
0x11a5   :  { %v3761_v48 = vpop.permute.xlu0 %3760 }
0x11a6   :  { %v3763_v15 = vunpack.i.h.bf16 %v3761_v48  ;;  %v3762_v25 = vunpack.i.l.bf16 %v3761_v48 }
0x11a8   :  { %v3962_v51 = vpop.eup %3961  ;;  %v1422_v20 = vsel %vm587_vm0, %v4364_v16, %v3763_v15  ;;  %v1421_v21 = vsel %vm587_vm0, %v4366_v17, %v3762_v25 }
0x11a9   :  { %v3781_v22 = vpop.permute.xlu0 %3780  ;;  %v2156_v45 = vmul.f32 %v3962_v51, %v3958_v6  ;;  %v1424_v46 = vsel %vm1423_vm12, %v1421_v21, %v3767_v32  ;;  %v1425_v28 = vsel %vm1423_vm12, %v1422_v20, %v3768_v26  ;;  %v3843_v6 = vld [vmem:[%s4784_s9 + $0x44] ss:$16 sps:$4 sm:$0xff]   ;;  %v3852_v32 = vld [vmem:[%s4784_s9 + $0x6c] ss:$16 sps:$4 sm:$0xff]   ;;  %v3850_v51 = vld [vmem:[%s4784_s9 + $0x68] ss:$16 sps:$4 sm:$0xff]  }
0x11aa   :  { %v3783_v29 = vunpack.i.h.bf16 %v3781_v22  ;;  %v3782_v55 = vunpack.i.l.bf16 %v3781_v22  ;;  %v1427_v31 = vsel %vm1426_vm13, %v1424_v46, %v3777_v27  ;;  %v1428_v49 = vsel %vm1426_vm13, %v1425_v28, %v3778_v30  ;;  %2631 = vmatprep.subr.bf16.mxu0 %v3843_v6  ;;  %v3855_v30 = vld [vmem:[%s4784_s9 + $0x84] ss:$16 sps:$4 sm:$0xff]   ;;  %v3858_v27 = vld [vmem:[%s4784_s9 + $0x8c] ss:$16 sps:$4 sm:$0xff]   ;;  %v3853_v20 = vld [vmem:[%s4784_s9 + $0x80] ss:$16 sps:$4 sm:$0xff]  }
0x11ab   :  { %3527 = vmatprep.mubr.msk.f32.mxu1 %vm679_vm8, %v2156_v45  ;;  %v2276_v33 = vpack.c.bf16 %v1428_v49, %v1427_v31  ;;  %2632 = vmatpush1.bf16.msra.mxu0 %v3841_v42  ;;  %v3856_v21 = vld [vmem:[%s4784_s9 + $0x88] ss:$16 sps:$4 sm:$0xff]   ;;  %v3861_v22 = vld [vmem:[%s4784_s9 + $0xa4] ss:$16 sps:$4 sm:$0xff]   ;;  %v3864_v45 = vld [vmem:[%s4784_s9 + $0xac] ss:$16 sps:$4 sm:$0xff]  }
0x11ac   :  { %v3964_v50 = vpop.eup %3963  ;;  %v2272_v16 = vsel %vm1423_vm12, %v2270_v8, %v3782_v55  ;;  %v2273_v17 = vsel %vm1423_vm12, %v2271_v7, %v3783_v29  ;;  %v3844_v7 = vld [vmem:[%s4784_s9 + $0x48] ss:$16 sps:$4 sm:$0xff]   ;;  %v3846_v8 = vld [vmem:[%s4784_s9 + $0x4c] ss:$16 sps:$4 sm:$0xff]   ;;  %v3859_v46 = vld [vmem:[%s4784_s9 + $0xa0] ss:$16 sps:$4 sm:$0xff]  }
0x11ad   :  { %v2158_v34 = vmul.f32 %v3964_v50, %v3960_v1  ;;  %v3862_v28 = vld [vmem:[%s4784_s9 + $0xa8] ss:$16 sps:$4 sm:$0xff]   ;;  %v3865_v29 = vld [vmem:[%s4784_s9 + $0xc0] ss:$16 sps:$4 sm:$0xff]   ;;  %v3867_v55 = vld [vmem:[%s4784_s9 + $0xc4] ss:$16 sps:$4 sm:$0xff]  }
0x11ae   :  { %v3868_v31 = vld [vmem:[%s4784_s9 + $0xc8] ss:$16 sps:$4 sm:$0xff]   ;;  %v3870_v49 = vld [vmem:[%s4784_s9 + $0xcc] ss:$16 sps:$4 sm:$0xff]  }
0x11af   :  { %3528 = vmatmul.mubr.msk.f32.vlgmr.msra.gmra.mrb[22].mxu1 %vm679_vm8, %v2158_v34  ;;  %v3876_v50 = vld [vmem:[%s4784_s9 + $0xec] ss:$16 sps:$4 sm:$0xff]  }
0x11b0   :  { %3546 = vmatprep.mubr.bf16.mxu1 %v2276_v33  ;;  %3531 = vmatpush3.bf16.msra.mxu1 %v3821_v35  ;;  %v3873_v33 = vld [vmem:[%s4784_s9 + $0xe4] ss:$16 sps:$4 sm:$0xff]  }
0x11b1   :  { %3532 = vmatprep.subr.bf16.mxu1 %v3822_v58 }
0x11b4   :  { %3533 = vmatpush3.bf16.msra.mxu1 %v3822_v58 }
0x11b5   :  { %3534 = vmatprep.subr.bf16.mxu1 %v3823_v37 }
0x11b8   :  { %3535 = vmatpush3.bf16.msra.mxu1 %v3823_v37 }
0x11b9   :  { %3536 = vmatprep.subr.bf16.mxu1 %v3824_v38 }
0x11bc   :  { %3537 = vmatpush3.bf16.msra.mxu1 %v3824_v38 }
0x11bd   :  { %3538 = vmatprep.subr.bf16.mxu1 %v3825_v39 }
0x11c0   :  { %3539 = vmatpush3.bf16.msra.mxu1 %v3825_v39 }
0x11c1   :  { %3540 = vmatprep.subr.bf16.mxu1 %v3826_v53 }
0x11c4   :  { %3541 = vmatpush3.bf16.msra.mxu1 %v3826_v53 }
0x11c5   :  { %3542 = vmatprep.subr.bf16.mxu1 %v3827_v52 }
0x11c8   :  { %3543 = vmatpush3.bf16.msra.mxu1 %v3827_v52 }
0x11c9   :  { %3544 = vmatprep.subr.bf16.mxu1 %v3828_v14 }
0x11cc   :  { %3545 = vmatpush3.bf16.msra.mxu1 %v3828_v14 }
0x11cd   :  { %2680 = vmatprep.subr.bf16.mxu1 %v3834_v11 }
0x1282   :  { %v3529_v57 = vpop.f32.mrb[22].mxu1 }
0x1283   :  { %v2237_v12 = vpop.f32.mrb[23].mxu1 }
0x1284   :  { %v3784_v18 = vpack.i.bf16 %v3529_v57, %v2237_v12 }
0x1286   :  { %3785 = vrot.lane.b32.xlu1 %v3784_v18, %s4006_s2  ;;  %v2423_v18 = vld [vmem:[%s4785_s6] sm:$0x1] }
0x12f8   :  { %v3786_v59 = vpop.permute.xlu1 %3785 }
0x12f9   :  { %v3788_v44 = vunpack.i.h.bf16 %v3786_v59  ;;  %v3787_v24 = vunpack.i.l.bf16 %v3786_v59 }
0x12fb   :  { %v2275_v60 = vsel %vm1426_vm13, %v2273_v17, %v3788_v44  ;;  %v2274_v61 = vsel %vm1426_vm13, %v2272_v16, %v3787_v24  ;;  %v3871_v16 = vld [vmem:[%s4784_s9 + $0xe0] ss:$16 sps:$4 sm:$0xff]   ;;  %v3874_v17 = vld [vmem:[%s4784_s9 + $0xe8] ss:$16 sps:$4 sm:$0xff]   ;;  %v2424_v44 = vunpack.c.l.bf16 %v2423_v18 }
0x12fc   :  { %v2277_v56 = vpack.c.bf16 %v2275_v60, %v2274_v61 }
0x12fd   :  { %v2428_v61 = vrot.slane %v2424_v44, %v4182_v54 }
0x12fe   :  { %3547 = vmatmul.mubr.bf16.vlgmr.msra.gmra.mrb[24].mxu1 %v2277_v56 }
0x12ff   :  { %2712 = vmatprep.mubr.bf16.mxu1 %v4005_v23  ;;  %2681 = vmatpush1.bf16.msra.mxu1 %v3832_v10 }
0x1300   :  { %2682 = vmatprep.subr.bf16.mxu1 %v3840_v41 }
0x1303   :  { %2683 = vmatpush1.bf16.msra.mxu1 %v3838_v40 }
0x1304   :  { %2684 = vmatprep.subr.bf16.mxu1 %v3846_v8  ;;  %v3878_v8 = vld [vmem:[%s4786_s10] sm:$0xff]  }
0x1307   :  { %2685 = vmatpush1.bf16.msra.mxu1 %v3844_v7  ;;  %v3877_v7 = vld [vmem:[%s4786_s10 + $0x40] sm:$0xff]  }
0x1308   :  { %2686 = vmatprep.subr.bf16.mxu1 %v3852_v32  ;;  %v3889_v32 = vld [vmem:[%s4786_s10 + $0x70] sm:$0xff]  }
0x130b   :  { %2687 = vmatpush1.bf16.msra.mxu1 %v3850_v51  ;;  %v3891_v51 = vld [vmem:[%s4786_s10 + $0x78] sm:$0xff]  }
0x130c   :  { %2688 = vmatprep.subr.bf16.mxu1 %v3858_v27 }
0x130f   :  { %2689 = vmatpush1.bf16.msra.mxu1 %v3856_v21 }
0x1310   :  { %2690 = vmatprep.subr.bf16.mxu1 %v3864_v45 }
0x1313   :  { %2691 = vmatpush1.bf16.msra.mxu1 %v3862_v28 }
0x1314   :  { %2692 = vmatprep.subr.bf16.mxu1 %v3870_v49 }
0x1317   :  { %2693 = vmatpush1.bf16.msra.mxu1 %v3868_v31 }
0x1318   :  { %2694 = vmatprep.subr.bf16.mxu1 %v3876_v50 }
0x131b   :  { %2695 = vmatpush1.bf16.msra.mxu1 %v3874_v17 }
0x13d1   :  { %v3548_v0 = vpop.f32.mrb[24].mxu1 }
0x13d2   :  { %v2376_v1 = vpop.f32.mrb[25].mxu1  ;;  %v4632_v19 = vadd.f32 %v3548_v0, %v4080_v4  ;;  %v3879_v0 = vld [vmem:[%s4786_s10 + $0x48] sm:$0xff]  }
0x13d3   :  { %v4629_v36 = vadd.f32 %v4076_v2, %v2376_v1  ;;  %v3549_v9 = vpop.f32.mrb[26].mxu1  ;;  %v3881_v1 = vld [vmem:[%s4786_s10 + $0x50] sm:$0xff]  }
0x13d4   :  { %v2379_v43 = vpop.f32.mrb[27].mxu1  ;;  %v4642_v26 = vadd.f32 %v3549_v9, %v4082_v5  ;;  %v2397_v2 = vmul.f32 %v4632_v19, %v4632_v19  ;;  %v3847_v5 = vld [vmem:[%s4784_s9 + $0x60] ss:$16 sps:$4 sm:$0xff]  }
0x13d5   :  { %v4635_v48 = vadd.f32 %v4078_v3, %v2379_v43  ;;  %v2395_v15 = vmul.f32 %v4629_v36, %v4629_v36  ;;  %v3849_v3 = vld [vmem:[%s4784_s9 + $0x64] ss:$16 sps:$4 sm:$0xff]   ;;  %v3883_v43 = vld [vmem:[%s4786_s10 + $0x58] sm:$0xff]  }
0x13d6   :  { %v2398_v4 = vmul.f32 %v4642_v26, %v4642_v26  ;;  %2633 = vmatprep.subr.bf16.mxu0 %v3849_v3  ;;  %v3882_v9 = vld [vmem:[%s4786_s10 + $0x10] sm:$0xff]   ;;  %v3888_v3 = vld [vmem:[%s4786_s10 + $0x28] sm:$0xff]  }
0x13d7   :  { %2399 = vadd.xlane.f32.xlu0 %v2395_v15  ;;  %v2396_v25 = vmul.f32 %v4635_v48, %v4635_v48  ;;  %2634 = vmatpush1.bf16.msra.mxu0 %v3847_v5  ;;  %v3884_v15 = vld [vmem:[%s4786_s10 + $0x18] sm:$0xff]   ;;  %v3890_v5 = vld [vmem:[%s4786_s10 + $0x30] sm:$0xff]  }
0x13d8   :  { %2635 = vmatprep.subr.bf16.mxu0 %v3855_v30  ;;  %v3892_v30 = vld [vmem:[%s4786_s10 + $0x38] sm:$0xff]  }
0x13d9   :  { %2401 = vadd.xlane.f32.xlu1 %v2396_v25  ;;  %v3885_v25 = vld [vmem:[%s4786_s10 + $0x60] sm:$0xff]  }
0x13db   :  { %2403 = vadd.xlane.f32.xlu0 %v2397_v2  ;;  %2636 = vmatpush1.bf16.msra.mxu0 %v3853_v20  ;;  %v3886_v2 = vld [vmem:[%s4786_s10 + $0x20] sm:$0xff]  }
0x13dc   :  { %2637 = vmatprep.subr.bf16.mxu0 %v3861_v22 }
0x13df   :  { %2405 = vadd.xlane.f32.xlu0 %v2398_v4  ;;  %2638 = vmatpush1.bf16.msra.mxu0 %v3859_v46  ;;  %v3887_v4 = vld [vmem:[%s4786_s10 + $0x68] sm:$0xff]  }
0x13e0   :  { %2639 = vmatprep.subr.bf16.mxu0 %v3867_v55 }
0x13e3   :  { %2640 = vmatpush1.bf16.msra.mxu0 %v3865_v29 }
0x13e4   :  { %2641 = vmatprep.subr.bf16.mxu0 %v3873_v33 }
0x13e7   :  { %2642 = vmatpush1.bf16.msra.mxu0 %v3871_v16 }
0x13e8   :  { %3294 = vmatprep.subr.bf16.mxu0 %v3877_v7 }
0x1464   :  { %v2400_v34 = vpop.xlane.xlu0 %2399 }
0x1465   :  { %v2407_v35 = vmul.f32 0.0078125, %v2400_v34 }
0x1466   :  { %v2402_v58 = vpop.xlane.xlu1 %2401 }
0x1467   :  { %v2411_v37 = vadd.f32 1e-06, %v2407_v35  ;;  %v2408_v38 = vmul.f32 0.0078125, %v2402_v58 }
0x1468   :  { %v2404_v39 = vpop.xlane.xlu0 %2403 }
0x1469   :  { %3965 = vrsqrt.f32 %v2411_v37  ;;  %v2412_v53 = vadd.f32 1e-06, %v2408_v38  ;;  %v2409_v52 = vmul.f32 0.0078125, %v2404_v39 }
0x146b   :  { %3967 = vrsqrt.f32 %v2412_v53  ;;  %v2413_v14 = vadd.f32 1e-06, %v2409_v52 }
0x146c   :  { %v2406_v57 = vpop.xlane.xlu0 %2405 }
0x146d   :  { %v2410_v12 = vmul.f32 0.0078125, %v2406_v57  ;;  %3969 = vrsqrt.f32 %v2413_v14 }
0x146f   :  { %v2414_v59 = vadd.f32 1e-06, %v2410_v12 }
0x1471   :  { %3971 = vrsqrt.f32 %v2414_v59 }
0x1473   :  { %v3966_v24 = vpop.eup %3965 }
0x1474   :  { %v2419_v60 = vmul.f32 %v3966_v24, %v4629_v36 }
0x1475   :  { %v3968_v56 = vpop.eup %3967 }
0x1476   :  { %v2420_v47 = vmul.f32 %v3968_v56, %v4635_v48  ;;  %v2429_v62 = vmul.f32 %v2428_v61, %v2419_v60 }
0x1477   :  { %v3970_v11 = vpop.eup %3969 }
0x1478   :  { %v2430_v10 = vmul.f32 %v2428_v61, %v2420_v47  ;;  %v2421_v40 = vmul.f32 %v3970_v11, %v4632_v19 }
0x147a   :  { %v2433_v13 = vpack.c.bf16 %v2430_v10, %v2429_v62  ;;  %v2431_v54 = vmul.f32 %v2428_v61, %v2421_v40 }
0x147b   :  { %v3972_v63 = vpop.eup %3971 }
0x147c   :  { %2660 = vmatmul.mubr.bf16.vlgmr.msra.gmra.mrb[28].mxu0 %v2433_v13  ;;  %2713 = vmatmul.mubr.bf16.vlgmr.msra.gmra.mrb[28].mxu1 %v2433_v13  ;;  %v2422_v41 = vmul.f32 %v3972_v63, %v4642_v26 }
0x147d   :  { %2669 = vmatprep.mubr.bf16.mxu0 %v4005_v23  ;;  %2722 = vmatprep.mubr.bf16.mxu1 %v4005_v23  ;;  %v3880_v23 = vld [vmem:[%s4786_s10 + $0x8] sm:$0xff]  }
0x147e   :  { %v2432_v42 = vmul.f32 %v2428_v61, %v2422_v41  ;;  %3295 = vmatpush3.bf16.msra.mxu0 %v3878_v8 }
0x147f   :  { %3296 = vmatprep.subr.bf16.mxu0 %v3879_v0 }
0x1480   :  { %v2434_v6 = vpack.c.bf16 %v2432_v42, %v2431_v54 }
0x1482   :  { %3297 = vmatpush3.bf16.msra.mxu0 %v3880_v23 }
0x1483   :  { %3298 = vmatprep.subr.bf16.mxu0 %v3881_v1 }
0x1484   :  { %2670 = vmatmul.mubr.bf16.gmra.mrb[32].mxu0 %v2434_v6  ;;  %2723 = vmatmul.mubr.bf16.gmra.mrb[32].mxu1 %v2434_v6 }
0x1486   :  { %3299 = vmatpush3.bf16.msra.mxu0 %v3882_v9 }
0x1487   :  { %3300 = vmatprep.subr.bf16.mxu0 %v3883_v43 }
0x148a   :  { %3301 = vmatpush3.bf16.msra.mxu0 %v3884_v15 }
0x148b   :  { %3302 = vmatprep.subr.bf16.mxu0 %v3885_v25 }
0x148e   :  { %3303 = vmatpush3.bf16.msra.mxu0 %v3886_v2 }
0x148f   :  { %3304 = vmatprep.subr.bf16.mxu0 %v3887_v4 }
0x1492   :  { %3305 = vmatpush3.bf16.msra.mxu0 %v3888_v3 }
0x1493   :  { %3306 = vmatprep.subr.bf16.mxu0 %v3889_v32 }
0x1496   :  { %3307 = vmatpush3.bf16.msra.mxu0 %v3890_v5 }
0x1497   :  { %3308 = vmatprep.subr.bf16.mxu0 %v3891_v51 }
0x149a   :  { %3309 = vmatpush3.bf16.msra.mxu0 %v3892_v30 }
0x154f   :  { %v2661_v27 = vpop.f32.mrb[28].mxu0  ;;  %v2714_v20 = vpop.f32.mrb[28].mxu1 }
0x1550   :  { %v3118_v21 = vmul.f32 -1.442695, %v2661_v27  ;;  %v2663_v22 = vpop.f32.mrb[29].mxu0  ;;  %v2716_v45 = vpop.f32.mrb[29].mxu1 }
0x1551   :  { %v3119_v46 = vmul.f32 -1.442695, %v2663_v22  ;;  %v2665_v28 = vpop.f32.mrb[30].mxu0  ;;  %v2718_v29 = vpop.f32.mrb[30].mxu1 }
0x1552   :  { %3973 = vpow2.f32 %v3118_v21  ;;  %v3120_v55 = vmul.f32 -1.442695, %v2665_v28  ;;  %v2667_v31 = vpop.f32.mrb[31].mxu0  ;;  %v2720_v49 = vpop.f32.mrb[31].mxu1 }
0x1553   :  { %3975 = vpow2.f32 %v3119_v46  ;;  %v3121_v33 = vmul.f32 -1.442695, %v2667_v31 }
0x1554   :  { %3977 = vpow2.f32 %v3120_v55 }
0x1555   :  { %3979 = vpow2.f32 %v3121_v33 }
0x1557   :  { %v2671_v50 = vpop.f32.mrb[32].mxu0  ;;  %v2724_v16 = vpop.f32.mrb[32].mxu1 }
0x1558   :  { %v3122_v17 = vmul.f32 -1.442695, %v2671_v50  ;;  %v2673_v34 = vpop.f32.mrb[33].mxu0  ;;  %v2726_v35 = vpop.f32.mrb[33].mxu1 }
0x1559   :  { %v3123_v58 = vmul.f32 -1.442695, %v2673_v34  ;;  %v2675_v37 = vpop.f32.mrb[34].mxu0  ;;  %v2728_v38 = vpop.f32.mrb[34].mxu1 }
0x155a   :  { %3981 = vpow2.f32 %v3122_v17  ;;  %v3124_v39 = vmul.f32 -1.442695, %v2675_v37  ;;  %v2677_v53 = vpop.f32.mrb[35].mxu0  ;;  %v2730_v52 = vpop.f32.mrb[35].mxu1 }
0x155b   :  { %3983 = vpow2.f32 %v3123_v58  ;;  %v3125_v14 = vmul.f32 -1.442695, %v2677_v53 }
0x155c   :  { %v3974_v57 = vpop.eup %3973  ;;  %3985 = vpow2.f32 %v3124_v39 }
0x155d   :  { %v3976_v12 = vpop.eup %3975  ;;  %v2757_v18 = vadd.f32 1.0, %v3974_v57  ;;  %3987 = vpow2.f32 %v3125_v14 }
0x155e   :  { %v3978_v59 = vpop.eup %3977  ;;  %v2758_v44 = vadd.f32 1.0, %v3976_v12 }
0x155f   :  { %v3980_v24 = vpop.eup %3979  ;;  %3989 = vrcp.f32 %v2757_v18  ;;  %v2759_v60 = vadd.f32 1.0, %v3978_v59 }
0x1560   :  { %3991 = vrcp.f32 %v2758_v44  ;;  %v2760_v61 = vadd.f32 1.0, %v3980_v24 }
0x1561   :  { %3993 = vrcp.f32 %v2759_v60 }
0x1562   :  { %3995 = vrcp.f32 %v2760_v61 }
0x1564   :  { %v3982_v56 = vpop.eup %3981 }
0x1565   :  { %v3984_v47 = vpop.eup %3983  ;;  %v2761_v62 = vadd.f32 1.0, %v3982_v56 }
0x1566   :  { %v3986_v10 = vpop.eup %3985  ;;  %v2762_v11 = vadd.f32 1.0, %v3984_v47 }
0x1567   :  { %v3988_v13 = vpop.eup %3987  ;;  %3997 = vrcp.f32 %v2761_v62  ;;  %v2763_v63 = vadd.f32 1.0, %v3986_v10 }
0x1568   :  { %3999 = vrcp.f32 %v2762_v11  ;;  %v2764_v40 = vadd.f32 1.0, %v3988_v13 }
0x1569   :  { %v3990_v41 = vpop.eup %3989  ;;  %4001 = vrcp.f32 %v2763_v63 }
0x156a   :  { %v3992_v42 = vpop.eup %3991  ;;  %v2781_v54 = vmul.f32 %v3990_v41, %v2661_v27  ;;  %4003 = vrcp.f32 %v2764_v40 }
0x156b   :  { %v3994_v6 = vpop.eup %3993  ;;  %v2782_v7 = vmul.f32 %v3992_v42, %v2663_v22 }
0x156c   :  { %v3996_v8 = vpop.eup %3995  ;;  %v2789_v0 = vmul.f32 %v2781_v54, %v2714_v20  ;;  %v2783_v23 = vmul.f32 %v3994_v6, %v2665_v28 }
0x156d   :  { %v2790_v1 = vmul.f32 %v2782_v7, %v2716_v45  ;;  %v2784_v9 = vmul.f32 %v3996_v8, %v2667_v31 }
0x156e   :  { %v2791_v43 = vmul.f32 %v2783_v23, %v2718_v29 }
0x156f   :  { %v2792_v15 = vmul.f32 %v2784_v9, %v2720_v49 }
0x1570   :  { %v2797_v25 = vpack.c.bf16 %v2791_v43, %v2789_v0 }
0x1571   :  { %v3998_v2 = vpop.eup %3997  ;;  %v2798_v4 = vpack.c.bf16 %v2792_v15, %v2790_v1 }
0x1572   :  { %v4000_v3 = vpop.eup %3999  ;;  %v2785_v32 = vmul.f32 %v3998_v2, %v2671_v50 }
0x1573   :  { %v4002_v5 = vpop.eup %4001  ;;  %v2786_v51 = vmul.f32 %v4000_v3, %v2673_v34  ;;  %2961 = vmatprep.mubr.bf16.mxu0 %v2798_v4 }
0x1574   :  { %v4004_v30 = vpop.eup %4003  ;;  %v2793_v27 = vmul.f32 %v2785_v32, %v2724_v16  ;;  %v2787_v21 = vmul.f32 %v4002_v5, %v2675_v37  ;;  %2962 = vmatmul.mubr.bf16.vlgmr.msra.gmra.mrb[36].mxu0 %v2797_v25 }
0x1575   :  { %v2794_v22 = vmul.f32 %v2786_v51, %v2726_v35  ;;  %v2788_v46 = vmul.f32 %v4004_v30, %v2677_v53 }
0x1576   :  { %v2795_v20 = vmul.f32 %v2787_v21, %v2728_v38 }
0x1577   :  { %v2796_v28 = vmul.f32 %v2788_v46, %v2730_v52 }
0x1578   :  { %v2799_v45 = vpack.c.bf16 %v2795_v20, %v2793_v27 }
0x1579   :  { %v2800_v55 = vpack.c.bf16 %v2796_v28, %v2794_v22 }
0x157b   :  { %2969 = vmatprep.mubr.bf16.mxu0 %v2800_v55 }
0x157c   :  { %2970 = vmatmul.mubr.bf16.gmra.mrb[40].mxu0 %v2799_v45 }
0x1647   :  { %v3310_v29 = vpop.f32.mrb[36].mxu0 }
0x1648   :  { %v3311_v31 = vpop.f32.mrb[37].mxu0 }
0x1649   :  { %v3312_v49 = vadd.f32 %v3311_v31, %v3310_v29  ;;  %v3313_v33 = vpop.f32.mrb[38].mxu0 }
0x164a   :  { %v3314_v50 = vpop.f32.mrb[39].mxu0 }
0x164b   :  { %v3315_v17 = vadd.f32 %v3314_v50, %v3313_v33  ;;  %v2978_v34 = vadd.f32 %v3312_v49, %v4629_v36 }
0x164d   :  { %v2979_v16 = vadd.f32 %v3315_v17, %v4635_v48 }
0x164f   :  { %v3161_v58 = vpack.c.bf16 %v2979_v16, %v2978_v34  ;;  %v3316_v37 = vpop.f32.mrb[40].mxu0 }
0x1650   :  { %v3317_v35 = vpop.f32.mrb[41].mxu0 }
0x1651   :  { %3162 = vst [vmem:[%s4787_s11] sm:$0xff] %v3161_v58   ;;  %v3318_v38 = vadd.f32 %v3317_v35, %v3316_v37  ;;  %v3319_v39 = vpop.f32.mrb[42].mxu0 }
0x1652   :  { %v3320_v53 = vpop.f32.mrb[43].mxu0 }
0x1653   :  { %v3321_v52 = vadd.f32 %v3320_v53, %v3319_v39  ;;  %v2980_v14 = vadd.f32 %v3318_v38, %v4632_v19 }
0x1655   :  { %v2981_v57 = vadd.f32 %v3321_v52, %v4642_v26 }
0x1657   :  { %v3166_v12 = vpack.c.bf16 %v2981_v57, %v2980_v14 }
0x1659   :  { %3169 = vst [vmem:[%s4787_s11 + $0x8] sm:$0xff] %v3166_v12  }

</bundles_post_ra>
